<compile_context>
chip_gen: v7x
topology: tpu7x:2x2x1
jax: 0.10.0
libtpu: 0.0.40
codegen_flags: <defaults>
</compile_context>

<pallas_src>
import jax
import jax.numpy as jnp
from jax import lax
from jax.experimental import pallas as pl
from jax.experimental.pallas import tpu as pltpu

H_DIM = 256 + 7   # 263
Z_DIM = 32
D1_C = 128        # deconv1 out channels
D1_K = 5          # deconv1 kernel size


# ---------------- fused FC / reparameterize / fcExpand / deconv1(1x1) ----------------
def _fc_deconv1_kernel(enc_ref, eps_ref, wmu_ref, bmu_ref, wlv_ref, blv_ref,
                       wexp_ref, bexp_ref, w1_ref, b1_ref, o_ref):
    x = enc_ref[...]                                                    # (B, 263)
    mu = jnp.dot(x, wmu_ref[...], preferred_element_type=jnp.float32) + bmu_ref[...]
    logvar = jnp.dot(x, wlv_ref[...], preferred_element_type=jnp.float32) + blv_ref[...]
    z = eps_ref[...] * jnp.exp(0.5 * logvar) + mu                       # reparameterize
    h = jnp.dot(z, wexp_ref[...], preferred_element_type=jnp.float32) + bexp_ref[...]
    # deconv1 on a 1x1 spatial input == linear layer with lane-dense N = 5*5*128
    d1 = jnp.dot(h.astype(w1_ref.dtype), w1_ref[...],
                 preferred_element_type=jnp.float32) + b1_ref[...]
    o_ref[...] = jnp.maximum(d1, 0.0).astype(o_ref.dtype)               # fused ReLU


def fc_reparam_deconv1(enc, eps, wmu, bmu, wlv, blv, wexp, bexp, w1_mat, b1_full):
    B = enc.shape[0]
    return pl.pallas_call(
        _fc_deconv1_kernel,
        out_shape=jax.ShapeDtypeStruct((B, D1_K * D1_K * D1_C), jnp.bfloat16),
    )(enc, eps, wmu, bmu, wlv, blv, wexp, bexp, w1_mat, b1_full)


# ---------------- batched GEMM kernel (used for deconv2/3/4) ----------------
def _gemm_kernel(x_ref, w_ref, o_ref):
    o_ref[0] = jnp.dot(x_ref[0], w_ref[...], preferred_element_type=jnp.float32)


def batched_gemm(x, w):
    """x: (B, M, K) bf16, w: (K, N) bf16 -> (B, M, N) f32; grid over batch."""
    B, M, K = x.shape
    N = w.shape[1]
    return pl.pallas_call(
        _gemm_kernel,
        out_shape=jax.ShapeDtypeStruct((B, M, N), jnp.float32),
        grid_spec=pltpu.PrefetchScalarGridSpec(
            num_scalar_prefetch=0,
            grid=(B,),
            in_specs=[
                pl.BlockSpec((1, M, K), lambda b: (b, 0, 0)),
                pl.BlockSpec((K, N), lambda b: (0, 0)),
            ],
            out_specs=pl.BlockSpec((1, M, N), lambda b: (b, 0, 0)),
        ),
        compiler_params=pltpu.CompilerParams(
            dimension_semantics=("parallel",)),
    )(x, w)


# ---------------- ConvTranspose2d = Pallas GEMM + col2im (overlap-add) glue ----------------
def conv_transpose2d(x, w_mat, b, *, k, stride, apply_relu):
    """PyTorch ConvTranspose2d (padding=0) on NHWC x via GEMM + col2im.

    x: (B, Hin, Win, Cin) ;  w_mat: (Cin, k*k*Cout) bf16 (from PyTorch
    weight.transpose(0,2,3,1).reshape) ;  b: (Cout,) f32.
    Returns (B, Hout, Wout, Cout) f32 with Hout = (Hin-1)*stride + k.
    """
    B, Hin, Win, Cin = x.shape
    Cout = w_mat.shape[1] // (k * k)
    Hout = (Hin - 1) * stride + k
    Wout = (Win - 1) * stride + k

    # Pallas GEMM: (B, Hin*Win, Cin) @ (Cin, k*k*Cout), f32 accumulate.
    y = batched_gemm(x.reshape(B, Hin * Win, Cin).astype(jnp.bfloat16), w_mat)
    y = y.reshape(B, Hin, Win, k, k, Cout)

    # col2im overlap-add: place tap (ky,kx) at output (stride*iy+ky, stride*ix+kx).
    # Expressed as k*k interior-padded (dilated) placements + adds — fusible
    # elementwise data movement in XLA, no scatter, no zero-dilated GEMM input.
    # TODO(synk): overlap-add could be moved in-kernel with strided VMEM stores;
    # kept in XLA glue here as pure data movement for robustness.
    span_h = (Hin - 1) * stride + 1
    span_w = (Win - 1) * stride + 1
    zero = jnp.zeros((), y.dtype)
    out = jnp.zeros((B, Hout, Wout, Cout), jnp.float32)
    for ky in range(k):
        for kx in range(k):
            placed = lax.pad(
                y[:, :, :, ky, kx, :], zero,
                ((0, 0, 0),
                 (ky, Hout - ky - span_h, stride - 1),
                 (kx, Wout - kx - span_w, stride - 1),
                 (0, 0, 0)))
            out = out + placed
    out = out + b.reshape(1, 1, 1, Cout)
    if apply_relu:
        out = jnp.maximum(out, 0.0)
    return out


# ---------------- parameter init (deterministic, synthetic) ----------------
def init_params(key):
    def linear(k, fan_in, fan_out):
        k1, k2 = jax.random.split(k)
        return (jax.random.normal(k1, (fan_in, fan_out), jnp.float32) * 0.05,
                jax.random.normal(k2, (fan_out,), jnp.float32) * 0.05)

    def convt(k, cin, cout, ksz):
        k1, k2 = jax.random.split(k)
        return (jax.random.normal(k1, (cin, cout, ksz, ksz), jnp.float32) * 0.05,
                jax.random.normal(k2, (cout,), jnp.float32) * 0.05)

    keys = jax.random.split(key, 7)
    return dict(
        fcMu=linear(keys[0], H_DIM, Z_DIM),
        fcLogVar=linear(keys[1], H_DIM, Z_DIM),
        fcExpand=linear(keys[2], Z_DIM, H_DIM),
        deconv1=convt(keys[3], H_DIM, 128, 5),
        deconv2=convt(keys[4], 128, 64, 5),
        deconv3=convt(keys[5], 64, 32, 6),
        deconv4=convt(keys[6], 32, 3, 6),
    )


def _deconv_wmat(w):
    """PyTorch ConvTranspose2d weight (Cin, Cout, k, k) -> GEMM matrix (Cin, k*k*Cout)."""
    cin, cout, k, _ = w.shape
    return jnp.transpose(w, (0, 2, 3, 1)).reshape(cin, k * k * cout).astype(jnp.bfloat16)


# ---------------- full forward ----------------
def vae_decoder_forward(params, representation, view, eps):
    # representation: (B, 256, 1, 1) NCHW, view: (B, 7), eps: (B, Z_DIM)
    B = representation.shape[0]
    # torch.cat((representation, view[:, :, None, None]), dim=1).view(-1, 263)
    enc = jnp.concatenate([representation.reshape(B, 256), view], axis=1)   # (B, 263)

    wmu, bmu = params['fcMu']
    wlv, blv = params['fcLogVar']
    wexp, bexp = params['fcExpand']
    w1, b1 = params['deconv1']                                   # (263,128,5,5), (128,)
    # deconv1 as a linear layer: out[b, (ky*5+kx)*128 + co] = sum_ci z[ci] * w1[ci,co,ky,kx]
    w1_mat = jnp.transpose(w1, (0, 2, 3, 1)).reshape(H_DIM, D1_K * D1_K * D1_C)
    w1_mat = w1_mat.astype(jnp.bfloat16)
    b1_full = jnp.tile(b1, D1_K * D1_K).reshape(1, D1_K * D1_K * D1_C)

    h1 = fc_reparam_deconv1(enc, eps,
                            wmu, bmu.reshape(1, -1),
                            wlv, blv.reshape(1, -1),
                            wexp, bexp.reshape(1, -1),
                            w1_mat, b1_full)                     # (B, 5*5*128) bf16, post-ReLU
    h1 = h1.reshape(B, D1_K, D1_K, D1_C)                         # (B, 5, 5, 128) NHWC

    w2, b2 = params['deconv2']
    w3, b3 = params['deconv3']
    w4, b4 = params['deconv4']
    h2 = conv_transpose2d(h1, _deconv_wmat(w2), b2, k=5, stride=2, apply_relu=True)    # (B,13,13,64)
    h3 = conv_transpose2d(h2, _deconv_wmat(w3), b3, k=6, stride=2, apply_relu=True)    # (B,30,30,32)
    img = conv_transpose2d(h3, _deconv_wmat(w4), b4, k=6, stride=2, apply_relu=False)  # (B,64,64,3)
    return img   # NHWC == PyTorch output.permute([0, 2, 3, 1])


if __name__ == "__main__":
    key = jax.random.PRNGKey(0)
    kp, kr, kv, ke = jax.random.split(key, 4)
    params = init_params(kp)

    B = 2
    representation = jax.random.normal(kr, (B, 256, 1, 1), jnp.float32)
    view = jax.random.normal(kv, (B, 7), jnp.float32)
    # eps plays the role of torch.randn_like(std) in reparameterize (deterministic here)
    eps = jax.random.normal(ke, (B, Z_DIM), jnp.float32)

    out = jax.jit(vae_decoder_forward)(params, representation, view, eps)
    out = jax.block_until_ready(out)
    assert out.shape == (B, 64, 64, 3), out.shape
    assert bool(jnp.all(jnp.isfinite(out)))
    print("KERNEL_OK")
</pallas_src>

<mosaic_0001>
module attributes {stable_mosaic.version = 11 : i64} {
  func.func @_fc_deconv1_kernel(%arg0: memref<2x263xf32, #tpu.memory_space<vmem>>, %arg1: memref<2x32xf32, #tpu.memory_space<vmem>>, %arg2: memref<263x32xf32, #tpu.memory_space<vmem>>, %arg3: memref<1x32xf32, #tpu.memory_space<vmem>>, %arg4: memref<263x32xf32, #tpu.memory_space<vmem>>, %arg5: memref<1x32xf32, #tpu.memory_space<vmem>>, %arg6: memref<32x263xf32, #tpu.memory_space<vmem>>, %arg7: memref<1x263xf32, #tpu.memory_space<vmem>>, %arg8: memref<263x3200xbf16, #tpu.memory_space<vmem>>, %arg9: memref<1x3200xf32, #tpu.memory_space<vmem>>, %arg10: memref<2x3200xbf16, #tpu.memory_space<vmem>>) attributes {dimension_semantics = [], scalar_prefetch = 0 : i64, scratch_operands = 0 : i64, tpu.core_type = #tpu.core_type<tc>} {
    %c0 = arith.constant 0 : index
    %c0_0 = arith.constant 0 : index
    %0 = vector.load %arg0[%c0, %c0_0] : memref<2x263xf32, #tpu.memory_space<vmem>>, vector<2x263xf32>
    %c0_1 = arith.constant 0 : index
    %c0_2 = arith.constant 0 : index
    %1 = vector.load %arg2[%c0_1, %c0_2] : memref<263x32xf32, #tpu.memory_space<vmem>>, vector<263x32xf32>
    %cst = arith.constant dense<0.000000e+00> : vector<2x32xf32>
    %2 = tpu.matmul %0, %1, %cst {dimension_numbers = #tpu.dot_dimension_numbers<[1], [0], [0], [1], [0, 0, 1, 1], [], []>} : vector<2x263xf32>, vector<263x32xf32>, vector<2x32xf32> -> vector<2x32xf32>
    %c0_3 = arith.constant 0 : index
    %c0_4 = arith.constant 0 : index
    %3 = vector.load %arg3[%c0_3, %c0_4] : memref<1x32xf32, #tpu.memory_space<vmem>>, vector<1x32xf32>
    %4 = vector.broadcast %3 : vector<1x32xf32> to vector<2x32xf32>
    %5 = arith.addf %2, %4 : vector<2x32xf32>
    %c0_5 = arith.constant 0 : index
    %c0_6 = arith.constant 0 : index
    %6 = vector.load %arg4[%c0_5, %c0_6] : memref<263x32xf32, #tpu.memory_space<vmem>>, vector<263x32xf32>
    %cst_7 = arith.constant dense<0.000000e+00> : vector<2x32xf32>
    %7 = tpu.matmul %0, %6, %cst_7 {dimension_numbers = #tpu.dot_dimension_numbers<[1], [0], [0], [1], [0, 0, 1, 1], [], []>} : vector<2x263xf32>, vector<263x32xf32>, vector<2x32xf32> -> vector<2x32xf32>
    %c0_8 = arith.constant 0 : index
    %c0_9 = arith.constant 0 : index
    %8 = vector.load %arg5[%c0_8, %c0_9] : memref<1x32xf32, #tpu.memory_space<vmem>>, vector<1x32xf32>
    %9 = vector.broadcast %8 : vector<1x32xf32> to vector<2x32xf32>
    %10 = arith.addf %7, %9 : vector<2x32xf32>
    %c0_10 = arith.constant 0 : index
    %c0_11 = arith.constant 0 : index
    %11 = vector.load %arg1[%c0_10, %c0_11] : memref<2x32xf32, #tpu.memory_space<vmem>>, vector<2x32xf32>
    %cst_12 = arith.constant 5.000000e-01 : f32
    %12 = vector.broadcast %cst_12 : f32 to vector<2x32xf32>
    %13 = arith.mulf %12, %10 : vector<2x32xf32>
    %14 = math.exp %13 : vector<2x32xf32>
    %15 = arith.mulf %11, %14 : vector<2x32xf32>
    %16 = arith.addf %15, %5 : vector<2x32xf32>
    %c0_13 = arith.constant 0 : index
    %c0_14 = arith.constant 0 : index
    %17 = vector.load %arg6[%c0_13, %c0_14] : memref<32x263xf32, #tpu.memory_space<vmem>>, vector<32x263xf32>
    %cst_15 = arith.constant dense<0.000000e+00> : vector<2x263xf32>
    %18 = tpu.matmul %16, %17, %cst_15 {dimension_numbers = #tpu.dot_dimension_numbers<[1], [0], [0], [1], [0, 0, 1, 1], [], []>} : vector<2x32xf32>, vector<32x263xf32>, vector<2x263xf32> -> vector<2x263xf32>
    %c0_16 = arith.constant 0 : index
    %c0_17 = arith.constant 0 : index
    %19 = vector.load %arg7[%c0_16, %c0_17] : memref<1x263xf32, #tpu.memory_space<vmem>>, vector<1x263xf32>
    %20 = vector.broadcast %19 : vector<1x263xf32> to vector<2x263xf32>
    %21 = arith.addf %18, %20 : vector<2x263xf32>
    %22 = arith.truncf %21 : vector<2x263xf32> to vector<2x263xbf16>
    %c0_18 = arith.constant 0 : index
    %c0_19 = arith.constant 0 : index
    %23 = vector.load %arg8[%c0_18, %c0_19] : memref<263x3200xbf16, #tpu.memory_space<vmem>>, vector<263x3200xbf16>
    %cst_20 = arith.constant dense<0.000000e+00> : vector<2x3200xf32>
    %24 = tpu.matmul %22, %23, %cst_20 {dimension_numbers = #tpu.dot_dimension_numbers<[1], [0], [0], [1], [0, 0, 1, 1], [], []>} : vector<2x263xbf16>, vector<263x3200xbf16>, vector<2x3200xf32> -> vector<2x3200xf32>
    %c0_21 = arith.constant 0 : index
    %c0_22 = arith.constant 0 : index
    %25 = vector.load %arg9[%c0_21, %c0_22] : memref<1x3200xf32, #tpu.memory_space<vmem>>, vector<1x3200xf32>
    %26 = vector.broadcast %25 : vector<1x3200xf32> to vector<2x3200xf32>
    %27 = arith.addf %24, %26 : vector<2x3200xf32>
    %cst_23 = arith.constant 0.000000e+00 : f32
    %28 = vector.broadcast %cst_23 : f32 to vector<2x3200xf32>
    %29 = arith.maximumf %27, %28 : vector<2x3200xf32>
    %30 = arith.truncf %29 : vector<2x3200xf32> to vector<2x3200xbf16>
    %c0_24 = arith.constant 0 : index
    %c0_25 = arith.constant 0 : index
    %31 = vector.load %arg10[%c0_24, %c0_25] : memref<2x3200xbf16, #tpu.memory_space<vmem>>, vector<2x3200xbf16>
    tpu.vector_store %arg10[%c0_24, %c0_25], %30 {strides = array<i32>} : memref<2x3200xbf16, #tpu.memory_space<vmem>>, vector<2x3200xbf16>,
    return
  }
}

module attributes {stable_mosaic.version = 11 : i64} {
  func.func @_gemm_kernel(%arg0: i32, %arg1: memref<1x25x128xbf16, #tpu.memory_space<vmem>>, %arg2: memref<128x1600xbf16, #tpu.memory_space<vmem>>, %arg3: memref<1x25x1600xf32, #tpu.memory_space<vmem>>) attributes {dimension_semantics = [#tpu.dimension_semantics<parallel>], iteration_bounds = array<i64: 2>, scalar_prefetch = 0 : i64, scratch_operands = 0 : i64, tpu.core_type = #tpu.core_type<tc>, window_params = [{transform_indices = @transform_0, window_bounds = array<i64: 1, 25, 128>}, {pipeline_mode = #tpu.pipeline_mode<synchronous>, transform_indices = @transform_1, window_bounds = array<i64: 128, 1600>}, {transform_indices = @transform_2, window_bounds = array<i64: 1, 25, 1600>}]} {
    %c0 = arith.constant 0 : index
    %c0_0 = arith.constant 0 : index
    %c0_1 = arith.constant 0 : index
    %0 = vector.load %arg1[%c0, %c0_0, %c0_1] : memref<1x25x128xbf16, #tpu.memory_space<vmem>>, vector<1x25x128xbf16>
    %1 = vector.shape_cast %0 : vector<1x25x128xbf16> to vector<25x128xbf16>
    %c0_2 = arith.constant 0 : index
    %c0_3 = arith.constant 0 : index
    %2 = vector.load %arg2[%c0_2, %c0_3] : memref<128x1600xbf16, #tpu.memory_space<vmem>>, vector<128x1600xbf16>
    %cst = arith.constant dense<0.000000e+00> : vector<25x1600xf32>
    %3 = tpu.matmul %1, %2, %cst {dimension_numbers = #tpu.dot_dimension_numbers<[1], [0], [0], [1], [0, 0, 1, 1], [], []>} : vector<25x128xbf16>, vector<128x1600xbf16>, vector<25x1600xf32> -> vector<25x1600xf32>
    %c0_4 = arith.constant 0 : index
    %c0_5 = arith.constant 0 : index
    %c0_6 = arith.constant 0 : index
    %4 = vector.load %arg3[%c0_4, %c0_5, %c0_6] : memref<1x25x1600xf32, #tpu.memory_space<vmem>>, vector<1x25x1600xf32>
    %5 = vector.shape_cast %4 : vector<1x25x1600xf32> to vector<25x1600xf32>
    %6 = vector.shape_cast %3 : vector<25x1600xf32> to vector<1x25x1600xf32>
    tpu.vector_store %arg3[%c0_4, %c0_5, %c0_6], %6 {strides = array<i32>} : memref<1x25x1600xf32, #tpu.memory_space<vmem>>, vector<1x25x1600xf32>,
    return
  }
  func.func @transform_0(%arg0: i32) -> (i32, i32, i32) {
    %c0_i32 = arith.constant 0 : i32
    %c0_i32_0 = arith.constant 0 : i32
    %c0_i32_1 = arith.constant 0 : i32
    return %arg0, %c0_i32, %c0_i32_0 : i32, i32, i32
  }
  func.func @transform_1(%arg0: i32) -> (i32, i32) {
    %c0_i32 = arith.constant 0 : i32
    %c0_i32_0 = arith.constant 0 : i32
    %c0_i32_1 = arith.constant 0 : i32
    return %c0_i32, %c0_i32_0 : i32, i32
  }
  func.func @transform_2(%arg0: i32) -> (i32, i32, i32) {
    %c0_i32 = arith.constant 0 : i32
    %c0_i32_0 = arith.constant 0 : i32
    %c0_i32_1 = arith.constant 0 : i32
    return %arg0, %c0_i32, %c0_i32_0 : i32, i32, i32
  }
}

module attributes {stable_mosaic.version = 11 : i64} {
  func.func @_gemm_kernel(%arg0: i32, %arg1: memref<1x169x64xbf16, #tpu.memory_space<vmem>>, %arg2: memref<64x1152xbf16, #tpu.memory_space<vmem>>, %arg3: memref<1x169x1152xf32, #tpu.memory_space<vmem>>) attributes {dimension_semantics = [#tpu.dimension_semantics<parallel>], iteration_bounds = array<i64: 2>, scalar_prefetch = 0 : i64, scratch_operands = 0 : i64, tpu.core_type = #tpu.core_type<tc>, window_params = [{transform_indices = @transform_0, window_bounds = array<i64: 1, 169, 64>}, {pipeline_mode = #tpu.pipeline_mode<synchronous>, transform_indices = @transform_1, window_bounds = array<i64: 64, 1152>}, {transform_indices = @transform_2, window_bounds = array<i64: 1, 169, 1152>}]} {
    %c0 = arith.constant 0 : index
    %c0_0 = arith.constant 0 : index
    %c0_1 = arith.constant 0 : index
    %0 = vector.load %arg1[%c0, %c0_0, %c0_1] : memref<1x169x64xbf16, #tpu.memory_space<vmem>>, vector<1x169x64xbf16>
    %1 = vector.shape_cast %0 : vector<1x169x64xbf16> to vector<169x64xbf16>
    %c0_2 = arith.constant 0 : index
    %c0_3 = arith.constant 0 : index
    %2 = vector.load %arg2[%c0_2, %c0_3] : memref<64x1152xbf16, #tpu.memory_space<vmem>>, vector<64x1152xbf16>
    %cst = arith.constant dense<0.000000e+00> : vector<169x1152xf32>
    %3 = tpu.matmul %1, %2, %cst {dimension_numbers = #tpu.dot_dimension_numbers<[1], [0], [0], [1], [0, 0, 1, 1], [], []>} : vector<169x64xbf16>, vector<64x1152xbf16>, vector<169x1152xf32> -> vector<169x1152xf32>
    %c0_4 = arith.constant 0 : index
    %c0_5 = arith.constant 0 : index
    %c0_6 = arith.constant 0 : index
    %4 = vector.load %arg3[%c0_4, %c0_5, %c0_6] : memref<1x169x1152xf32, #tpu.memory_space<vmem>>, vector<1x169x1152xf32>
    %5 = vector.shape_cast %4 : vector<1x169x1152xf32> to vector<169x1152xf32>
    %6 = vector.shape_cast %3 : vector<169x1152xf32> to vector<1x169x1152xf32>
    tpu.vector_store %arg3[%c0_4, %c0_5, %c0_6], %6 {strides = array<i32>} : memref<1x169x1152xf32, #tpu.memory_space<vmem>>, vector<1x169x1152xf32>,
    return
  }
  func.func @transform_0(%arg0: i32) -> (i32, i32, i32) {
    %c0_i32 = arith.constant 0 : i32
    %c0_i32_0 = arith.constant 0 : i32
    %c0_i32_1 = arith.constant 0 : i32
    return %arg0, %c0_i32, %c0_i32_0 : i32, i32, i32
  }
  func.func @transform_1(%arg0: i32) -> (i32, i32) {
    %c0_i32 = arith.constant 0 : i32
    %c0_i32_0 = arith.constant 0 : i32
    %c0_i32_1 = arith.constant 0 : i32
    return %c0_i32, %c0_i32_0 : i32, i32
  }
  func.func @transform_2(%arg0: i32) -> (i32, i32, i32) {
    %c0_i32 = arith.constant 0 : i32
    %c0_i32_0 = arith.constant 0 : i32
    %c0_i32_1 = arith.constant 0 : i32
    return %arg0, %c0_i32, %c0_i32_0 : i32, i32, i32
  }
}

module attributes {stable_mosaic.version = 11 : i64} {
  func.func @_gemm_kernel(%arg0: i32, %arg1: memref<1x900x32xbf16, #tpu.memory_space<vmem>>, %arg2: memref<32x108xbf16, #tpu.memory_space<vmem>>, %arg3: memref<1x900x108xf32, #tpu.memory_space<vmem>>) attributes {dimension_semantics = [#tpu.dimension_semantics<parallel>], iteration_bounds = array<i64: 2>, scalar_prefetch = 0 : i64, scratch_operands = 0 : i64, tpu.core_type = #tpu.core_type<tc>, window_params = [{transform_indices = @transform_0, window_bounds = array<i64: 1, 900, 32>}, {pipeline_mode = #tpu.pipeline_mode<synchronous>, transform_indices = @transform_1, window_bounds = array<i64: 32, 108>}, {transform_indices = @transform_2, window_bounds = array<i64: 1, 900, 108>}]} {
    %c0 = arith.constant 0 : index
    %c0_0 = arith.constant 0 : index
    %c0_1 = arith.constant 0 : index
    %0 = vector.load %arg1[%c0, %c0_0, %c0_1] : memref<1x900x32xbf16, #tpu.memory_space<vmem>>, vector<1x900x32xbf16>
    %1 = vector.shape_cast %0 : vector<1x900x32xbf16> to vector<900x32xbf16>
    %c0_2 = arith.constant 0 : index
    %c0_3 = arith.constant 0 : index
    %2 = vector.load %arg2[%c0_2, %c0_3] : memref<32x108xbf16, #tpu.memory_space<vmem>>, vector<32x108xbf16>
    %cst = arith.constant dense<0.000000e+00> : vector<900x108xf32>
    %3 = tpu.matmul %1, %2, %cst {dimension_numbers = #tpu.dot_dimension_numbers<[1], [0], [0], [1], [0, 0, 1, 1], [], []>} : vector<900x32xbf16>, vector<32x108xbf16>, vector<900x108xf32> -> vector<900x108xf32>
    %c0_4 = arith.constant 0 : index
    %c0_5 = arith.constant 0 : index
    %c0_6 = arith.constant 0 : index
    %4 = vector.load %arg3[%c0_4, %c0_5, %c0_6] : memref<1x900x108xf32, #tpu.memory_space<vmem>>, vector<1x900x108xf32>
    %5 = vector.shape_cast %4 : vector<1x900x108xf32> to vector<900x108xf32>
    %6 = vector.shape_cast %3 : vector<900x108xf32> to vector<1x900x108xf32>
    tpu.vector_store %arg3[%c0_4, %c0_5, %c0_6], %6 {strides = array<i32>} : memref<1x900x108xf32, #tpu.memory_space<vmem>>, vector<1x900x108xf32>,
    return
  }
  func.func @transform_0(%arg0: i32) -> (i32, i32, i32) {
    %c0_i32 = arith.constant 0 : i32
    %c0_i32_0 = arith.constant 0 : i32
    %c0_i32_1 = arith.constant 0 : i32
    return %arg0, %c0_i32, %c0_i32_0 : i32, i32, i32
  }
  func.func @transform_1(%arg0: i32) -> (i32, i32) {
    %c0_i32 = arith.constant 0 : i32
    %c0_i32_0 = arith.constant 0 : i32
    %c0_i32_1 = arith.constant 0 : i32
    return %c0_i32, %c0_i32_0 : i32, i32
  }
  func.func @transform_2(%arg0: i32) -> (i32, i32, i32) {
    %c0_i32 = arith.constant 0 : i32
    %c0_i32_0 = arith.constant 0 : i32
    %c0_i32_1 = arith.constant 0 : i32
    return %arg0, %c0_i32, %c0_i32_0 : i32, i32, i32
  }
}

</mosaic_0001>

<bundles_post_ra>
// kernel: vae_decoder_forward.4
= control target key start
LH: loop header
LB: loop body
LE: loop exit
PB: predicated region body
PF: predicated region fallthrough
CT: control target
= control target key end

     0   :  { %v6011_v43 = vmov 1983009808   ;;  %v82_v45 = vlaneseq  ;;  %vm99_vm0 = vcmask 1046528   ;;  %vm96_vm1 = vcmask 56320   ;;  %s7800_s2 = inlined_call_operand.vmem [shape: f32[263,32], index: 2, kind: input, shape index: {}]   ;;  %s7801_s4 = inlined_call_operand.vmem [shape: f32[263,32], index: 4, kind: input, shape index: {}]   ;;  %s7802_s0 = inlined_call_operand.vmem [shape: f32[2,263], index: 0, kind: input, shape index: {}]   ;;  %s7803_s6 = inlined_call_operand.vmem [shape: f32[32,263], index: 6, kind: input, shape index: {}]   ;;  %s7804_s8 = inlined_call_operand.vmem [shape: bf16[263,3200], index: 8, kind: input, shape index: {}]   ;;  %s7805_s3 = inlined_call_operand.vmem [shape: f32[1,32], index: 3, kind: input, shape index: {}]   ;;  %s7806_s5 = inlined_call_operand.vmem [shape: f32[1,32], index: 5, kind: input, shape index: {}]   ;;  %s7807_s1 = inlined_call_operand.vmem [shape: f32[2,32], index: 1, kind: input, shape index: {}]   ;;  %s7808_s7 = inlined_call_operand.vmem [shape: f32[1,263], index: 7, kind: input, shape index: {}]   ;;  %s7809_s9 = inlined_call_operand.vmem [shape: f32[1,3200], index: 9, kind: input, shape index: {}]   ;;  %s7810_s10 = inlined_call_operand.vmem [shape: bf16[2,3200], index: 10, kind: output, shape index: {}]  }
   0x1   :  { %v53_v0 = vld [vmem:[%s7800_s2 + $0x80] sm:$0xff]  ;;  %v54_v1 = vld [vmem:[%s7800_s2 + $0x88] sm:$0xff]  ;;  %v55_v11 = vld [vmem:[%s7800_s2 + $0x90] sm:$0xff]  ;;  %v80_v44 = vunpack.c.l.s4 %v6011_v43  ;;  %vm6013_vm2 = vmmov 0   ;;  %vm461_vm3 = vcmask 261120   ;;  %vm3253_vm4 = vcmask 1042432  }
   0x2   :  { %v37_v2 = vld [vmem:[%s7800_s2] sm:$0xff]  ;;  %v5234_v3 = vpack.c.bf16 %v54_v1, %v53_v0  ;;  %v38_v4 = vld [vmem:[%s7800_s2 + $0x8] sm:$0xff]  ;;  %v56_v13 = vld [vmem:[%s7800_s2 + $0x98] sm:$0xff]  ;;  %v6190_v60 = vshrl.u32 %v82_v45, 7  ;;  %vm3254_vm5 = vcmask 1043456  }
   0x3   :  { %v259_v5 = vld [vmem:[%s7801_s4 + $0x80] sm:$0xff]  ;;  %v260_v6 = vld [vmem:[%s7801_s4 + $0x88] sm:$0xff]  ;;  %v5236_v7 = vpack.c.bf16 %v38_v4, %v37_v2  ;;  %v39_v14 = vld [vmem:[%s7800_s2 + $0x10] sm:$0xff]  ;;  %v5238_v16 = vpack.c.bf16 %v56_v13, %v55_v11  ;;  %v81_v59 = vunpack.c.0.s8 %v80_v44 }
   0x4   :  { %v5266_v8 = vpack.c.bf16 %v260_v6, %v259_v5  ;;  %v243_v9 = vld [vmem:[%s7801_s4] sm:$0xff]  ;;  %v244_v10 = vld [vmem:[%s7801_s4 + $0x8] sm:$0xff]  ;;  %5235 = vmatprep.subr.bf16.mxu0 %v5234_v3  ;;  %v40_v15 = vld [vmem:[%s7800_s2 + $0x18] sm:$0xff] }
   0x5   :  { %v5268_v12 = vpack.c.bf16 %v244_v10, %v243_v9  ;;  %5237 = vmatpush3.bf16.msra.mxu0 %v5236_v7  ;;  %v5240_v17 = vpack.c.bf16 %v40_v15, %v39_v14  ;;  %v261_v18 = vld [vmem:[%s7801_s4 + $0x90] sm:$0xff]  ;;  %v262_v19 = vld [vmem:[%s7801_s4 + $0x98] sm:$0xff]  ;;  %v57_v23 = vld [vmem:[%s7800_s2 + $0xa0] sm:$0xff]  ;;  %v84_v9 = vsub.s32 %v81_v59, %v6190_v60 }
   0x6   :  { %5267 = vmatprep.subr.bf16.mxu1 %v5266_v8  ;;  %v245_v20 = vld [vmem:[%s7801_s4 + $0x10] sm:$0xff]  ;;  %v5270_v21 = vpack.c.bf16 %v262_v19, %v261_v18  ;;  %v246_v22 = vld [vmem:[%s7801_s4 + $0x18] sm:$0xff]  ;;  %v58_v24 = vld [vmem:[%s7800_s2 + $0xa8] sm:$0xff]  ;;  %5239 = vmatprep.subr.bf16.mxu0 %v5238_v16 }
   0x7   :  { %5269 = vmatpush3.bf16.msra.mxu1 %v5268_v12  ;;  %v5272_v25 = vpack.c.bf16 %v246_v22, %v245_v20  ;;  %v5242_v26 = vpack.c.bf16 %v58_v24, %v57_v23  ;;  %v41_v27 = vld [vmem:[%s7800_s2 + $0x20] sm:$0xff]  ;;  %v42_v28 = vld [vmem:[%s7800_s2 + $0x28] sm:$0xff]  ;;  %v59_v35 = vld [vmem:[%s7800_s2 + $0xb0] sm:$0xff] }
   0x8   :  { %v263_v29 = vld [vmem:[%s7801_s4 + $0xa0] sm:$0xff]  ;;  %5271 = vmatprep.subr.bf16.mxu1 %v5270_v21  ;;  %v264_v30 = vld [vmem:[%s7801_s4 + $0xa8] sm:$0xff]  ;;  %v5244_v33 = vpack.c.bf16 %v42_v28, %v41_v27  ;;  %v60_v36 = vld [vmem:[%s7800_s2 + $0xb8] sm:$0xff] }
   0x9   :  { %v247_v31 = vld [vmem:[%s7801_s4 + $0x20] sm:$0xff]  ;;  %v248_v32 = vld [vmem:[%s7801_s4 + $0x28] sm:$0xff]  ;;  %5241 = vmatpush3.bf16.msra.mxu0 %v5240_v17  ;;  %v5274_v34 = vpack.c.bf16 %v264_v30, %v263_v29  ;;  %v43_v37 = vld [vmem:[%s7800_s2 + $0x30] sm:$0xff]  ;;  %v5246_v39 = vpack.c.bf16 %v60_v36, %v59_v35 }
   0xa   :  { %5243 = vmatprep.subr.bf16.mxu0 %v5242_v26  ;;  %v5276_v38 = vpack.c.bf16 %v248_v32, %v247_v31  ;;  %v44_v40 = vld [vmem:[%s7800_s2 + $0x38] sm:$0xff]  ;;  %v265_v41 = vld [vmem:[%s7801_s4 + $0xb0] sm:$0xff]  ;;  %v61_v49 = vld [vmem:[%s7800_s2 + $0xc0] sm:$0xff] }
   0xb   :  { %5273 = vmatpush3.bf16.msra.mxu1 %v5272_v25  ;;  %v266_v42 = vld [vmem:[%s7801_s4 + $0xb8] sm:$0xff]  ;;  %v249_v47 = vld [vmem:[%s7801_s4 + $0x30] sm:$0xff]  ;;  %v62_v50 = vld [vmem:[%s7800_s2 + $0xc8] sm:$0xff]  ;;  %v5248_v51 = vpack.c.bf16 %v44_v40, %v43_v37 }
   0xc   :  { %5275 = vmatprep.subr.bf16.mxu1 %v5274_v34  ;;  %v5278_v46 = vpack.c.bf16 %v266_v42, %v265_v41  ;;  %v250_v48 = vld [vmem:[%s7801_s4 + $0x38] sm:$0xff]  ;;  %v267_v52 = vld [vmem:[%s7801_s4 + $0xc0] sm:$0xff]  ;;  %v268_v53 = vld [vmem:[%s7801_s4 + $0xc8] sm:$0xff]  ;;  %v5250_v55 = vpack.c.bf16 %v62_v50, %v61_v49  ;;  %v6012_v42 = vmov 0.0  }
   0xd   :  { %5245 = vmatpush3.bf16.msra.mxu0 %v5244_v33  ;;  %v5280_v54 = vpack.c.bf16 %v250_v48, %v249_v47  ;;  %v45_v56 = vld [vmem:[%s7800_s2 + $0x40] sm:$0xff]  ;;  %v46_v57 = vld [vmem:[%s7800_s2 + $0x48] sm:$0xff]  ;;  %v5282_v61 = vpack.c.bf16 %v268_v53, %v267_v52  ;;  %v63_v63 = vld [vmem:[%s7800_s2 + $0xd0] sm:$0xff] }
   0xe   :  { %5247 = vmatprep.subr.bf16.mxu0 %v5246_v39  ;;  %v251_v58 = vld [vmem:[%s7801_s4 + $0x40] sm:$0xff]  ;;  %v252_v62 = vld [vmem:[%s7801_s4 + $0x48] sm:$0xff]  ;;  %v64_v0 = vld [vmem:[%s7800_s2 + $0xd8] sm:$0xff]  ;;  %v5252_v3 = vpack.c.bf16 %v46_v57, %v45_v56 }
   0xf   :  { %5277 = vmatpush3.bf16.msra.mxu1 %v5276_v38  ;;  %v269_v1 = vld [vmem:[%s7801_s4 + $0xd0] sm:$0xff]  ;;  %v270_v2 = vld [vmem:[%s7801_s4 + $0xd8] sm:$0xff]  ;;  %v5284_v4 = vpack.c.bf16 %v252_v62, %v251_v58  ;;  %v5254_v5 = vpack.c.bf16 %v64_v0, %v63_v63  ;;  %v65_v12 = vld [vmem:[%s7800_s2 + $0xe0] sm:$0xff]  ;;  %v6014_v58 = vmov 0.0|0.0  }
  0x10   :  { %5279 = vmatprep.subr.bf16.mxu1 %v5278_v46  ;;  %v47_v6 = vld [vmem:[%s7800_s2 + $0x50] sm:$0xff]  ;;  %v48_v7 = vld [vmem:[%s7800_s2 + $0x58] sm:$0xff]  ;;  %v5286_v10 = vpack.c.bf16 %v270_v2, %v269_v1  ;;  %v66_v13 = vld [vmem:[%s7800_s2 + $0xe8] sm:$0xff] }
  0x11   :  { %5249 = vmatpush3.bf16.msra.mxu0 %v5248_v51  ;;  %v253_v8 = vld [vmem:[%s7801_s4 + $0x50] sm:$0xff]  ;;  %v254_v11 = vld [vmem:[%s7801_s4 + $0x58] sm:$0xff]  ;;  %v271_v14 = vld [vmem:[%s7801_s4 + $0xe0] sm:$0xff]  ;;  %v5256_v16 = vpack.c.bf16 %v48_v7, %v47_v6  ;;  %v5258_v19 = vpack.c.bf16 %v66_v13, %v65_v12 }
  0x12   :  { %5251 = vmatprep.subr.bf16.mxu0 %v5250_v55  ;;  %v272_v15 = vld [vmem:[%s7801_s4 + $0xe8] sm:$0xff]  ;;  %v36_v17 = vld [vmem:[%s7802_s0] sm:$0x3f]  ;;  %v5288_v18 = vpack.c.bf16 %v254_v11, %v253_v8  ;;  %v67_v26 = vld [vmem:[%s7800_s2 + $0xf0] sm:$0xff] }
  0x13   :  { %5281 = vmatpush3.bf16.msra.mxu1 %v5280_v54  ;;  %v49_v20 = vld [vmem:[%s7800_s2 + $0x60] sm:$0xff]  ;;  %v50_v21 = vld [vmem:[%s7800_s2 + $0x68] sm:$0xff]  ;;  %v85_v23 = vrot.slane %v36_v17, %v84_v9  ;;  %v5290_v24 = vpack.c.bf16 %v272_v15, %v271_v14  ;;  %v68_v27 = vld [vmem:[%s7800_s2 + $0xf8] sm:$0xff]  ;;  %v78_v41 = vcombine.high %v36_v17, %v36_v17 }
  0x14   :  { %5283 = vmatprep.subr.bf16.mxu1 %v5282_v61  ;;  %v255_v22 = vld [vmem:[%s7801_s4 + $0x60] sm:$0xff]  ;;  %v256_v25 = vld [vmem:[%s7801_s4 + $0x68] sm:$0xff]  ;;  %v273_v28 = vld [vmem:[%s7801_s4 + $0xf0] sm:$0xff]  ;;  %v5260_v31 = vpack.c.bf16 %v50_v21, %v49_v20  ;;  %v5262_v33 = vpack.c.bf16 %v68_v27, %v67_v26 }
  0x15   :  { %5253 = vmatpush3.bf16.msra.mxu0 %v5252_v3  ;;  %v274_v29 = vld [vmem:[%s7801_s4 + $0xf8] sm:$0xff]  ;;  %v93_v30 = vcombine.high %v85_v23, %v85_v23  ;;  %v5292_v32 = vpack.c.bf16 %v256_v25, %v255_v22  ;;  %v51_v34 = vld [vmem:[%s7800_s2 + $0x70] sm:$0xff]  ;;  %v69_v43 = vld [vmem:[%s7800_s2 + $0x100] sm:$0x7f]  ;;  %v92_v44 = vrot.slane %v78_v41, %v84_v9 }
  0x16   :  { %5255 = vmatprep.subr.bf16.mxu0 %v5254_v5  ;;  %v52_v35 = vld [vmem:[%s7800_s2 + $0x78] sm:$0xff]  ;;  %v5294_v36 = vpack.c.bf16 %v274_v29, %v273_v28  ;;  %v257_v37 = vld [vmem:[%s7801_s4 + $0x70] sm:$0xff]  ;;  %v275_v45 = vld [vmem:[%s7801_s4 + $0x100] sm:$0x7f] }
  0x17   :  { %5285 = vmatpush3.bf16.msra.mxu1 %v5284_v4  ;;  %167 = vmatprep.mubr.f32.mxu0 %v93_v30  ;;  %v258_v38 = vld [vmem:[%s7801_s4 + $0x78] sm:$0xff]  ;;  %v5264_v39 = vpack.c.bf16 %v52_v35, %v51_v34  ;;  %v433_v46 = vld [vmem:[%s7803_s6 + $0x8] sm:$0xff]  ;;  %v436_v47 = vld [vmem:[%s7803_s6 + $0x20] sm:$0xff] }
  0x18   :  { %5287 = vmatprep.subr.bf16.mxu1 %v5286_v10  ;;  %350 = vmatprep.mubr.f32.mxu1 %v93_v30  ;;  %v5296_v40 = vpack.c.bf16 %v258_v38, %v257_v37  ;;  %v5298_v48 = vpack.c.bf16 %v436_v47, %v433_v46  ;;  %v432_v49 = vld [vmem:[%s7803_s6] sm:$0xff]  ;;  %v435_v50 = vld [vmem:[%s7803_s6 + $0x18] sm:$0xff]  ;;  %v442_v53 = vld [vmem:[%s7803_s6 + $0x50] sm:$0xff] }
  0x19   :  { %5257 = vmatpush3.bf16.msra.mxu0 %v5256_v16  ;;  %v5300_v51 = vpack.c.bf16 %v435_v50, %v432_v49  ;;  %v439_v52 = vld [vmem:[%s7803_s6 + $0x38] sm:$0xff]  ;;  %v438_v55 = vld [vmem:[%s7803_s6 + $0x30] sm:$0xff]  ;;  %v441_v56 = vld [vmem:[%s7803_s6 + $0x48] sm:$0xff] }
  0x1a   :  { %5259 = vmatprep.subr.bf16.mxu0 %v5258_v19  ;;  %v5302_v54 = vpack.c.bf16 %v442_v53, %v439_v52  ;;  %v5304_v57 = vpack.c.bf16 %v441_v56, %v438_v55  ;;  %v5392_v59 = vld [vmem:[%s7804_s8] ss:$100 sps:$4 sm:$0xff]   ;;  %v5400_v62 = vld [vmem:[%s7804_s8 + $0xcc] ss:$100 sps:$4 sm:$0xff]   ;;  %v5406_v0 = vld [vmem:[%s7804_s8 + $0x194] ss:$100 sps:$4 sm:$0xff]  }
  0x1b   :  { %5289 = vmatpush3.bf16.msra.mxu1 %v5288_v18  ;;  %v5394_v61 = vld [vmem:[%s7804_s8 + $0x4] ss:$100 sps:$4 sm:$0xff]   ;;  %v5404_v1 = vld [vmem:[%s7804_s8 + $0x190] ss:$100 sps:$4 sm:$0xff]   ;;  %v5412_v2 = vld [vmem:[%s7804_s8 + $0x25c] ss:$100 sps:$4 sm:$0xff]  }
  0x1c   :  { %5291 = vmatprep.subr.bf16.mxu1 %v5290_v24  ;;  %v5398_v63 = vld [vmem:[%s7804_s8 + $0xc8] ss:$100 sps:$4 sm:$0xff]   ;;  %v5410_v3 = vld [vmem:[%s7804_s8 + $0x258] ss:$100 sps:$4 sm:$0xff]   ;;  %v5416_v5 = vld [vmem:[%s7804_s8 + $0x320] ss:$100 sps:$4 sm:$0xff]  }
  0x1d   :  { %5261 = vmatpush3.bf16.msra.mxu0 %v5260_v31  ;;  %v5418_v4 = vld [vmem:[%s7804_s8 + $0x324] ss:$100 sps:$4 sm:$0xff]   ;;  %v5424_v6 = vld [vmem:[%s7804_s8 + $0x3ec] ss:$100 sps:$4 sm:$0xff]   ;;  %v5430_v8 = vld [vmem:[%s7804_s8 + $0x4b4] ss:$100 sps:$4 sm:$0xff]  }
  0x1e   :  { %5263 = vmatprep.subr.bf16.mxu0 %v5262_v33  ;;  %v5422_v7 = vld [vmem:[%s7804_s8 + $0x3e8] ss:$100 sps:$4 sm:$0xff]   ;;  %v5428_v9 = vld [vmem:[%s7804_s8 + $0x4b0] ss:$100 sps:$4 sm:$0xff]   ;;  %v5436_v10 = vld [vmem:[%s7804_s8 + $0x57c] ss:$100 sps:$4 sm:$0xff]  }
  0x1f   :  { %5293 = vmatpush3.bf16.msra.mxu1 %v5292_v32  ;;  %v5434_v11 = vld [vmem:[%s7804_s8 + $0x578] ss:$100 sps:$4 sm:$0xff]   ;;  %v5442_v12 = vld [vmem:[%s7804_s8 + $0x644] ss:$100 sps:$4 sm:$0xff]   ;;  %v5448_v14 = vld [vmem:[%s7804_s8 + $0x70c] ss:$100 sps:$4 sm:$0xff]  }
  0x20   :  { %5295 = vmatprep.subr.bf16.mxu1 %v5294_v36  ;;  %v5440_v13 = vld [vmem:[%s7804_s8 + $0x640] ss:$100 sps:$4 sm:$0xff]   ;;  %v5446_v15 = vld [vmem:[%s7804_s8 + $0x708] ss:$100 sps:$4 sm:$0xff]   ;;  %v5454_v16 = vld [vmem:[%s7804_s8 + $0x7d4] ss:$100 sps:$4 sm:$0xff]  }
  0x21   :  { %5265 = vmatpush3.bf16.msra.mxu0 %v5264_v39  ;;  %v5452_v17 = vld [vmem:[%s7804_s8 + $0x7d0] ss:$100 sps:$4 sm:$0xff]   ;;  %v5460_v18 = vld [vmem:[%s7804_s8 + $0x89c] ss:$100 sps:$4 sm:$0xff]   ;;  %v5466_v20 = vld [vmem:[%s7804_s8 + $0x964] ss:$100 sps:$4 sm:$0xff]  }
  0x22   :  { %5207 = vmatprep.subr.mxu0 %v6012_v42  ;;  %v5458_v19 = vld [vmem:[%s7804_s8 + $0x898] ss:$100 sps:$4 sm:$0xff]   ;;  %v5464_v21 = vld [vmem:[%s7804_s8 + $0x960] ss:$100 sps:$4 sm:$0xff]   ;;  %v5472_v22 = vld [vmem:[%s7804_s8 + $0xa2c] ss:$100 sps:$4 sm:$0xff]  }
  0x23   :  { %5297 = vmatpush3.bf16.msra.mxu1 %v5296_v40  ;;  %v5478_v24 = vld [vmem:[%s7804_s8 + $0xaf4] ss:$100 sps:$4 sm:$0xff]   ;;  %v4644_v26 = vld [vmem:[%s7805_s3] ss:$0 sm:$0xff]  ;;  %v437_v47 = vld [vmem:[%s7803_s6 + $0x28] sm:$0xff] }
  0x24   :  { %168 = vmatmul.mubr.f32.vlgmr.msra.gmra.mrb[0].mxu0 %v85_v23  ;;  %3332 = vmatprep.subr.bf16.mxu1 %v5394_v61  ;;  %v5476_v25 = vld [vmem:[%s7804_s8 + $0xaf0] ss:$100 sps:$4 sm:$0xff]   ;;  %v4647_v28 = vld [vmem:[%s7806_s5] ss:$0 sm:$0xff]  ;;  %v5395_v56 = vld [vmem:[%s7804_s8 + $0x8] ss:$100 sps:$4 sm:$0xff]  }
  0x25   :  { %5208 = vmatpush3.msk.msra.mxu0 %vm99_vm0, %v69_v43  ;;  %5209 = vmatprep.mubr.msk.f32.mxu0 %vm6013_vm2, %v6012_v42  ;;  %v434_v46 = vld [vmem:[%s7803_s6 + $0x10] sm:$0xff]  ;;  %v440_v50 = vld [vmem:[%s7803_s6 + $0x40] sm:$0xff] }
  0x26   :  { %351 = vmatmul.mubr.f32.vlgmr.msra.gmra.mrb[0].mxu1 %v85_v23  ;;  %5212 = vmatprep.subr.mxu0 %v6012_v42  ;;  %v5470_v23 = vld [vmem:[%s7804_s8 + $0xa28] ss:$100 sps:$4 sm:$0xff]   ;;  %v5307_v52 = vpack.c.bf16 %v437_v47, %v434_v46  ;;  %v5409_v61 = vld [vmem:[%s7804_s8 + $0x19c] ss:$100 sps:$4 sm:$0xff]  }
  0x27   :  { %3333 = vmatpush1.bf16.msra.mxu1 %v5392_v59  ;;  %v5401_v59 = vld [vmem:[%s7804_s8 + $0xd0] ss:$100 sps:$4 sm:$0xff]  }
  0x28   :  { %5210 = vmatmul.mubr.msk.f32.vlgmr.msra.gmra.mrb[2].mxu0 %vm96_vm1, %v92_v44  ;;  %3334 = vmatprep.subr.bf16.mxu1 %v5400_v62  ;;  %v5415_v62 = vld [vmem:[%s7804_s8 + $0x264] ss:$100 sps:$4 sm:$0xff]  }
  0x29   :  { %5213 = vmatpush3.msk.msra.mxu0 %vm99_vm0, %v275_v45  ;;  %5214 = vmatprep.mubr.msk.f32.mxu0 %vm6013_vm2, %v6012_v42  ;;  %v426_v45 = vld [vmem:[%s7807_s1] sm:$0x3] }
  0x2a   :  { %5299 = vmatprep.subr.bf16.mxu0 %v5298_v48 }
  0x2b   :  { %3335 = vmatpush1.bf16.msra.mxu1 %v5398_v63  ;;  %v5413_v63 = vld [vmem:[%s7804_s8 + $0x260] ss:$100 sps:$4 sm:$0xff]  }
  0x2c   :  { %5215 = vmatmul.mubr.msk.f32.vlgmr.msra.gmra.mrb[4].mxu0 %vm96_vm1, %v92_v44  ;;  %3336 = vmatprep.subr.bf16.mxu1 %v5406_v0  ;;  %v5421_v0 = vld [vmem:[%s7804_s8 + $0x32c] ss:$100 sps:$4 sm:$0xff]  }
  0x2d   :  { %529 = vmatprep.mubr.f32.mxu0 %v6012_v42  ;;  %5301 = vmatpush1.bf16.msra.mxu0 %v5300_v51  ;;  %v443_v51 = vld [vmem:[%s7803_s6 + $0x58] sm:$0xff] }
  0x2e   :  { %5303 = vmatprep.subr.bf16.mxu0 %v5302_v54  ;;  %v5397_v54 = vld [vmem:[%s7804_s8 + $0xc] ss:$100 sps:$4 sm:$0xff]   ;;  %v5310_v55 = vpack.c.bf16 %v443_v51, %v440_v50  ;;  %v6555_v51 = vsub.s32 2, %v6190_v60 }
  0x2f   :  { %3337 = vmatpush1.bf16.msra.mxu1 %v5404_v1  ;;  %v5419_v1 = vld [vmem:[%s7804_s8 + $0x328] ss:$100 sps:$4 sm:$0xff]  }
  0x30   :  { %3338 = vmatprep.subr.bf16.mxu1 %v5412_v2  ;;  %v5427_v2 = vld [vmem:[%s7804_s8 + $0x3f4] ss:$100 sps:$4 sm:$0xff]  }
  0x31   :  { %5305 = vmatpush1.bf16.msra.mxu0 %v5304_v57  ;;  %v5403_v57 = vld [vmem:[%s7804_s8 + $0xd4] ss:$100 sps:$4 sm:$0xff]  }
  0x32   :  { %5306 = vmatprep.subr.bf16.mxu0 %v6014_v58 }
  0x33   :  { %3339 = vmatpush1.bf16.msra.mxu1 %v5410_v3  ;;  %v5425_v3 = vld [vmem:[%s7804_s8 + $0x3f0] ss:$100 sps:$4 sm:$0xff]  }
  0x34   :  { %3340 = vmatprep.subr.bf16.mxu1 %v5418_v4  ;;  %v5433_v4 = vld [vmem:[%s7804_s8 + $0x4bc] ss:$100 sps:$4 sm:$0xff]  }
  0x37   :  { %3341 = vmatpush1.bf16.msra.mxu1 %v5416_v5  ;;  %v5431_v5 = vld [vmem:[%s7804_s8 + $0x4b8] ss:$100 sps:$4 sm:$0xff]  }
  0x38   :  { %3342 = vmatprep.subr.bf16.mxu1 %v5424_v6  ;;  %v5439_v6 = vld [vmem:[%s7804_s8 + $0x584] ss:$100 sps:$4 sm:$0xff]  }
  0x3b   :  { %3343 = vmatpush1.bf16.msra.mxu1 %v5422_v7  ;;  %v5437_v7 = vld [vmem:[%s7804_s8 + $0x580] ss:$100 sps:$4 sm:$0xff]  }
  0x3c   :  { %3344 = vmatprep.subr.bf16.mxu1 %v5430_v8  ;;  %v5445_v8 = vld [vmem:[%s7804_s8 + $0x64c] ss:$100 sps:$4 sm:$0xff]  }
  0x3f   :  { %3345 = vmatpush1.bf16.msra.mxu1 %v5428_v9  ;;  %v5443_v9 = vld [vmem:[%s7804_s8 + $0x648] ss:$100 sps:$4 sm:$0xff]  }
  0x40   :  { %3346 = vmatprep.subr.bf16.mxu1 %v5436_v10  ;;  %v5451_v10 = vld [vmem:[%s7804_s8 + $0x714] ss:$100 sps:$4 sm:$0xff]  }
  0x43   :  { %3347 = vmatpush1.bf16.msra.mxu1 %v5434_v11  ;;  %v5449_v11 = vld [vmem:[%s7804_s8 + $0x710] ss:$100 sps:$4 sm:$0xff]  }
  0x44   :  { %3348 = vmatprep.subr.bf16.mxu1 %v5442_v12  ;;  %v5457_v12 = vld [vmem:[%s7804_s8 + $0x7dc] ss:$100 sps:$4 sm:$0xff]  }
  0x47   :  { %3349 = vmatpush1.bf16.msra.mxu1 %v5440_v13  ;;  %v5455_v13 = vld [vmem:[%s7804_s8 + $0x7d8] ss:$100 sps:$4 sm:$0xff]  }
  0x48   :  { %3350 = vmatprep.subr.bf16.mxu1 %v5448_v14  ;;  %v5463_v14 = vld [vmem:[%s7804_s8 + $0x8a4] ss:$100 sps:$4 sm:$0xff]  }
  0x4b   :  { %3351 = vmatpush1.bf16.msra.mxu1 %v5446_v15  ;;  %v5461_v15 = vld [vmem:[%s7804_s8 + $0x8a0] ss:$100 sps:$4 sm:$0xff]  }
  0x4c   :  { %3352 = vmatprep.subr.bf16.mxu1 %v5454_v16  ;;  %v5469_v16 = vld [vmem:[%s7804_s8 + $0x96c] ss:$100 sps:$4 sm:$0xff]  }
  0x4f   :  { %3353 = vmatpush1.bf16.msra.mxu1 %v5452_v17  ;;  %v5467_v17 = vld [vmem:[%s7804_s8 + $0x968] ss:$100 sps:$4 sm:$0xff]  }
  0x50   :  { %3354 = vmatprep.subr.bf16.mxu1 %v5460_v18  ;;  %v5475_v18 = vld [vmem:[%s7804_s8 + $0xa34] ss:$100 sps:$4 sm:$0xff]  }
  0x53   :  { %3355 = vmatpush1.bf16.msra.mxu1 %v5458_v19  ;;  %v5473_v19 = vld [vmem:[%s7804_s8 + $0xa30] ss:$100 sps:$4 sm:$0xff]  }
  0x54   :  { %3356 = vmatprep.subr.bf16.mxu1 %v5466_v20  ;;  %v5481_v20 = vld [vmem:[%s7804_s8 + $0xafc] ss:$100 sps:$4 sm:$0xff]  }
  0x57   :  { %3357 = vmatpush1.bf16.msra.mxu1 %v5464_v21  ;;  %v5479_v21 = vld [vmem:[%s7804_s8 + $0xaf8] ss:$100 sps:$4 sm:$0xff]  }
  0x58   :  { %3358 = vmatprep.subr.bf16.mxu1 %v5472_v22  ;;  %v5484_v22 = vld [vmem:[%s7804_s8 + $0xbbc] ss:$100 sps:$4 sm:$0xff]  }
  0x5b   :  { %3359 = vmatpush1.bf16.msra.mxu1 %v5470_v23  ;;  %v5487_v23 = vld [vmem:[%s7804_s8 + $0xbc4] ss:$100 sps:$4 sm:$0xff]  }
  0x5c   :  { %3360 = vmatprep.subr.bf16.mxu1 %v5478_v24  ;;  %v5482_v24 = vld [vmem:[%s7804_s8 + $0xbb8] ss:$100 sps:$4 sm:$0xff]  }
  0x5f   :  { %3361 = vmatpush1.bf16.msra.mxu1 %v5476_v25  ;;  %v5485_v25 = vld [vmem:[%s7804_s8 + $0xbc0] ss:$100 sps:$4 sm:$0xff]  }
  0x60   :  { %3362 = vmatprep.subr.bf16.mxu1 %v5484_v22  ;;  %v5531_v22 = vld [vmem:[%s7804_s8 + $0x4c8] ss:$100 sps:$4 sm:$0xff]  }
  0x63   :  { %3363 = vmatpush1.bf16.msra.mxu1 %v5482_v24  ;;  %v5539_v24 = vld [vmem:[%s7804_s8 + $0x594] ss:$100 sps:$4 sm:$0xff]  }
  0xf7   :  { %v5136_v27 = vpop.f32.mrb[0].mxu0 }
  0xf8   :  { %v5137_v29 = vpop.f32.mrb[1].mxu0 }
  0xf9   :  { %v5173_v30 = vpop.f32.mrb[0].mxu1  ;;  %v5138_v31 = vadd.f32 %v5137_v29, %v5136_v27  ;;  %v1026_v27 = vld [vmem:[%s7804_s8 + $0xc88] sm:$0xff]  ;;  %v6015_v29 = vmov 65535  }
  0xfa   :  { %v5174_v32 = vpop.f32.mrb[1].mxu1 }
  0xfb   :  { %v5175_v33 = vadd.f32 %v5174_v32, %v5173_v30  ;;  %v170_v34 = vadd.f32 %v5138_v31, %v4644_v26  ;;  %v239_v35 = vpop.f32.mrb[2].mxu0  ;;  %v1025_v26 = vld [vmem:[%s7804_s8 + $0xc80] sm:$0xff]  ;;  %v3255_v30 = vsel %vm3253_vm4, 4294967295, %v6015_v29  ;;  %v5056_v32 = vcombine.high %v1026_v27, %v1026_v27  ;;  %v5540_v29 = vld [vmem:[%s7804_s8 + $0x650] ss:$100 sps:$4 sm:$0xff]  }
  0xfc   :  { %v5211_v36 = vpop.f32.mrb[3].mxu0  ;;  %v6533_v31 = vsel %vm3254_vm5, %v3255_v30, 0  ;;  %v5543_v30 = vld [vmem:[%s7804_s8 + $0x658] ss:$100 sps:$4 sm:$0xff]  }
  0xfd   :  { %v353_v37 = vadd.f32 %v5175_v33, %v4647_v28  ;;  %v240_v38 = vadd.f32 %v239_v35, %v170_v34  ;;  %v5054_v28 = vcombine.high %v1025_v26, %v1025_v26  ;;  %v3267_v34 = vand.u32 %v5056_v32, %v6533_v31  ;;  %v444_v36 = vld [vmem:[%s7808_s7] sm:$0x7] }
  0xfe   :  { %v6538_v35 = vsub.s32 0, %v6190_v60  ;;  %v5548_v32 = vld [vmem:[%s7804_s8 + $0x71c] ss:$100 sps:$4 sm:$0xff]  }
  0xff   :  { %v422_v39 = vpop.f32.mrb[4].mxu0  ;;  %v3261_v33 = vand.u32 %v5054_v28, %v6533_v31  ;;  %v5545_v28 = vld [vmem:[%s7804_s8 + $0x65c] ss:$100 sps:$4 sm:$0xff]  }
 0x100   :  { %v423_v40 = vadd.f32 %v422_v39, %v353_v37  ;;  %v5216_v41 = vpop.f32.mrb[5].mxu0  ;;  %v6544_v37 = vsub.s32 1, %v6190_v60 }
 0x101   :  { %3373 = vmatprep.subr.bf16.mxu1 %v3261_v33  ;;  %v5053_v41 = vcombine.low %v1025_v26, %v1025_v26  ;;  %v5537_v26 = vld [vmem:[%s7804_s8 + $0x590] ss:$100 sps:$4 sm:$0xff]   ;;  %v5551_v33 = vld [vmem:[%s7804_s8 + $0x724] ss:$100 sps:$4 sm:$0xff]  }
 0x102   :  { %v427_v43 = vmul.f32 0.5, %v423_v40  ;;  %v453_v39 = vrot.slane %v444_v36, %v6544_v37 }
 0x104   :  { %v428_v44 = vmul.f32 1.442695, %v427_v43  ;;  %v5055_v43 = vcombine.low %v1026_v27, %v1026_v27  ;;  %v5542_v27 = vld [vmem:[%s7804_s8 + $0x654] ss:$100 sps:$4 sm:$0xff]  }
 0x106   :  { %6009 = vpow2.f32 %v428_v44 }
 0x110   :  { %v6010_v48 = vpop.eup %6009 }
 0x111   :  { %v430_v49 = vmul.f32 %v6010_v48, %v426_v45  ;;  %v3258_v48 = vand.u32 %v5053_v41, %v6533_v31  ;;  %v5555_v41 = vld [vmem:[%s7804_s8 + $0x7e8] ss:$100 sps:$4 sm:$0xff]  }
 0x113   :  { %v431_v53 = vadd.f32 %v430_v49, %v240_v38  ;;  %v449_v38 = vrot.slane %v444_v36, %v6538_v35  ;;  %v3264_v49 = vand.u32 %v5055_v43, %v6533_v31  ;;  %v5560_v43 = vld [vmem:[%s7804_s8 + $0x8ac] ss:$100 sps:$4 sm:$0xff]  }
 0x115   :  { %4650 = vmatmul.mubr.msk.f32.vlgmr.msra.gmra.mrb[6].mxu0 %vm461_vm3, %v431_v53 }
 0x116   :  { %5308 = vmatpush3.bf16.msra.mxu0 %v5307_v52  ;;  %5225 = vmatprep.mubr.msk.f32.mxu0 %vm6013_vm2, %v6012_v42  ;;  %v5494_v52 = vld [vmem:[%s7804_s8 + $0x14] ss:$100 sps:$4 sm:$0xff]  }
 0x117   :  { %5309 = vmatprep.subr.bf16.mxu0 %v6014_v58  ;;  %v5407_v58 = vld [vmem:[%s7804_s8 + $0x198] ss:$100 sps:$4 sm:$0xff]  }
 0x11a   :  { %5311 = vmatpush3.bf16.msra.mxu0 %v5310_v55  ;;  %v457_v55 = vrot.slane %v444_v36, %v6555_v51  ;;  %v5549_v36 = vld [vmem:[%s7804_s8 + $0x720] ss:$100 sps:$4 sm:$0xff]  }
 0x11b   :  { %3414 = vmatprep.subr.bf16.mxu0 %v5397_v54 }
 0x11d   :  { %5226 = vmatmul.mubr.msk.f32.vlgmr.msra.gmra.mrb[8].mxu0 %vm461_vm3, %v431_v53  ;;  %v5497_v53 = vld [vmem:[%s7804_s8 + $0x1c] ss:$100 sps:$4 sm:$0xff]  }
 0x11e   :  { %3415 = vmatpush1.bf16.msra.mxu0 %v5395_v56 }
 0x11f   :  { %3416 = vmatprep.subr.bf16.mxu0 %v5403_v57  ;;  %v6016_v57 = vmov 0  }
 0x122   :  { %3417 = vmatpush1.bf16.msra.mxu0 %v5401_v59 }
 0x123   :  { %3418 = vmatprep.subr.bf16.mxu0 %v5409_v61  ;;  %v5492_v61 = vld [vmem:[%s7804_s8 + $0x10] ss:$100 sps:$4 sm:$0xff]  }
 0x126   :  { %3419 = vmatpush1.bf16.msra.mxu0 %v5407_v58  ;;  %v5495_v58 = vld [vmem:[%s7804_s8 + $0x18] ss:$100 sps:$4 sm:$0xff]  }
 0x127   :  { %3420 = vmatprep.subr.bf16.mxu0 %v5415_v62 }
 0x12a   :  { %3421 = vmatpush1.bf16.msra.mxu0 %v5413_v63  ;;  %v5500_v63 = vld [vmem:[%s7804_s8 + $0xdc] ss:$100 sps:$4 sm:$0xff]  }
 0x12b   :  { %3422 = vmatprep.subr.bf16.mxu0 %v5421_v0  ;;  %v5503_v0 = vld [vmem:[%s7804_s8 + $0xe4] ss:$100 sps:$4 sm:$0xff]  }
 0x12e   :  { %3423 = vmatpush1.bf16.msra.mxu0 %v5419_v1  ;;  %v5498_v1 = vld [vmem:[%s7804_s8 + $0xd8] ss:$100 sps:$4 sm:$0xff]  }
 0x12f   :  { %3424 = vmatprep.subr.bf16.mxu0 %v5427_v2  ;;  %v5501_v2 = vld [vmem:[%s7804_s8 + $0xe0] ss:$100 sps:$4 sm:$0xff]  }
 0x132   :  { %3425 = vmatpush1.bf16.msra.mxu0 %v5425_v3  ;;  %v5506_v3 = vld [vmem:[%s7804_s8 + $0x1a4] ss:$100 sps:$4 sm:$0xff]  }
 0x133   :  { %3426 = vmatprep.subr.bf16.mxu0 %v5433_v4  ;;  %v5509_v4 = vld [vmem:[%s7804_s8 + $0x1ac] ss:$100 sps:$4 sm:$0xff]  }
 0x136   :  { %3427 = vmatpush1.bf16.msra.mxu0 %v5431_v5  ;;  %v5504_v5 = vld [vmem:[%s7804_s8 + $0x1a0] ss:$100 sps:$4 sm:$0xff]  }
 0x137   :  { %3428 = vmatprep.subr.bf16.mxu0 %v5439_v6  ;;  %v5507_v6 = vld [vmem:[%s7804_s8 + $0x1a8] ss:$100 sps:$4 sm:$0xff]  }
 0x13a   :  { %3429 = vmatpush1.bf16.msra.mxu0 %v5437_v7  ;;  %v5512_v7 = vld [vmem:[%s7804_s8 + $0x26c] ss:$100 sps:$4 sm:$0xff]  }
 0x13b   :  { %3430 = vmatprep.subr.bf16.mxu0 %v5445_v8  ;;  %v5515_v8 = vld [vmem:[%s7804_s8 + $0x274] ss:$100 sps:$4 sm:$0xff]  }
 0x13e   :  { %3431 = vmatpush1.bf16.msra.mxu0 %v5443_v9  ;;  %v5510_v9 = vld [vmem:[%s7804_s8 + $0x268] ss:$100 sps:$4 sm:$0xff]  }
 0x13f   :  { %3432 = vmatprep.subr.bf16.mxu0 %v5451_v10  ;;  %v5513_v10 = vld [vmem:[%s7804_s8 + $0x270] ss:$100 sps:$4 sm:$0xff]  }
 0x142   :  { %3433 = vmatpush1.bf16.msra.mxu0 %v5449_v11  ;;  %v5518_v11 = vld [vmem:[%s7804_s8 + $0x334] ss:$100 sps:$4 sm:$0xff]  }
 0x143   :  { %3434 = vmatprep.subr.bf16.mxu0 %v5457_v12  ;;  %v5521_v12 = vld [vmem:[%s7804_s8 + $0x33c] ss:$100 sps:$4 sm:$0xff]  }
 0x146   :  { %3435 = vmatpush1.bf16.msra.mxu0 %v5455_v13  ;;  %v5516_v13 = vld [vmem:[%s7804_s8 + $0x330] ss:$100 sps:$4 sm:$0xff]  }
 0x147   :  { %3436 = vmatprep.subr.bf16.mxu0 %v5463_v14  ;;  %v5519_v14 = vld [vmem:[%s7804_s8 + $0x338] ss:$100 sps:$4 sm:$0xff]  }
 0x14a   :  { %3437 = vmatpush1.bf16.msra.mxu0 %v5461_v15  ;;  %v5524_v15 = vld [vmem:[%s7804_s8 + $0x3fc] ss:$100 sps:$4 sm:$0xff]  }
 0x14b   :  { %3438 = vmatprep.subr.bf16.mxu0 %v5469_v16  ;;  %v5527_v16 = vld [vmem:[%s7804_s8 + $0x404] ss:$100 sps:$4 sm:$0xff]  }
 0x14e   :  { %3439 = vmatpush1.bf16.msra.mxu0 %v5467_v17  ;;  %v5522_v17 = vld [vmem:[%s7804_s8 + $0x3f8] ss:$100 sps:$4 sm:$0xff]  }
 0x14f   :  { %3440 = vmatprep.subr.bf16.mxu0 %v5475_v18  ;;  %v5525_v18 = vld [vmem:[%s7804_s8 + $0x400] ss:$100 sps:$4 sm:$0xff]  }
 0x152   :  { %3441 = vmatpush1.bf16.msra.mxu0 %v5473_v19  ;;  %v5530_v19 = vld [vmem:[%s7804_s8 + $0x4c4] ss:$100 sps:$4 sm:$0xff]  }
 0x153   :  { %3442 = vmatprep.subr.bf16.mxu0 %v5481_v20  ;;  %v5533_v20 = vld [vmem:[%s7804_s8 + $0x4cc] ss:$100 sps:$4 sm:$0xff]  }
 0x156   :  { %3443 = vmatpush1.bf16.msra.mxu0 %v5479_v21  ;;  %v5528_v21 = vld [vmem:[%s7804_s8 + $0x4c0] ss:$100 sps:$4 sm:$0xff]  }
 0x157   :  { %3444 = vmatprep.subr.bf16.mxu0 %v5487_v23  ;;  %v5536_v23 = vld [vmem:[%s7804_s8 + $0x58c] ss:$100 sps:$4 sm:$0xff]  }
 0x15a   :  { %3445 = vmatpush1.bf16.msra.mxu0 %v5485_v25  ;;  %v5534_v25 = vld [vmem:[%s7804_s8 + $0x588] ss:$100 sps:$4 sm:$0xff]  }
 0x15b   :  { %3455 = vmatprep.subr.bf16.mxu0 %v3267_v34  ;;  %v5546_v34 = vld [vmem:[%s7804_s8 + $0x718] ss:$100 sps:$4 sm:$0xff]  }
 0x1e8   :  { %v531_v40 = vpop.f32.mrb[6].mxu0 }
 0x1e9   :  { %v532_v44 = vadd.f32 %v531_v40, %v449_v38  ;;  %v533_v45 = vpop.f32.mrb[7].mxu0  ;;  %v5554_v38 = vld [vmem:[%s7804_s8 + $0x7e4] ss:$100 sps:$4 sm:$0xff]  }
 0x1ea   :  { %v534_v46 = vadd.f32 %v533_v45, %v453_v39  ;;  %v5557_v39 = vld [vmem:[%s7804_s8 + $0x7ec] ss:$100 sps:$4 sm:$0xff]   ;;  %v5552_v40 = vld [vmem:[%s7804_s8 + $0x7e0] ss:$100 sps:$4 sm:$0xff]  }
 0x1eb   :  { %v6552_v50 = vpack.c.bf16 %v532_v44, %v532_v44  ;;  %v5563_v44 = vld [vmem:[%s7804_s8 + $0x8b4] ss:$100 sps:$4 sm:$0xff]   ;;  %v5558_v45 = vld [vmem:[%s7804_s8 + $0x8a8] ss:$100 sps:$4 sm:$0xff]  }
 0x1ec   :  { %v6548_v47 = vpack.c.bf16 %v534_v46, %v534_v46  ;;  %v5561_v46 = vld [vmem:[%s7804_s8 + $0x8b0] ss:$100 sps:$4 sm:$0xff]  }
 0x1ee   :  { %3364 = vmatprep.mubr.bf16.mxu1 %v6548_v47  ;;  %3446 = vmatprep.mubr.bf16.mxu0 %v6548_v47 }
 0x1ef   :  { %3365 = vmatmul.mubr.bf16.vlgmr.msra.gmra.mrb[4].mxu1 %v6552_v50  ;;  %3447 = vmatmul.mubr.bf16.vlgmr.msra.gmra.mrb[12].mxu0 %v6552_v50 }
 0x1f0   :  { %v602_v54 = vpop.f32.mrb[8].mxu0  ;;  %3374 = vmatpush1.bf16.msra.mxu1 %v3258_v48  ;;  %3456 = vmatpush1.bf16.msra.mxu0 %v3264_v49  ;;  %v5566_v48 = vld [vmem:[%s7804_s8 + $0x974] ss:$100 sps:$4 sm:$0xff]   ;;  %v5569_v49 = vld [vmem:[%s7804_s8 + $0x97c] ss:$100 sps:$4 sm:$0xff]  }
 0x1f1   :  { %v5227_v56 = vpop.f32.mrb[9].mxu0  ;;  %3405 = vmatprep.mubr.bf16.mxu1 %v6016_v57  ;;  %3487 = vmatprep.mubr.bf16.mxu0 %v6016_v57  ;;  %v603_v59 = vadd.f32 %v602_v54, %v457_v55  ;;  %v5572_v54 = vld [vmem:[%s7804_s8 + $0xa3c] ss:$100 sps:$4 sm:$0xff]   ;;  %v5575_v55 = vld [vmem:[%s7804_s8 + $0xa44] ss:$100 sps:$4 sm:$0xff]  }
 0x1f2   :  { %3496 = vmatprep.subr.bf16.mxu1 %v5494_v52  ;;  %3578 = vmatprep.subr.bf16.mxu0 %v5497_v53  ;;  %v5564_v52 = vld [vmem:[%s7804_s8 + $0x970] ss:$100 sps:$4 sm:$0xff]   ;;  %v5567_v53 = vld [vmem:[%s7804_s8 + $0x978] ss:$100 sps:$4 sm:$0xff]  }
 0x1f3   :  { %v6576_v62 = vpack.c.bf16 %v603_v59, %v603_v59  ;;  %v5570_v56 = vld [vmem:[%s7804_s8 + $0xa38] ss:$100 sps:$4 sm:$0xff]   ;;  %v5573_v59 = vld [vmem:[%s7804_s8 + $0xa40] ss:$100 sps:$4 sm:$0xff]  }
 0x1fb   :  { %5078 = vmatmul.mubr.msk.bf16.vlgmr.msra.gmra.mrb[4].mxu1 %vm96_vm1, %v6576_v62  ;;  %5079 = vmatmul.mubr.msk.bf16.vlgmr.msra.gmra.mrb[12].mxu0 %vm96_vm1, %v6576_v62 }
 0x1fc   :  { %3497 = vmatpush1.bf16.msra.mxu1 %v5492_v61  ;;  %3579 = vmatpush1.bf16.msra.mxu0 %v5495_v58  ;;  %v5578_v61 = vld [vmem:[%s7804_s8 + $0xb04] ss:$100 sps:$4 sm:$0xff]   ;;  %v5581_v58 = vld [vmem:[%s7804_s8 + $0xb0c] ss:$100 sps:$4 sm:$0xff]  }
 0x1fd   :  { %3528 = vmatprep.mubr.bf16.mxu1 %v6548_v47  ;;  %3610 = vmatprep.mubr.bf16.mxu0 %v6548_v47 }
 0x1fe   :  { %3498 = vmatprep.subr.bf16.mxu1 %v5500_v63  ;;  %3580 = vmatprep.subr.bf16.mxu0 %v5503_v0  ;;  %v1027_v63 = vld [vmem:[%s7804_s8 + $0xc90] sm:$0xff]  ;;  %v1028_v0 = vld [vmem:[%s7804_s8 + $0xc98] sm:$0xff] }
 0x200   :  { %3499 = vmatpush1.bf16.msra.mxu1 %v5498_v1  ;;  %3581 = vmatpush1.bf16.msra.mxu0 %v5501_v2  ;;  %v5576_v1 = vld [vmem:[%s7804_s8 + $0xb00] ss:$100 sps:$4 sm:$0xff]   ;;  %v5579_v2 = vld [vmem:[%s7804_s8 + $0xb08] ss:$100 sps:$4 sm:$0xff]  }
 0x201   :  { %3500 = vmatprep.subr.bf16.mxu1 %v5506_v3  ;;  %3582 = vmatprep.subr.bf16.mxu0 %v5509_v4  ;;  %v5584_v3 = vld [vmem:[%s7804_s8 + $0xbcc] ss:$100 sps:$4 sm:$0xff]   ;;  %v5587_v4 = vld [vmem:[%s7804_s8 + $0xbd4] ss:$100 sps:$4 sm:$0xff]  }
 0x204   :  { %3501 = vmatpush1.bf16.msra.mxu1 %v5504_v5  ;;  %3583 = vmatpush1.bf16.msra.mxu0 %v5507_v6  ;;  %v5058_v5 = vcombine.high %v1027_v63, %v1027_v63  ;;  %v5060_v6 = vcombine.high %v1028_v0, %v1028_v0 }
 0x205   :  { %3502 = vmatprep.subr.bf16.mxu1 %v5512_v7  ;;  %3584 = vmatprep.subr.bf16.mxu0 %v5515_v8  ;;  %v5582_v7 = vld [vmem:[%s7804_s8 + $0xbc8] ss:$100 sps:$4 sm:$0xff]   ;;  %v5585_v8 = vld [vmem:[%s7804_s8 + $0xbd0] ss:$100 sps:$4 sm:$0xff]  }
 0x208   :  { %3503 = vmatpush1.bf16.msra.mxu1 %v5510_v9  ;;  %3585 = vmatpush1.bf16.msra.mxu0 %v5513_v10  ;;  %v5057_v9 = vcombine.low %v1027_v63, %v1027_v63  ;;  %v5059_v10 = vcombine.low %v1028_v0, %v1028_v0  ;;  %v5646_v63 = vld [vmem:[%s7804_s8 + $0x728] ss:$100 sps:$4 sm:$0xff]   ;;  %v5649_v0 = vld [vmem:[%s7804_s8 + $0x730] ss:$100 sps:$4 sm:$0xff]  }
 0x209   :  { %3504 = vmatprep.subr.bf16.mxu1 %v5518_v11  ;;  %3586 = vmatprep.subr.bf16.mxu0 %v5521_v12  ;;  %v3273_v11 = vand.u32 %v5058_v5, %v6533_v31  ;;  %v3279_v12 = vand.u32 %v5060_v6, %v6533_v31  ;;  %v5660_v5 = vld [vmem:[%s7804_s8 + $0x8bc] ss:$100 sps:$4 sm:$0xff]   ;;  %v5663_v6 = vld [vmem:[%s7804_s8 + $0x8c4] ss:$100 sps:$4 sm:$0xff]  }
 0x20c   :  { %3505 = vmatpush1.bf16.msra.mxu1 %v5516_v13  ;;  %3587 = vmatpush1.bf16.msra.mxu0 %v5519_v14  ;;  %v3270_v13 = vand.u32 %v5057_v9, %v6533_v31  ;;  %v3276_v14 = vand.u32 %v5059_v10, %v6533_v31  ;;  %v5666_v9 = vld [vmem:[%s7804_s8 + $0x984] ss:$100 sps:$4 sm:$0xff]   ;;  %v5669_v10 = vld [vmem:[%s7804_s8 + $0x98c] ss:$100 sps:$4 sm:$0xff]  }
 0x20d   :  { %3506 = vmatprep.subr.bf16.mxu1 %v5524_v15  ;;  %3588 = vmatprep.subr.bf16.mxu0 %v5527_v16  ;;  %v5594_v15 = vld [vmem:[%s7804_s8 + $0x24] ss:$100 sps:$4 sm:$0xff]   ;;  %v5597_v16 = vld [vmem:[%s7804_s8 + $0x2c] ss:$100 sps:$4 sm:$0xff]  }
 0x210   :  { %3507 = vmatpush1.bf16.msra.mxu1 %v5522_v17  ;;  %3589 = vmatpush1.bf16.msra.mxu0 %v5525_v18  ;;  %v5592_v17 = vld [vmem:[%s7804_s8 + $0x20] ss:$100 sps:$4 sm:$0xff]   ;;  %v5595_v18 = vld [vmem:[%s7804_s8 + $0x28] ss:$100 sps:$4 sm:$0xff]  }
 0x211   :  { %3508 = vmatprep.subr.bf16.mxu1 %v5530_v19  ;;  %3590 = vmatprep.subr.bf16.mxu0 %v5533_v20  ;;  %v5600_v19 = vld [vmem:[%s7804_s8 + $0xec] ss:$100 sps:$4 sm:$0xff]   ;;  %v5603_v20 = vld [vmem:[%s7804_s8 + $0xf4] ss:$100 sps:$4 sm:$0xff]  }
 0x214   :  { %3509 = vmatpush1.bf16.msra.mxu1 %v5528_v21  ;;  %3591 = vmatpush1.bf16.msra.mxu0 %v5531_v22  ;;  %v5598_v21 = vld [vmem:[%s7804_s8 + $0xe8] ss:$100 sps:$4 sm:$0xff]   ;;  %v5601_v22 = vld [vmem:[%s7804_s8 + $0xf0] ss:$100 sps:$4 sm:$0xff]  }
 0x215   :  { %3510 = vmatprep.subr.bf16.mxu1 %v5536_v23  ;;  %3592 = vmatprep.subr.bf16.mxu0 %v5539_v24  ;;  %v5606_v23 = vld [vmem:[%s7804_s8 + $0x1b4] ss:$100 sps:$4 sm:$0xff]   ;;  %v5609_v24 = vld [vmem:[%s7804_s8 + $0x1bc] ss:$100 sps:$4 sm:$0xff]  }
 0x218   :  { %3511 = vmatpush1.bf16.msra.mxu1 %v5534_v25  ;;  %3593 = vmatpush1.bf16.msra.mxu0 %v5537_v26  ;;  %v5604_v25 = vld [vmem:[%s7804_s8 + $0x1b0] ss:$100 sps:$4 sm:$0xff]   ;;  %v5607_v26 = vld [vmem:[%s7804_s8 + $0x1b8] ss:$100 sps:$4 sm:$0xff]  }
 0x219   :  { %3512 = vmatprep.subr.bf16.mxu1 %v5542_v27  ;;  %3594 = vmatprep.subr.bf16.mxu0 %v5545_v28  ;;  %v5612_v27 = vld [vmem:[%s7804_s8 + $0x27c] ss:$100 sps:$4 sm:$0xff]   ;;  %v5615_v28 = vld [vmem:[%s7804_s8 + $0x284] ss:$100 sps:$4 sm:$0xff]  }
 0x21c   :  { %3513 = vmatpush1.bf16.msra.mxu1 %v5540_v29  ;;  %3595 = vmatpush1.bf16.msra.mxu0 %v5543_v30  ;;  %v5610_v29 = vld [vmem:[%s7804_s8 + $0x278] ss:$100 sps:$4 sm:$0xff]   ;;  %v5613_v30 = vld [vmem:[%s7804_s8 + $0x280] ss:$100 sps:$4 sm:$0xff]  }
 0x21d   :  { %3514 = vmatprep.subr.bf16.mxu1 %v5548_v32  ;;  %3596 = vmatprep.subr.bf16.mxu0 %v5551_v33  ;;  %v5618_v32 = vld [vmem:[%s7804_s8 + $0x344] ss:$100 sps:$4 sm:$0xff]   ;;  %v5621_v33 = vld [vmem:[%s7804_s8 + $0x34c] ss:$100 sps:$4 sm:$0xff]  }
 0x220   :  { %3515 = vmatpush1.bf16.msra.mxu1 %v5546_v34  ;;  %3597 = vmatpush1.bf16.msra.mxu0 %v5549_v36  ;;  %v5616_v34 = vld [vmem:[%s7804_s8 + $0x340] ss:$100 sps:$4 sm:$0xff]   ;;  %v5619_v36 = vld [vmem:[%s7804_s8 + $0x348] ss:$100 sps:$4 sm:$0xff]  }
 0x221   :  { %3516 = vmatprep.subr.bf16.mxu1 %v5554_v38  ;;  %3598 = vmatprep.subr.bf16.mxu0 %v5557_v39  ;;  %v5624_v38 = vld [vmem:[%s7804_s8 + $0x40c] ss:$100 sps:$4 sm:$0xff]   ;;  %v5627_v39 = vld [vmem:[%s7804_s8 + $0x414] ss:$100 sps:$4 sm:$0xff]  }
 0x224   :  { %3517 = vmatpush1.bf16.msra.mxu1 %v5552_v40  ;;  %3599 = vmatpush1.bf16.msra.mxu0 %v5555_v41  ;;  %v5622_v40 = vld [vmem:[%s7804_s8 + $0x408] ss:$100 sps:$4 sm:$0xff]   ;;  %v5625_v41 = vld [vmem:[%s7804_s8 + $0x410] ss:$100 sps:$4 sm:$0xff]  }
 0x225   :  { %3518 = vmatprep.subr.bf16.mxu1 %v5560_v43  ;;  %3600 = vmatprep.subr.bf16.mxu0 %v5563_v44  ;;  %v5630_v43 = vld [vmem:[%s7804_s8 + $0x4d4] ss:$100 sps:$4 sm:$0xff]   ;;  %v5633_v44 = vld [vmem:[%s7804_s8 + $0x4dc] ss:$100 sps:$4 sm:$0xff]  }
 0x228   :  { %3519 = vmatpush1.bf16.msra.mxu1 %v5558_v45  ;;  %3601 = vmatpush1.bf16.msra.mxu0 %v5561_v46  ;;  %v5628_v45 = vld [vmem:[%s7804_s8 + $0x4d0] ss:$100 sps:$4 sm:$0xff]   ;;  %v5631_v46 = vld [vmem:[%s7804_s8 + $0x4d8] ss:$100 sps:$4 sm:$0xff]  }
 0x229   :  { %3520 = vmatprep.subr.bf16.mxu1 %v5566_v48  ;;  %3602 = vmatprep.subr.bf16.mxu0 %v5569_v49  ;;  %v5636_v48 = vld [vmem:[%s7804_s8 + $0x59c] ss:$100 sps:$4 sm:$0xff]   ;;  %v5639_v49 = vld [vmem:[%s7804_s8 + $0x5a4] ss:$100 sps:$4 sm:$0xff]  }
 0x22c   :  { %3521 = vmatpush1.bf16.msra.mxu1 %v5564_v52  ;;  %3603 = vmatpush1.bf16.msra.mxu0 %v5567_v53  ;;  %v5634_v52 = vld [vmem:[%s7804_s8 + $0x598] ss:$100 sps:$4 sm:$0xff]   ;;  %v5637_v53 = vld [vmem:[%s7804_s8 + $0x5a0] ss:$100 sps:$4 sm:$0xff]  }
 0x22d   :  { %3522 = vmatprep.subr.bf16.mxu1 %v5572_v54  ;;  %3604 = vmatprep.subr.bf16.mxu0 %v5575_v55  ;;  %v5642_v54 = vld [vmem:[%s7804_s8 + $0x664] ss:$100 sps:$4 sm:$0xff]   ;;  %v5645_v55 = vld [vmem:[%s7804_s8 + $0x66c] ss:$100 sps:$4 sm:$0xff]  }
 0x230   :  { %3523 = vmatpush1.bf16.msra.mxu1 %v5570_v56  ;;  %3605 = vmatpush1.bf16.msra.mxu0 %v5573_v59  ;;  %v5640_v56 = vld [vmem:[%s7804_s8 + $0x660] ss:$100 sps:$4 sm:$0xff]   ;;  %v5643_v59 = vld [vmem:[%s7804_s8 + $0x668] ss:$100 sps:$4 sm:$0xff]  }
 0x231   :  { %3524 = vmatprep.subr.bf16.mxu1 %v5578_v61  ;;  %3606 = vmatprep.subr.bf16.mxu0 %v5581_v58  ;;  %v5648_v61 = vld [vmem:[%s7804_s8 + $0x72c] ss:$100 sps:$4 sm:$0xff]   ;;  %v5651_v58 = vld [vmem:[%s7804_s8 + $0x734] ss:$100 sps:$4 sm:$0xff]  }
 0x234   :  { %3525 = vmatpush1.bf16.msra.mxu1 %v5576_v1  ;;  %3607 = vmatpush1.bf16.msra.mxu0 %v5579_v2  ;;  %v5654_v1 = vld [vmem:[%s7804_s8 + $0x7f4] ss:$100 sps:$4 sm:$0xff]   ;;  %v5657_v2 = vld [vmem:[%s7804_s8 + $0x7fc] ss:$100 sps:$4 sm:$0xff]  }
 0x235   :  { %3526 = vmatprep.subr.bf16.mxu1 %v5584_v3  ;;  %3608 = vmatprep.subr.bf16.mxu0 %v5587_v4  ;;  %v5652_v3 = vld [vmem:[%s7804_s8 + $0x7f0] ss:$100 sps:$4 sm:$0xff]   ;;  %v5655_v4 = vld [vmem:[%s7804_s8 + $0x7f8] ss:$100 sps:$4 sm:$0xff]  }
 0x238   :  { %3527 = vmatpush1.bf16.msra.mxu1 %v5582_v7  ;;  %3609 = vmatpush1.bf16.msra.mxu0 %v5585_v8  ;;  %v5658_v7 = vld [vmem:[%s7804_s8 + $0x8b8] ss:$100 sps:$4 sm:$0xff]   ;;  %v5661_v8 = vld [vmem:[%s7804_s8 + $0x8c0] ss:$100 sps:$4 sm:$0xff]  }
 0x239   :  { %3537 = vmatprep.subr.bf16.mxu1 %v3273_v11  ;;  %3619 = vmatprep.subr.bf16.mxu0 %v3279_v12  ;;  %v5664_v11 = vld [vmem:[%s7804_s8 + $0x980] ss:$100 sps:$4 sm:$0xff]   ;;  %v5667_v12 = vld [vmem:[%s7804_s8 + $0x988] ss:$100 sps:$4 sm:$0xff]  }
 0x23b   :  { %3529 = vmatmul.mubr.bf16.vlgmr.msra.gmra.mrb[8].mxu1 %v6552_v50  ;;  %3611 = vmatmul.mubr.bf16.vlgmr.msra.gmra.mrb[16].mxu0 %v6552_v50 }
 0x23c   :  { %3538 = vmatpush1.bf16.msra.mxu1 %v3270_v13  ;;  %3620 = vmatpush1.bf16.msra.mxu0 %v3276_v14  ;;  %v5672_v13 = vld [vmem:[%s7804_s8 + $0xa4c] ss:$100 sps:$4 sm:$0xff]   ;;  %v5675_v14 = vld [vmem:[%s7804_s8 + $0xa54] ss:$100 sps:$4 sm:$0xff]  }
 0x23d   :  { %3569 = vmatprep.mubr.bf16.mxu1 %v6016_v57  ;;  %3651 = vmatprep.mubr.bf16.mxu0 %v6016_v57 }
 0x23e   :  { %3660 = vmatprep.subr.bf16.mxu1 %v5594_v15  ;;  %3742 = vmatprep.subr.bf16.mxu0 %v5597_v16  ;;  %v5670_v15 = vld [vmem:[%s7804_s8 + $0xa48] ss:$100 sps:$4 sm:$0xff]   ;;  %v5673_v16 = vld [vmem:[%s7804_s8 + $0xa50] ss:$100 sps:$4 sm:$0xff]  }
 0x247   :  { %5080 = vmatmul.mubr.msk.bf16.vlgmr.msra.gmra.mrb[8].mxu1 %vm96_vm1, %v6576_v62  ;;  %5081 = vmatmul.mubr.msk.bf16.vlgmr.msra.gmra.mrb[16].mxu0 %vm96_vm1, %v6576_v62 }
 0x248   :  { %3661 = vmatpush1.bf16.msra.mxu1 %v5592_v17  ;;  %3743 = vmatpush1.bf16.msra.mxu0 %v5595_v18  ;;  %v5678_v17 = vld [vmem:[%s7804_s8 + $0xb14] ss:$100 sps:$4 sm:$0xff]   ;;  %v5681_v18 = vld [vmem:[%s7804_s8 + $0xb1c] ss:$100 sps:$4 sm:$0xff]  }
 0x249   :  { %3692 = vmatprep.mubr.bf16.mxu1 %v6548_v47  ;;  %3774 = vmatprep.mubr.bf16.mxu0 %v6548_v47 }
 0x24a   :  { %3662 = vmatprep.subr.bf16.mxu1 %v5600_v19  ;;  %3744 = vmatprep.subr.bf16.mxu0 %v5603_v20  ;;  %v1029_v19 = vld [vmem:[%s7804_s8 + $0xca0] sm:$0xff]  ;;  %v1030_v20 = vld [vmem:[%s7804_s8 + $0xca8] sm:$0xff] }
 0x24c   :  { %3663 = vmatpush1.bf16.msra.mxu1 %v5598_v21  ;;  %3745 = vmatpush1.bf16.msra.mxu0 %v5601_v22  ;;  %v5676_v21 = vld [vmem:[%s7804_s8 + $0xb10] ss:$100 sps:$4 sm:$0xff]   ;;  %v5679_v22 = vld [vmem:[%s7804_s8 + $0xb18] ss:$100 sps:$4 sm:$0xff]  }
 0x24d   :  { %3664 = vmatprep.subr.bf16.mxu1 %v5606_v23  ;;  %3746 = vmatprep.subr.bf16.mxu0 %v5609_v24  ;;  %v5684_v23 = vld [vmem:[%s7804_s8 + $0xbdc] ss:$100 sps:$4 sm:$0xff]   ;;  %v5687_v24 = vld [vmem:[%s7804_s8 + $0xbe4] ss:$100 sps:$4 sm:$0xff]  }
 0x250   :  { %3665 = vmatpush1.bf16.msra.mxu1 %v5604_v25  ;;  %3747 = vmatpush1.bf16.msra.mxu0 %v5607_v26  ;;  %v5062_v25 = vcombine.high %v1029_v19, %v1029_v19  ;;  %v5064_v26 = vcombine.high %v1030_v20, %v1030_v20 }
 0x251   :  { %3666 = vmatprep.subr.bf16.mxu1 %v5612_v27  ;;  %3748 = vmatprep.subr.bf16.mxu0 %v5615_v28  ;;  %v5682_v27 = vld [vmem:[%s7804_s8 + $0xbd8] ss:$100 sps:$4 sm:$0xff]   ;;  %v5685_v28 = vld [vmem:[%s7804_s8 + $0xbe0] ss:$100 sps:$4 sm:$0xff]  }
 0x254   :  { %3667 = vmatpush1.bf16.msra.mxu1 %v5610_v29  ;;  %3749 = vmatpush1.bf16.msra.mxu0 %v5613_v30  ;;  %v5061_v29 = vcombine.low %v1029_v19, %v1029_v19  ;;  %v5063_v30 = vcombine.low %v1030_v20, %v1030_v20  ;;  %v5746_v19 = vld [vmem:[%s7804_s8 + $0x738] ss:$100 sps:$4 sm:$0xff]   ;;  %v5749_v20 = vld [vmem:[%s7804_s8 + $0x740] ss:$100 sps:$4 sm:$0xff]  }
 0x255   :  { %3668 = vmatprep.subr.bf16.mxu1 %v5618_v32  ;;  %3750 = vmatprep.subr.bf16.mxu0 %v5621_v33  ;;  %v3285_v32 = vand.u32 %v5062_v25, %v6533_v31  ;;  %v3291_v33 = vand.u32 %v5064_v26, %v6533_v31  ;;  %v5760_v25 = vld [vmem:[%s7804_s8 + $0x8cc] ss:$100 sps:$4 sm:$0xff]   ;;  %v5763_v26 = vld [vmem:[%s7804_s8 + $0x8d4] ss:$100 sps:$4 sm:$0xff]  }
 0x258   :  { %3669 = vmatpush1.bf16.msra.mxu1 %v5616_v34  ;;  %3751 = vmatpush1.bf16.msra.mxu0 %v5619_v36  ;;  %v3282_v34 = vand.u32 %v5061_v29, %v6533_v31  ;;  %v3288_v36 = vand.u32 %v5063_v30, %v6533_v31  ;;  %v5766_v29 = vld [vmem:[%s7804_s8 + $0x994] ss:$100 sps:$4 sm:$0xff]   ;;  %v5769_v30 = vld [vmem:[%s7804_s8 + $0x99c] ss:$100 sps:$4 sm:$0xff]  }
 0x259   :  { %3670 = vmatprep.subr.bf16.mxu1 %v5624_v38  ;;  %3752 = vmatprep.subr.bf16.mxu0 %v5627_v39  ;;  %v5694_v38 = vld [vmem:[%s7804_s8 + $0x34] ss:$100 sps:$4 sm:$0xff]   ;;  %v5697_v39 = vld [vmem:[%s7804_s8 + $0x3c] ss:$100 sps:$4 sm:$0xff]  }
 0x25c   :  { %3671 = vmatpush1.bf16.msra.mxu1 %v5622_v40  ;;  %3753 = vmatpush1.bf16.msra.mxu0 %v5625_v41  ;;  %v5692_v40 = vld [vmem:[%s7804_s8 + $0x30] ss:$100 sps:$4 sm:$0xff]   ;;  %v5695_v41 = vld [vmem:[%s7804_s8 + $0x38] ss:$100 sps:$4 sm:$0xff]  }
 0x25d   :  { %3672 = vmatprep.subr.bf16.mxu1 %v5630_v43  ;;  %3754 = vmatprep.subr.bf16.mxu0 %v5633_v44  ;;  %v5700_v43 = vld [vmem:[%s7804_s8 + $0xfc] ss:$100 sps:$4 sm:$0xff]   ;;  %v5703_v44 = vld [vmem:[%s7804_s8 + $0x104] ss:$100 sps:$4 sm:$0xff]  }
 0x260   :  { %3673 = vmatpush1.bf16.msra.mxu1 %v5628_v45  ;;  %3755 = vmatpush1.bf16.msra.mxu0 %v5631_v46  ;;  %v5698_v45 = vld [vmem:[%s7804_s8 + $0xf8] ss:$100 sps:$4 sm:$0xff]   ;;  %v5701_v46 = vld [vmem:[%s7804_s8 + $0x100] ss:$100 sps:$4 sm:$0xff]  }
 0x261   :  { %3674 = vmatprep.subr.bf16.mxu1 %v5636_v48  ;;  %3756 = vmatprep.subr.bf16.mxu0 %v5639_v49  ;;  %v5706_v48 = vld [vmem:[%s7804_s8 + $0x1c4] ss:$100 sps:$4 sm:$0xff]   ;;  %v5709_v49 = vld [vmem:[%s7804_s8 + $0x1cc] ss:$100 sps:$4 sm:$0xff]  }
 0x264   :  { %3675 = vmatpush1.bf16.msra.mxu1 %v5634_v52  ;;  %3757 = vmatpush1.bf16.msra.mxu0 %v5637_v53  ;;  %v5704_v52 = vld [vmem:[%s7804_s8 + $0x1c0] ss:$100 sps:$4 sm:$0xff]   ;;  %v5707_v53 = vld [vmem:[%s7804_s8 + $0x1c8] ss:$100 sps:$4 sm:$0xff]  }
 0x265   :  { %3676 = vmatprep.subr.bf16.mxu1 %v5642_v54  ;;  %3758 = vmatprep.subr.bf16.mxu0 %v5645_v55  ;;  %v5712_v54 = vld [vmem:[%s7804_s8 + $0x28c] ss:$100 sps:$4 sm:$0xff]   ;;  %v5715_v55 = vld [vmem:[%s7804_s8 + $0x294] ss:$100 sps:$4 sm:$0xff]  }
 0x268   :  { %3677 = vmatpush1.bf16.msra.mxu1 %v5640_v56  ;;  %3759 = vmatpush1.bf16.msra.mxu0 %v5643_v59  ;;  %v5710_v56 = vld [vmem:[%s7804_s8 + $0x288] ss:$100 sps:$4 sm:$0xff]   ;;  %v5713_v59 = vld [vmem:[%s7804_s8 + $0x290] ss:$100 sps:$4 sm:$0xff]  }
 0x269   :  { %3678 = vmatprep.subr.bf16.mxu1 %v5648_v61  ;;  %3760 = vmatprep.subr.bf16.mxu0 %v5651_v58  ;;  %v5718_v61 = vld [vmem:[%s7804_s8 + $0x354] ss:$100 sps:$4 sm:$0xff]   ;;  %v5721_v58 = vld [vmem:[%s7804_s8 + $0x35c] ss:$100 sps:$4 sm:$0xff]  }
 0x26c   :  { %3679 = vmatpush1.bf16.msra.mxu1 %v5646_v63  ;;  %3761 = vmatpush1.bf16.msra.mxu0 %v5649_v0  ;;  %v5716_v63 = vld [vmem:[%s7804_s8 + $0x350] ss:$100 sps:$4 sm:$0xff]   ;;  %v5719_v0 = vld [vmem:[%s7804_s8 + $0x358] ss:$100 sps:$4 sm:$0xff]  }
 0x26d   :  { %3680 = vmatprep.subr.bf16.mxu1 %v5654_v1  ;;  %3762 = vmatprep.subr.bf16.mxu0 %v5657_v2  ;;  %v5724_v1 = vld [vmem:[%s7804_s8 + $0x41c] ss:$100 sps:$4 sm:$0xff]   ;;  %v5727_v2 = vld [vmem:[%s7804_s8 + $0x424] ss:$100 sps:$4 sm:$0xff]  }
 0x270   :  { %3681 = vmatpush1.bf16.msra.mxu1 %v5652_v3  ;;  %3763 = vmatpush1.bf16.msra.mxu0 %v5655_v4  ;;  %v5722_v3 = vld [vmem:[%s7804_s8 + $0x418] ss:$100 sps:$4 sm:$0xff]   ;;  %v5725_v4 = vld [vmem:[%s7804_s8 + $0x420] ss:$100 sps:$4 sm:$0xff]  }
 0x271   :  { %3682 = vmatprep.subr.bf16.mxu1 %v5660_v5  ;;  %3764 = vmatprep.subr.bf16.mxu0 %v5663_v6  ;;  %v5730_v5 = vld [vmem:[%s7804_s8 + $0x4e4] ss:$100 sps:$4 sm:$0xff]   ;;  %v5733_v6 = vld [vmem:[%s7804_s8 + $0x4ec] ss:$100 sps:$4 sm:$0xff]  }
 0x274   :  { %3683 = vmatpush1.bf16.msra.mxu1 %v5658_v7  ;;  %3765 = vmatpush1.bf16.msra.mxu0 %v5661_v8  ;;  %v5728_v7 = vld [vmem:[%s7804_s8 + $0x4e0] ss:$100 sps:$4 sm:$0xff]   ;;  %v5731_v8 = vld [vmem:[%s7804_s8 + $0x4e8] ss:$100 sps:$4 sm:$0xff]  }
 0x275   :  { %3684 = vmatprep.subr.bf16.mxu1 %v5666_v9  ;;  %3766 = vmatprep.subr.bf16.mxu0 %v5669_v10  ;;  %v5736_v9 = vld [vmem:[%s7804_s8 + $0x5ac] ss:$100 sps:$4 sm:$0xff]   ;;  %v5739_v10 = vld [vmem:[%s7804_s8 + $0x5b4] ss:$100 sps:$4 sm:$0xff]  }
 0x278   :  { %3685 = vmatpush1.bf16.msra.mxu1 %v5664_v11  ;;  %3767 = vmatpush1.bf16.msra.mxu0 %v5667_v12  ;;  %v5734_v11 = vld [vmem:[%s7804_s8 + $0x5a8] ss:$100 sps:$4 sm:$0xff]   ;;  %v5737_v12 = vld [vmem:[%s7804_s8 + $0x5b0] ss:$100 sps:$4 sm:$0xff]  }
 0x279   :  { %3686 = vmatprep.subr.bf16.mxu1 %v5672_v13  ;;  %3768 = vmatprep.subr.bf16.mxu0 %v5675_v14  ;;  %v5742_v13 = vld [vmem:[%s7804_s8 + $0x674] ss:$100 sps:$4 sm:$0xff]   ;;  %v5745_v14 = vld [vmem:[%s7804_s8 + $0x67c] ss:$100 sps:$4 sm:$0xff]  }
 0x27c   :  { %3687 = vmatpush1.bf16.msra.mxu1 %v5670_v15  ;;  %3769 = vmatpush1.bf16.msra.mxu0 %v5673_v16  ;;  %v5740_v15 = vld [vmem:[%s7804_s8 + $0x670] ss:$100 sps:$4 sm:$0xff]   ;;  %v5743_v16 = vld [vmem:[%s7804_s8 + $0x678] ss:$100 sps:$4 sm:$0xff]  }
 0x27d   :  { %3688 = vmatprep.subr.bf16.mxu1 %v5678_v17  ;;  %3770 = vmatprep.subr.bf16.mxu0 %v5681_v18  ;;  %v5748_v17 = vld [vmem:[%s7804_s8 + $0x73c] ss:$100 sps:$4 sm:$0xff]   ;;  %v5751_v18 = vld [vmem:[%s7804_s8 + $0x744] ss:$100 sps:$4 sm:$0xff]  }
 0x280   :  { %3689 = vmatpush1.bf16.msra.mxu1 %v5676_v21  ;;  %3771 = vmatpush1.bf16.msra.mxu0 %v5679_v22  ;;  %v5754_v21 = vld [vmem:[%s7804_s8 + $0x804] ss:$100 sps:$4 sm:$0xff]   ;;  %v5757_v22 = vld [vmem:[%s7804_s8 + $0x80c] ss:$100 sps:$4 sm:$0xff]  }
 0x281   :  { %3690 = vmatprep.subr.bf16.mxu1 %v5684_v23  ;;  %3772 = vmatprep.subr.bf16.mxu0 %v5687_v24  ;;  %v5752_v23 = vld [vmem:[%s7804_s8 + $0x800] ss:$100 sps:$4 sm:$0xff]   ;;  %v5755_v24 = vld [vmem:[%s7804_s8 + $0x808] ss:$100 sps:$4 sm:$0xff]  }
 0x284   :  { %3691 = vmatpush1.bf16.msra.mxu1 %v5682_v27  ;;  %3773 = vmatpush1.bf16.msra.mxu0 %v5685_v28  ;;  %v5758_v27 = vld [vmem:[%s7804_s8 + $0x8c8] ss:$100 sps:$4 sm:$0xff]   ;;  %v5761_v28 = vld [vmem:[%s7804_s8 + $0x8d0] ss:$100 sps:$4 sm:$0xff]  }
 0x285   :  { %3701 = vmatprep.subr.bf16.mxu1 %v3285_v32  ;;  %3783 = vmatprep.subr.bf16.mxu0 %v3291_v33  ;;  %v5764_v32 = vld [vmem:[%s7804_s8 + $0x990] ss:$100 sps:$4 sm:$0xff]   ;;  %v5767_v33 = vld [vmem:[%s7804_s8 + $0x998] ss:$100 sps:$4 sm:$0xff]  }
 0x287   :  { %3693 = vmatmul.mubr.bf16.vlgmr.msra.gmra.mrb[12].mxu1 %v6552_v50  ;;  %3775 = vmatmul.mubr.bf16.vlgmr.msra.gmra.mrb[20].mxu0 %v6552_v50 }
 0x288   :  { %3702 = vmatpush1.bf16.msra.mxu1 %v3282_v34  ;;  %3784 = vmatpush1.bf16.msra.mxu0 %v3288_v36  ;;  %v5772_v34 = vld [vmem:[%s7804_s8 + $0xa5c] ss:$100 sps:$4 sm:$0xff]   ;;  %v5775_v36 = vld [vmem:[%s7804_s8 + $0xa64] ss:$100 sps:$4 sm:$0xff]  }
 0x289   :  { %3733 = vmatprep.mubr.bf16.mxu1 %v6016_v57  ;;  %3815 = vmatprep.mubr.bf16.mxu0 %v6016_v57 }
 0x28a   :  { %3824 = vmatprep.subr.bf16.mxu1 %v5694_v38  ;;  %3906 = vmatprep.subr.bf16.mxu0 %v5697_v39  ;;  %v5770_v38 = vld [vmem:[%s7804_s8 + $0xa58] ss:$100 sps:$4 sm:$0xff]   ;;  %v5773_v39 = vld [vmem:[%s7804_s8 + $0xa60] ss:$100 sps:$4 sm:$0xff]  }
 0x293   :  { %5082 = vmatmul.mubr.msk.bf16.vlgmr.msra.gmra.mrb[12].mxu1 %vm96_vm1, %v6576_v62  ;;  %5083 = vmatmul.mubr.msk.bf16.vlgmr.msra.gmra.mrb[20].mxu0 %vm96_vm1, %v6576_v62 }
 0x294   :  { %3825 = vmatpush1.bf16.msra.mxu1 %v5692_v40  ;;  %3907 = vmatpush1.bf16.msra.mxu0 %v5695_v41  ;;  %v5778_v40 = vld [vmem:[%s7804_s8 + $0xb24] ss:$100 sps:$4 sm:$0xff]   ;;  %v5781_v41 = vld [vmem:[%s7804_s8 + $0xb2c] ss:$100 sps:$4 sm:$0xff]  }
 0x295   :  { %3856 = vmatprep.mubr.bf16.mxu1 %v6548_v47  ;;  %3938 = vmatprep.mubr.bf16.mxu0 %v6548_v47 }
 0x296   :  { %3826 = vmatprep.subr.bf16.mxu1 %v5700_v43  ;;  %3908 = vmatprep.subr.bf16.mxu0 %v5703_v44  ;;  %v1031_v43 = vld [vmem:[%s7804_s8 + $0xcb0] sm:$0xff]  ;;  %v1032_v44 = vld [vmem:[%s7804_s8 + $0xcb8] sm:$0xff] }
 0x298   :  { %3827 = vmatpush1.bf16.msra.mxu1 %v5698_v45  ;;  %3909 = vmatpush1.bf16.msra.mxu0 %v5701_v46  ;;  %v5776_v45 = vld [vmem:[%s7804_s8 + $0xb20] ss:$100 sps:$4 sm:$0xff]   ;;  %v5779_v46 = vld [vmem:[%s7804_s8 + $0xb28] ss:$100 sps:$4 sm:$0xff]  }
 0x299   :  { %3828 = vmatprep.subr.bf16.mxu1 %v5706_v48  ;;  %3910 = vmatprep.subr.bf16.mxu0 %v5709_v49  ;;  %v7185_v48 = vld [vmem:[%s7809_s9] sm:$0xff]  ;;  %v7188_v49 = vsub.s32 3, %v6190_v60 }
 0x29c   :  { %3829 = vmatpush1.bf16.msra.mxu1 %v5704_v52  ;;  %3911 = vmatpush1.bf16.msra.mxu0 %v5707_v53  ;;  %v5784_v52 = vld [vmem:[%s7804_s8 + $0xbec] ss:$100 sps:$4 sm:$0xff]   ;;  %v5787_v53 = vld [vmem:[%s7804_s8 + $0xbf4] ss:$100 sps:$4 sm:$0xff]  }
 0x29d   :  { %3830 = vmatprep.subr.bf16.mxu1 %v5712_v54  ;;  %3912 = vmatprep.subr.bf16.mxu0 %v5715_v55  ;;  %v5066_v54 = vcombine.high %v1031_v43, %v1031_v43  ;;  %v5068_v55 = vcombine.high %v1032_v44, %v1032_v44 }
 0x2a0   :  { %3831 = vmatpush1.bf16.msra.mxu1 %v5710_v56  ;;  %3913 = vmatpush1.bf16.msra.mxu0 %v5713_v59  ;;  %v6017_v56 = vmov 1966171168  }
 0x2a1   :  { %3832 = vmatprep.subr.bf16.mxu1 %v5718_v61  ;;  %3914 = vmatprep.subr.bf16.mxu0 %v5721_v58  ;;  %v4476_v59 = vunpack.c.l.s4 %v6017_v56  ;;  %v1049_v61 = vrot.slane %v7185_v48, %v6538_v35  ;;  %v1057_v58 = vrot.slane %v7185_v48, %v6555_v51  ;;  %v5813_v56 = vld [vmem:[%s7804_s8 + $0x2a0] ss:$100 sps:$4 sm:$0xff]  }
 0x2a4   :  { %3833 = vmatpush1.bf16.msra.mxu1 %v5716_v63  ;;  %3915 = vmatpush1.bf16.msra.mxu0 %v5719_v0  ;;  %v5065_v63 = vcombine.low %v1031_v43, %v1031_v43  ;;  %v5782_v0 = vld [vmem:[%s7804_s8 + $0xbe8] ss:$100 sps:$4 sm:$0xff]   ;;  %v5801_v43 = vld [vmem:[%s7804_s8 + $0x110] ss:$100 sps:$4 sm:$0xff]  }
 0x2a5   :  { %3834 = vmatprep.subr.bf16.mxu1 %v5724_v1  ;;  %3916 = vmatprep.subr.bf16.mxu0 %v5727_v2  ;;  %v5785_v1 = vld [vmem:[%s7804_s8 + $0xbf0] ss:$100 sps:$4 sm:$0xff]   ;;  %v1053_v2 = vrot.slane %v7185_v48, %v6544_v37 }
 0x2a8   :  { %3835 = vmatpush1.bf16.msra.mxu1 %v5722_v3  ;;  %3917 = vmatpush1.bf16.msra.mxu0 %v5725_v4  ;;  %v1061_v3 = vrot.slane %v7185_v48, %v7188_v49  ;;  %v5067_v4 = vcombine.low %v1032_v44, %v1032_v44  ;;  %v5806_v44 = vld [vmem:[%s7804_s8 + $0x1d4] ss:$100 sps:$4 sm:$0xff]  }
 0x2a9   :  { %3836 = vmatprep.subr.bf16.mxu1 %v5730_v5  ;;  %3918 = vmatprep.subr.bf16.mxu0 %v5733_v6  ;;  %v3297_v5 = vand.u32 %v5066_v54, %v6533_v31  ;;  %v3303_v6 = vand.u32 %v5068_v55, %v6533_v31  ;;  %v5815_v54 = vld [vmem:[%s7804_s8 + $0x2a4] ss:$100 sps:$4 sm:$0xff]   ;;  %v5810_v55 = vld [vmem:[%s7804_s8 + $0x298] ss:$100 sps:$4 sm:$0xff]  }
 0x2ac   :  { %3837 = vmatpush1.bf16.msra.mxu1 %v5728_v7  ;;  %3919 = vmatpush1.bf16.msra.mxu0 %v5731_v8 }
 0x2ad   :  { %3838 = vmatprep.subr.bf16.mxu1 %v5736_v9  ;;  %3920 = vmatprep.subr.bf16.mxu0 %v5739_v10  ;;  %v4477_v9 = vunpack.c.0.s8 %v4476_v59  ;;  %v5818_v59 = vld [vmem:[%s7804_s8 + $0x364] ss:$100 sps:$4 sm:$0xff]  }
 0x2b0   :  { %3839 = vmatpush1.bf16.msra.mxu1 %v5734_v11  ;;  %3921 = vmatpush1.bf16.msra.mxu0 %v5737_v12 }
 0x2b1   :  { %3840 = vmatprep.subr.bf16.mxu1 %v5742_v13  ;;  %3922 = vmatprep.subr.bf16.mxu0 %v5745_v14  ;;  %v3294_v14 = vand.u32 %v5065_v63, %v6533_v31  ;;  %v5819_v63 = vld [vmem:[%s7804_s8 + $0x368] ss:$100 sps:$4 sm:$0xff]  }
 0x2b4   :  { %3841 = vmatpush1.bf16.msra.mxu1 %v5740_v15  ;;  %3923 = vmatpush1.bf16.msra.mxu0 %v5743_v16 }
 0x2b5   :  { %3842 = vmatprep.subr.bf16.mxu1 %v5748_v17  ;;  %3924 = vmatprep.subr.bf16.mxu0 %v5751_v18 }
 0x2b8   :  { %3843 = vmatpush1.bf16.msra.mxu1 %v5746_v19  ;;  %3925 = vmatpush1.bf16.msra.mxu0 %v5749_v20  ;;  %v3300_v19 = vand.u32 %v5067_v4, %v6533_v31  ;;  %v5830_v4 = vld [vmem:[%s7804_s8 + $0x4f4] ss:$100 sps:$4 sm:$0xff]  }
 0x2b9   :  { %3844 = vmatprep.subr.bf16.mxu1 %v5754_v21  ;;  %3926 = vmatprep.subr.bf16.mxu0 %v5757_v22 }
 0x2bc   :  { %3845 = vmatpush1.bf16.msra.mxu1 %v5752_v23  ;;  %3927 = vmatpush1.bf16.msra.mxu0 %v5755_v24 }
 0x2bd   :  { %3846 = vmatprep.subr.bf16.mxu1 %v5760_v25  ;;  %3928 = vmatprep.subr.bf16.mxu0 %v5763_v26  ;;  %v7215_v25 = vsub.s32 %v4477_v9, %v6190_v60  ;;  %v5839_v9 = vld [vmem:[%s7804_s8 + $0x5c4] ss:$100 sps:$4 sm:$0xff]  }
 0x2c0   :  { %3847 = vmatpush1.bf16.msra.mxu1 %v5758_v27  ;;  %3929 = vmatpush1.bf16.msra.mxu0 %v5761_v28  ;;  %v5794_v27 = vld [vmem:[%s7804_s8 + $0x44] ss:$100 sps:$4 sm:$0xff]   ;;  %v5797_v28 = vld [vmem:[%s7804_s8 + $0x4c] ss:$100 sps:$4 sm:$0xff]  }
 0x2c1   :  { %3848 = vmatprep.subr.bf16.mxu1 %v5766_v29  ;;  %3930 = vmatprep.subr.bf16.mxu0 %v5769_v30 }
 0x2c4   :  { %3849 = vmatpush1.bf16.msra.mxu1 %v5764_v32  ;;  %3931 = vmatpush1.bf16.msra.mxu0 %v5767_v33 }
 0x2c5   :  { %3850 = vmatprep.subr.bf16.mxu1 %v5772_v34  ;;  %3932 = vmatprep.subr.bf16.mxu0 %v5775_v36  ;;  %v5792_v36 = vld [vmem:[%s7804_s8 + $0x40] ss:$100 sps:$4 sm:$0xff]  }
 0x2c8   :  { %3851 = vmatpush1.bf16.msra.mxu1 %v5770_v38  ;;  %3933 = vmatpush1.bf16.msra.mxu0 %v5773_v39  ;;  %v5795_v38 = vld [vmem:[%s7804_s8 + $0x48] ss:$100 sps:$4 sm:$0xff]  }
 0x2c9   :  { %3852 = vmatprep.subr.bf16.mxu1 %v5778_v40  ;;  %3934 = vmatprep.subr.bf16.mxu0 %v5781_v41  ;;  %v5800_v39 = vld [vmem:[%s7804_s8 + $0x10c] ss:$100 sps:$4 sm:$0xff]   ;;  %v5803_v40 = vld [vmem:[%s7804_s8 + $0x114] ss:$100 sps:$4 sm:$0xff]  }
 0x2ca   :  { %v5798_v41 = vld [vmem:[%s7804_s8 + $0x108] ss:$100 sps:$4 sm:$0xff]  }
 0x2cc   :  { %3853 = vmatpush1.bf16.msra.mxu1 %v5776_v45  ;;  %3935 = vmatpush1.bf16.msra.mxu0 %v5779_v46  ;;  %v5809_v45 = vld [vmem:[%s7804_s8 + $0x1dc] ss:$100 sps:$4 sm:$0xff]   ;;  %v5804_v46 = vld [vmem:[%s7804_s8 + $0x1d0] ss:$100 sps:$4 sm:$0xff]  }
 0x2cd   :  { %3854 = vmatprep.subr.bf16.mxu1 %v5784_v52  ;;  %3936 = vmatprep.subr.bf16.mxu0 %v5787_v53  ;;  %v5807_v52 = vld [vmem:[%s7804_s8 + $0x1d8] ss:$100 sps:$4 sm:$0xff]  }
 0x2ce   :  { %v3407_v7 = vpop.f32.mrb[4].mxu1  ;;  %v3489_v8 = vpop.f32.mrb[12].mxu0  ;;  %v5812_v53 = vld [vmem:[%s7804_s8 + $0x29c] ss:$100 sps:$4 sm:$0xff]  }
 0x2cf   :  { %v5312_v10 = vadd.f32 %v3407_v7, %v1049_v61  ;;  %v5314_v11 = vadd.f32 %v3489_v8, %v1057_v58  ;;  %v3409_v12 = vpop.f32.mrb[5].mxu1  ;;  %v3491_v13 = vpop.f32.mrb[13].mxu0  ;;  %v5821_v61 = vld [vmem:[%s7804_s8 + $0x36c] ss:$100 sps:$4 sm:$0xff]   ;;  %v5816_v58 = vld [vmem:[%s7804_s8 + $0x360] ss:$100 sps:$4 sm:$0xff]  }
 0x2d0   :  { %3855 = vmatpush1.bf16.msra.mxu1 %v5782_v0  ;;  %3937 = vmatpush1.bf16.msra.mxu0 %v5785_v1  ;;  %v5313_v15 = vadd.f32 %v3409_v12, %v1053_v2  ;;  %v5315_v16 = vadd.f32 %v3491_v13, %v1061_v3  ;;  %v3411_v17 = vpop.f32.mrb[6].mxu1  ;;  %v3493_v18 = vpop.f32.mrb[14].mxu0  ;;  %v5824_v0 = vld [vmem:[%s7804_s8 + $0x42c] ss:$100 sps:$4 sm:$0xff]   ;;  %v5827_v1 = vld [vmem:[%s7804_s8 + $0x434] ss:$100 sps:$4 sm:$0xff]  }
 0x2d1   :  { %v4396_v20 = vmax.f32 %v5312_v10, 0.0  ;;  %v4398_v21 = vmax.f32 %v5314_v11, 0.0  ;;  %3865 = vmatprep.subr.bf16.mxu1 %v3297_v5  ;;  %v3412_v22 = vpop.f32.mrb[7].mxu1  ;;  %v3494_v23 = vpop.f32.mrb[15].mxu0  ;;  %3947 = vmatprep.subr.bf16.mxu0 %v3303_v6  ;;  %v5822_v2 = vld [vmem:[%s7804_s8 + $0x428] ss:$100 sps:$4 sm:$0xff]  }
 0x2d2   :  { %v4397_v24 = vmax.f32 %v5313_v15, 0.0  ;;  %v4399_v26 = vmax.f32 %v5315_v16, 0.0  ;;  %v5825_v3 = vld [vmem:[%s7804_s8 + $0x430] ss:$100 sps:$4 sm:$0xff]   ;;  %v5833_v5 = vld [vmem:[%s7804_s8 + $0x4fc] ss:$100 sps:$4 sm:$0xff]  }
 0x2d3   :  { %3857 = vmatmul.mubr.bf16.vlgmr.msra.gmra.mrb[16].mxu1 %v6552_v50  ;;  %3939 = vmatmul.mubr.bf16.vlgmr.msra.gmra.mrb[24].mxu0 %v6552_v50  ;;  %v5828_v6 = vld [vmem:[%s7804_s8 + $0x4f0] ss:$100 sps:$4 sm:$0xff]   ;;  %v5831_v7 = vld [vmem:[%s7804_s8 + $0x4f8] ss:$100 sps:$4 sm:$0xff]   ;;  %v5837_v11 = vld [vmem:[%s7804_s8 + $0x5c0] ss:$100 sps:$4 sm:$0xff]  }
 0x2d4   :  { %v5091_v29 = vpack.c.bf16 %v4397_v24, %v4396_v20  ;;  %v5092_v30 = vpack.c.bf16 %v4399_v26, %v4398_v21  ;;  %3866 = vmatpush1.bf16.msra.mxu1 %v3294_v14  ;;  %3948 = vmatpush1.bf16.msra.mxu0 %v3300_v19  ;;  %v5836_v8 = vld [vmem:[%s7804_s8 + $0x5bc] ss:$100 sps:$4 sm:$0xff]   ;;  %v5842_v12 = vld [vmem:[%s7804_s8 + $0x684] ss:$100 sps:$4 sm:$0xff]   ;;  %v5845_v13 = vld [vmem:[%s7804_s8 + $0x68c] ss:$100 sps:$4 sm:$0xff]  }
 0x2d5   :  { %3897 = vmatprep.mubr.bf16.mxu1 %v6016_v57  ;;  %3979 = vmatprep.mubr.bf16.mxu0 %v6016_v57  ;;  %v5834_v10 = vld [vmem:[%s7804_s8 + $0x5b8] ss:$100 sps:$4 sm:$0xff]   ;;  %v5840_v14 = vld [vmem:[%s7804_s8 + $0x680] ss:$100 sps:$4 sm:$0xff]   ;;  %v5843_v15 = vld [vmem:[%s7804_s8 + $0x688] ss:$100 sps:$4 sm:$0xff]  }
 0x2d6   :  { %v4481_v32 = vrot.slane %v5091_v29, %v7215_v25  ;;  %v4488_v33 = vrot.slane %v5092_v30, %v7215_v25  ;;  %3988 = vmatprep.subr.bf16.mxu1 %v5794_v27  ;;  %4070 = vmatprep.subr.bf16.mxu0 %v5797_v28  ;;  %v5848_v16 = vld [vmem:[%s7804_s8 + $0x74c] ss:$100 sps:$4 sm:$0xff]   ;;  %v5851_v17 = vld [vmem:[%s7804_s8 + $0x754] ss:$100 sps:$4 sm:$0xff]   ;;  %v5857_v21 = vld [vmem:[%s7804_s8 + $0x81c] ss:$100 sps:$4 sm:$0xff]  }
 0x2d7   :  { %v5846_v18 = vld [vmem:[%s7804_s8 + $0x748] ss:$100 sps:$4 sm:$0xff]   ;;  %v5849_v19 = vld [vmem:[%s7804_s8 + $0x750] ss:$100 sps:$4 sm:$0xff]   ;;  %v5855_v23 = vld [vmem:[%s7804_s8 + $0x818] ss:$100 sps:$4 sm:$0xff]  }
 0x2d8   :  { %v7229_v34 = vcombine.low %v4481_v32, %v4488_v33  ;;  %v5854_v20 = vld [vmem:[%s7804_s8 + $0x814] ss:$100 sps:$4 sm:$0xff]   ;;  %v5860_v24 = vld [vmem:[%s7804_s8 + $0x8dc] ss:$100 sps:$4 sm:$0xff]   ;;  %v5863_v26 = vld [vmem:[%s7804_s8 + $0x8e4] ss:$100 sps:$4 sm:$0xff]  }
 0x2d9   :  { %v5852_v22 = vld [vmem:[%s7804_s8 + $0x810] ss:$100 sps:$4 sm:$0xff]   ;;  %v5858_v27 = vld [vmem:[%s7804_s8 + $0x8d8] ss:$100 sps:$4 sm:$0xff]   ;;  %v5861_v28 = vld [vmem:[%s7804_s8 + $0x8e0] ss:$100 sps:$4 sm:$0xff]  }
 0x2da   :  { %v5866_v29 = vld [vmem:[%s7804_s8 + $0x9a4] ss:$100 sps:$4 sm:$0xff]   ;;  %v5869_v30 = vld [vmem:[%s7804_s8 + $0x9ac] ss:$100 sps:$4 sm:$0xff]  }
 0x2db   :  { %v5864_v32 = vld [vmem:[%s7804_s8 + $0x9a0] ss:$100 sps:$4 sm:$0xff]   ;;  %v5867_v33 = vld [vmem:[%s7804_s8 + $0x9a8] ss:$100 sps:$4 sm:$0xff]  }
 0x2df   :  { %5084 = vmatmul.mubr.msk.bf16.vlgmr.msra.gmra.mrb[16].mxu1 %vm96_vm1, %v6576_v62  ;;  %5085 = vmatmul.mubr.msk.bf16.vlgmr.msra.gmra.mrb[24].mxu0 %vm96_vm1, %v6576_v62 }
 0x2e0   :  { %3989 = vmatpush1.bf16.msra.mxu1 %v5792_v36  ;;  %4071 = vmatpush1.bf16.msra.mxu0 %v5795_v38  ;;  %v5872_v36 = vld [vmem:[%s7804_s8 + $0xa6c] ss:$100 sps:$4 sm:$0xff]   ;;  %v5875_v38 = vld [vmem:[%s7804_s8 + $0xa74] ss:$100 sps:$4 sm:$0xff]  }
 0x2e1   :  { %4020 = vmatprep.mubr.bf16.mxu1 %v6548_v47  ;;  %4102 = vmatprep.mubr.bf16.mxu0 %v6548_v47 }
 0x2e2   :  { %3990 = vmatprep.subr.bf16.mxu1 %v5800_v39  ;;  %4072 = vmatprep.subr.bf16.mxu0 %v5803_v40  ;;  %v5870_v39 = vld [vmem:[%s7804_s8 + $0xa68] ss:$100 sps:$4 sm:$0xff]   ;;  %v5873_v40 = vld [vmem:[%s7804_s8 + $0xa70] ss:$100 sps:$4 sm:$0xff]  }
 0x2e4   :  { %3991 = vmatpush1.bf16.msra.mxu1 %v5798_v41  ;;  %4073 = vmatpush1.bf16.msra.mxu0 %v5801_v43  ;;  %v5878_v41 = vld [vmem:[%s7804_s8 + $0xb34] ss:$100 sps:$4 sm:$0xff]   ;;  %v5881_v43 = vld [vmem:[%s7804_s8 + $0xb3c] ss:$100 sps:$4 sm:$0xff]  }
 0x2e5   :  { %3992 = vmatprep.subr.bf16.mxu1 %v5806_v44  ;;  %4074 = vmatprep.subr.bf16.mxu0 %v5809_v45  ;;  %v1033_v44 = vld [vmem:[%s7804_s8 + $0xcc0] sm:$0xff]  ;;  %v1034_v45 = vld [vmem:[%s7804_s8 + $0xcc8] sm:$0xff] }
 0x2e8   :  { %3993 = vmatpush1.bf16.msra.mxu1 %v5804_v46  ;;  %4075 = vmatpush1.bf16.msra.mxu0 %v5807_v52  ;;  %v7412_v46 = vsub.s32 4, %v6190_v60  ;;  %v7415_v52 = vsub.s32 6, %v6190_v60 }
 0x2e9   :  { %3994 = vmatprep.subr.bf16.mxu1 %v5812_v53  ;;  %4076 = vmatprep.subr.bf16.mxu0 %v5815_v54  ;;  %v5876_v53 = vld [vmem:[%s7804_s8 + $0xb30] ss:$100 sps:$4 sm:$0xff]   ;;  %v5879_v54 = vld [vmem:[%s7804_s8 + $0xb38] ss:$100 sps:$4 sm:$0xff]  }
 0x2ec   :  { %3995 = vmatpush1.bf16.msra.mxu1 %v5810_v55  ;;  %4077 = vmatpush1.bf16.msra.mxu0 %v5813_v56  ;;  %v7424_v55 = vsub.s32 5, %v6190_v60  ;;  %v7427_v56 = vsub.s32 7, %v6190_v60  ;;  %v5069_v60 = vcombine.low %v1033_v44, %v1033_v44 }
 0x2ed   :  { %3996 = vmatprep.subr.bf16.mxu1 %v5818_v59  ;;  %4078 = vmatprep.subr.bf16.mxu0 %v5821_v61  ;;  %v5884_v59 = vld [vmem:[%s7804_s8 + $0xbfc] ss:$100 sps:$4 sm:$0xff]   ;;  %v5887_v61 = vld [vmem:[%s7804_s8 + $0xc04] ss:$100 sps:$4 sm:$0xff]  }
 0x2f0   :  { %3997 = vmatpush1.bf16.msra.mxu1 %v5816_v58  ;;  %4079 = vmatpush1.bf16.msra.mxu0 %v5819_v63  ;;  %v5070_v58 = vcombine.high %v1033_v44, %v1033_v44  ;;  %v5072_v63 = vcombine.high %v1034_v45, %v1034_v45  ;;  %v5900_v44 = vld [vmem:[%s7804_s8 + $0x11c] ss:$100 sps:$4 sm:$0xff]  }
 0x2f1   :  { %3998 = vmatprep.subr.bf16.mxu1 %v5824_v0  ;;  %4080 = vmatprep.subr.bf16.mxu0 %v5827_v1  ;;  %v1065_v0 = vrot.slane %v7185_v48, %v7412_v46  ;;  %v1073_v1 = vrot.slane %v7185_v48, %v7415_v52 }
 0x2f4   :  { %3999 = vmatpush1.bf16.msra.mxu1 %v5822_v2  ;;  %4081 = vmatpush1.bf16.msra.mxu0 %v5825_v3  ;;  %v5882_v2 = vld [vmem:[%s7804_s8 + $0xbf8] ss:$100 sps:$4 sm:$0xff]   ;;  %v5885_v3 = vld [vmem:[%s7804_s8 + $0xc00] ss:$100 sps:$4 sm:$0xff]  }
 0x2f5   :  { %4000 = vmatprep.subr.bf16.mxu1 %v5830_v4  ;;  %4082 = vmatprep.subr.bf16.mxu0 %v5833_v5  ;;  %v1069_v4 = vrot.slane %v7185_v48, %v7424_v55  ;;  %v1077_v5 = vrot.slane %v7185_v48, %v7427_v56 }
 0x2f8   :  { %4001 = vmatpush1.bf16.msra.mxu1 %v5828_v6  ;;  %4083 = vmatpush1.bf16.msra.mxu0 %v5831_v7  ;;  %v5071_v6 = vcombine.low %v1034_v45, %v1034_v45  ;;  %v3309_v7 = vand.u32 %v5070_v58, %v6533_v31  ;;  %v5898_v45 = vld [vmem:[%s7804_s8 + $0x118] ss:$100 sps:$4 sm:$0xff]   ;;  %v5907_v58 = vld [vmem:[%s7804_s8 + $0x1e8] ss:$100 sps:$4 sm:$0xff]  }
 0x2f9   :  { %4002 = vmatprep.subr.bf16.mxu1 %v5836_v8  ;;  %4084 = vmatprep.subr.bf16.mxu0 %v5839_v9  ;;  %v3315_v8 = vand.u32 %v5072_v63, %v6533_v31  ;;  %v5912_v63 = vld [vmem:[%s7804_s8 + $0x2ac] ss:$100 sps:$4 sm:$0xff]  }
 0x2fc   :  { %4003 = vmatpush1.bf16.msra.mxu1 %v5834_v10  ;;  %4085 = vmatpush1.bf16.msra.mxu0 %v5837_v11 }
 0x2fd   :  { %4004 = vmatprep.subr.bf16.mxu1 %v5842_v12  ;;  %4086 = vmatprep.subr.bf16.mxu0 %v5845_v13 }
 0x300   :  { %4005 = vmatpush1.bf16.msra.mxu1 %v5840_v14  ;;  %4087 = vmatpush1.bf16.msra.mxu0 %v5843_v15  ;;  %v3306_v15 = vand.u32 %v5069_v60, %v6533_v31  ;;  %v5913_v60 = vld [vmem:[%s7804_s8 + $0x2b0] ss:$100 sps:$4 sm:$0xff]  }
 0x301   :  { %4006 = vmatprep.subr.bf16.mxu1 %v5848_v16  ;;  %4088 = vmatprep.subr.bf16.mxu0 %v5851_v17 }
 0x304   :  { %4007 = vmatpush1.bf16.msra.mxu1 %v5846_v18  ;;  %4089 = vmatpush1.bf16.msra.mxu0 %v5849_v19  ;;  %v3312_v19 = vand.u32 %v5071_v6, %v6533_v31  ;;  %v5924_v6 = vld [vmem:[%s7804_s8 + $0x43c] ss:$100 sps:$4 sm:$0xff]  }
 0x305   :  { %4008 = vmatprep.subr.bf16.mxu1 %v5854_v20  ;;  %4090 = vmatprep.subr.bf16.mxu0 %v5857_v21 }
 0x308   :  { %4009 = vmatpush1.bf16.msra.mxu1 %v5852_v22  ;;  %4091 = vmatpush1.bf16.msra.mxu0 %v5855_v23 }
 0x309   :  { %4010 = vmatprep.subr.bf16.mxu1 %v5860_v24  ;;  %4092 = vmatprep.subr.bf16.mxu0 %v5863_v26 }
 0x30c   :  { %4011 = vmatpush1.bf16.msra.mxu1 %v5858_v27  ;;  %4093 = vmatpush1.bf16.msra.mxu0 %v5861_v28  ;;  %v5894_v27 = vld [vmem:[%s7804_s8 + $0x54] ss:$100 sps:$4 sm:$0xff]   ;;  %v5897_v28 = vld [vmem:[%s7804_s8 + $0x5c] ss:$100 sps:$4 sm:$0xff]  }
 0x30d   :  { %4012 = vmatprep.subr.bf16.mxu1 %v5866_v29  ;;  %4094 = vmatprep.subr.bf16.mxu0 %v5869_v30 }
 0x310   :  { %4013 = vmatpush1.bf16.msra.mxu1 %v5864_v32  ;;  %4095 = vmatpush1.bf16.msra.mxu0 %v5867_v33 }
 0x311   :  { %4014 = vmatprep.subr.bf16.mxu1 %v5872_v36  ;;  %4096 = vmatprep.subr.bf16.mxu0 %v5875_v38  ;;  %v4511_v38 = vrot.slane %v7229_v34, %v7215_v25  ;;  %v5903_v34 = vld [vmem:[%s7804_s8 + $0x124] ss:$100 sps:$4 sm:$0xff]  }
 0x314   :  { %4015 = vmatpush1.bf16.msra.mxu1 %v5870_v39  ;;  %4097 = vmatpush1.bf16.msra.mxu0 %v5873_v40 }
 0x315   :  { %4016 = vmatprep.subr.bf16.mxu1 %v5878_v41  ;;  %4098 = vmatprep.subr.bf16.mxu0 %v5881_v43  ;;  %v5892_v41 = vld [vmem:[%s7804_s8 + $0x50] ss:$100 sps:$4 sm:$0xff]   ;;  %v5895_v43 = vld [vmem:[%s7804_s8 + $0x58] ss:$100 sps:$4 sm:$0xff]  }
 0x318   :  { %4017 = vmatpush1.bf16.msra.mxu1 %v5876_v53  ;;  %4099 = vmatpush1.bf16.msra.mxu0 %v5879_v54  ;;  %v5901_v53 = vld [vmem:[%s7804_s8 + $0x120] ss:$100 sps:$4 sm:$0xff]  }
 0x319   :  { %4018 = vmatprep.subr.bf16.mxu1 %v5884_v59  ;;  %4100 = vmatprep.subr.bf16.mxu0 %v5887_v61  ;;  %v5906_v54 = vld [vmem:[%s7804_s8 + $0x1e4] ss:$100 sps:$4 sm:$0xff]   ;;  %v5909_v59 = vld [vmem:[%s7804_s8 + $0x1ec] ss:$100 sps:$4 sm:$0xff]  }
 0x31a   :  { %v3571_v9 = vpop.f32.mrb[8].mxu1  ;;  %v3653_v10 = vpop.f32.mrb[16].mxu0  ;;  %v5904_v61 = vld [vmem:[%s7804_s8 + $0x1e0] ss:$100 sps:$4 sm:$0xff]  }
 0x31b   :  { %v5316_v11 = vadd.f32 %v3571_v9, %v1065_v0  ;;  %v5318_v12 = vadd.f32 %v3653_v10, %v1073_v1  ;;  %v3573_v13 = vpop.f32.mrb[9].mxu1  ;;  %v3655_v14 = vpop.f32.mrb[17].mxu0  ;;  %v5915_v0 = vld [vmem:[%s7804_s8 + $0x2b4] ss:$100 sps:$4 sm:$0xff]   ;;  %v5910_v1 = vld [vmem:[%s7804_s8 + $0x2a8] ss:$100 sps:$4 sm:$0xff]  }
 0x31c   :  { %4019 = vmatpush1.bf16.msra.mxu1 %v5882_v2  ;;  %4101 = vmatpush1.bf16.msra.mxu0 %v5885_v3  ;;  %v5317_v16 = vadd.f32 %v3573_v13, %v1069_v4  ;;  %v5319_v17 = vadd.f32 %v3655_v14, %v1077_v5  ;;  %v3575_v48 = vpop.f32.mrb[10].mxu1  ;;  %v3657_v18 = vpop.f32.mrb[18].mxu0  ;;  %v5918_v2 = vld [vmem:[%s7804_s8 + $0x374] ss:$100 sps:$4 sm:$0xff]   ;;  %v5921_v3 = vld [vmem:[%s7804_s8 + $0x37c] ss:$100 sps:$4 sm:$0xff]  }
 0x31d   :  { %v4400_v20 = vmax.f32 %v5316_v11, 0.0  ;;  %v4402_v21 = vmax.f32 %v5318_v12, 0.0  ;;  %4029 = vmatprep.subr.bf16.mxu1 %v3309_v7  ;;  %v3576_v22 = vpop.f32.mrb[11].mxu1  ;;  %v3658_v23 = vpop.f32.mrb[19].mxu0  ;;  %4111 = vmatprep.subr.bf16.mxu0 %v3315_v8  ;;  %v5916_v4 = vld [vmem:[%s7804_s8 + $0x370] ss:$100 sps:$4 sm:$0xff]  }
 0x31e   :  { %v4401_v24 = vmax.f32 %v5317_v16, 0.0  ;;  %v4403_v26 = vmax.f32 %v5319_v17, 0.0  ;;  %v5919_v5 = vld [vmem:[%s7804_s8 + $0x378] ss:$100 sps:$4 sm:$0xff]   ;;  %v5927_v7 = vld [vmem:[%s7804_s8 + $0x444] ss:$100 sps:$4 sm:$0xff]  }
 0x31f   :  { %4021 = vmatmul.mubr.bf16.vlgmr.msra.gmra.mrb[20].mxu1 %v6552_v50  ;;  %4103 = vmatmul.mubr.bf16.vlgmr.msra.gmra.mrb[28].mxu0 %v6552_v50  ;;  %v5922_v8 = vld [vmem:[%s7804_s8 + $0x438] ss:$100 sps:$4 sm:$0xff]   ;;  %v5925_v9 = vld [vmem:[%s7804_s8 + $0x440] ss:$100 sps:$4 sm:$0xff]   ;;  %v5933_v11 = vld [vmem:[%s7804_s8 + $0x50c] ss:$100 sps:$4 sm:$0xff]  }
 0x320   :  { %v5093_v29 = vpack.c.bf16 %v4401_v24, %v4400_v20  ;;  %v5094_v30 = vpack.c.bf16 %v4403_v26, %v4402_v21  ;;  %4030 = vmatpush1.bf16.msra.mxu1 %v3306_v15  ;;  %4112 = vmatpush1.bf16.msra.mxu0 %v3312_v19  ;;  %v5930_v10 = vld [vmem:[%s7804_s8 + $0x504] ss:$100 sps:$4 sm:$0xff]   ;;  %v5936_v14 = vld [vmem:[%s7804_s8 + $0x5cc] ss:$100 sps:$4 sm:$0xff]   ;;  %v5939_v15 = vld [vmem:[%s7804_s8 + $0x5d4] ss:$100 sps:$4 sm:$0xff]  }
 0x321   :  { %4061 = vmatprep.mubr.bf16.mxu1 %v6016_v57  ;;  %4143 = vmatprep.mubr.bf16.mxu0 %v6016_v57  ;;  %v5928_v12 = vld [vmem:[%s7804_s8 + $0x500] ss:$100 sps:$4 sm:$0xff]   ;;  %v5931_v13 = vld [vmem:[%s7804_s8 + $0x508] ss:$100 sps:$4 sm:$0xff]   ;;  %v5937_v17 = vld [vmem:[%s7804_s8 + $0x5d0] ss:$100 sps:$4 sm:$0xff]  }
 0x322   :  { %v4495_v32 = vrot.slane %v5093_v29, %v7215_v25  ;;  %v4502_v33 = vrot.slane %v5094_v30, %v7215_v25  ;;  %4152 = vmatprep.subr.bf16.mxu1 %v5894_v27  ;;  %4234 = vmatprep.subr.bf16.mxu0 %v5897_v28  ;;  %v5934_v16 = vld [vmem:[%s7804_s8 + $0x5c8] ss:$100 sps:$4 sm:$0xff]   ;;  %v5942_v48 = vld [vmem:[%s7804_s8 + $0x694] ss:$100 sps:$4 sm:$0xff]   ;;  %v5945_v18 = vld [vmem:[%s7804_s8 + $0x69c] ss:$100 sps:$4 sm:$0xff]  }
 0x323   :  { %v5940_v19 = vld [vmem:[%s7804_s8 + $0x690] ss:$100 sps:$4 sm:$0xff]   ;;  %v5943_v20 = vld [vmem:[%s7804_s8 + $0x698] ss:$100 sps:$4 sm:$0xff]   ;;  %v5951_v22 = vld [vmem:[%s7804_s8 + $0x764] ss:$100 sps:$4 sm:$0xff]  }
 0x324   :  { %v4504_v36 = vcombine.low %v4495_v32, %v4502_v33  ;;  %v5948_v21 = vld [vmem:[%s7804_s8 + $0x75c] ss:$100 sps:$4 sm:$0xff]   ;;  %v5954_v26 = vld [vmem:[%s7804_s8 + $0x824] ss:$100 sps:$4 sm:$0xff]   ;;  %v5957_v27 = vld [vmem:[%s7804_s8 + $0x82c] ss:$100 sps:$4 sm:$0xff]  }
 0x325   :  { %v5946_v23 = vld [vmem:[%s7804_s8 + $0x758] ss:$100 sps:$4 sm:$0xff]   ;;  %v5949_v24 = vld [vmem:[%s7804_s8 + $0x760] ss:$100 sps:$4 sm:$0xff]   ;;  %v5955_v29 = vld [vmem:[%s7804_s8 + $0x828] ss:$100 sps:$4 sm:$0xff]  }
 0x326   :  { %v4518_v39 = vrot.slane %v4504_v36, %v7215_v25  ;;  %v5952_v28 = vld [vmem:[%s7804_s8 + $0x820] ss:$100 sps:$4 sm:$0xff]   ;;  %v5960_v30 = vld [vmem:[%s7804_s8 + $0x8ec] ss:$100 sps:$4 sm:$0xff]   ;;  %v5963_v32 = vld [vmem:[%s7804_s8 + $0x8f4] ss:$100 sps:$4 sm:$0xff]  }
 0x327   :  { %v5958_v33 = vld [vmem:[%s7804_s8 + $0x8e8] ss:$100 sps:$4 sm:$0xff]   ;;  %v5961_v36 = vld [vmem:[%s7804_s8 + $0x8f0] ss:$100 sps:$4 sm:$0xff]  }
 0x328   :  { %v4519_v40 = vcombine.low %v4511_v38, %v4518_v39  ;;  %v5966_v38 = vld [vmem:[%s7804_s8 + $0x9b4] ss:$100 sps:$4 sm:$0xff]   ;;  %v5969_v39 = vld [vmem:[%s7804_s8 + $0x9bc] ss:$100 sps:$4 sm:$0xff]  }
 0x32a   :  { %4636 = vst [vmem:[%s7810_s10] sm:$0xff] %v4519_v40  ;;  %v5964_v40 = vld [vmem:[%s7804_s8 + $0x9b0] ss:$100 sps:$4 sm:$0xff]  }
 0x32b   :  { %5086 = vmatmul.mubr.msk.bf16.vlgmr.msra.gmra.mrb[20].mxu1 %vm96_vm1, %v6576_v62  ;;  %5087 = vmatmul.mubr.msk.bf16.vlgmr.msra.gmra.mrb[28].mxu0 %vm96_vm1, %v6576_v62 }
 0x32c   :  { %4153 = vmatpush1.bf16.msra.mxu1 %v5892_v41  ;;  %4235 = vmatpush1.bf16.msra.mxu0 %v5895_v43  ;;  %v5967_v41 = vld [vmem:[%s7804_s8 + $0x9b8] ss:$100 sps:$4 sm:$0xff]  }
 0x32d   :  { %4184 = vmatprep.mubr.bf16.mxu1 %v6548_v47  ;;  %4266 = vmatprep.mubr.bf16.mxu0 %v6548_v47  ;;  %v5972_v43 = vld [vmem:[%s7804_s8 + $0xa7c] ss:$100 sps:$4 sm:$0xff]  }
 0x32e   :  { %4154 = vmatprep.subr.bf16.mxu1 %v5900_v44  ;;  %4236 = vmatprep.subr.bf16.mxu0 %v5903_v34  ;;  %v5975_v44 = vld [vmem:[%s7804_s8 + $0xa84] ss:$100 sps:$4 sm:$0xff]   ;;  %v5970_v34 = vld [vmem:[%s7804_s8 + $0xa78] ss:$100 sps:$4 sm:$0xff]  }
 0x330   :  { %4155 = vmatpush1.bf16.msra.mxu1 %v5898_v45  ;;  %4237 = vmatpush1.bf16.msra.mxu0 %v5901_v53  ;;  %v5973_v45 = vld [vmem:[%s7804_s8 + $0xa80] ss:$100 sps:$4 sm:$0xff]  }
 0x331   :  { %4156 = vmatprep.subr.bf16.mxu1 %v5906_v54  ;;  %4238 = vmatprep.subr.bf16.mxu0 %v5909_v59  ;;  %v5978_v53 = vld [vmem:[%s7804_s8 + $0xb44] ss:$100 sps:$4 sm:$0xff]   ;;  %v5981_v54 = vld [vmem:[%s7804_s8 + $0xb4c] ss:$100 sps:$4 sm:$0xff]  }
 0x332   :  { %v1035_v59 = vld [vmem:[%s7804_s8 + $0xcd0] sm:$0xff] }
 0x334   :  { %4157 = vmatpush1.bf16.msra.mxu1 %v5904_v61  ;;  %4239 = vmatpush1.bf16.msra.mxu0 %v5907_v58  ;;  %v1036_v61 = vld [vmem:[%s7804_s8 + $0xcd8] sm:$0xff]  ;;  %v5976_v58 = vld [vmem:[%s7804_s8 + $0xb40] ss:$100 sps:$4 sm:$0xff]  }
 0x335   :  { %4158 = vmatprep.subr.bf16.mxu1 %v5912_v63  ;;  %4240 = vmatprep.subr.bf16.mxu0 %v5915_v0  ;;  %v5979_v63 = vld [vmem:[%s7804_s8 + $0xb48] ss:$100 sps:$4 sm:$0xff]  }
 0x336   :  { %v7660_v0 = vld [vmem:[%s7809_s9 + $0x8] sm:$0xff] }
 0x338   :  { %4159 = vmatpush1.bf16.msra.mxu1 %v5910_v1  ;;  %4241 = vmatpush1.bf16.msra.mxu0 %v5913_v60  ;;  %v5984_v1 = vld [vmem:[%s7804_s8 + $0xc0c] ss:$100 sps:$4 sm:$0xff]   ;;  %v5987_v60 = vld [vmem:[%s7804_s8 + $0xc14] ss:$100 sps:$4 sm:$0xff]  }
 0x339   :  { %4160 = vmatprep.subr.bf16.mxu1 %v5918_v2  ;;  %4242 = vmatprep.subr.bf16.mxu0 %v5921_v3  ;;  %v5074_v2 = vcombine.high %v1035_v59, %v1035_v59  ;;  %v5076_v3 = vcombine.high %v1036_v61, %v1036_v61 }
 0x33c   :  { %4161 = vmatpush1.bf16.msra.mxu1 %v5916_v4  ;;  %4243 = vmatpush1.bf16.msra.mxu0 %v5919_v5  ;;  %v1081_v4 = vrot.slane %v7660_v0, %v6538_v35  ;;  %v1089_v5 = vrot.slane %v7660_v0, %v6555_v51 }
 0x33d   :  { %4162 = vmatprep.subr.bf16.mxu1 %v5924_v6  ;;  %4244 = vmatprep.subr.bf16.mxu0 %v5927_v7  ;;  %v5073_v6 = vcombine.low %v1035_v59, %v1035_v59  ;;  %v5982_v7 = vld [vmem:[%s7804_s8 + $0xc08] ss:$100 sps:$4 sm:$0xff]   ;;  %v6002_v59 = vld [vmem:[%s7804_s8 + $0x380] ss:$100 sps:$4 sm:$0xff]  }
 0x340   :  { %4163 = vmatpush1.bf16.msra.mxu1 %v5922_v8  ;;  %4245 = vmatpush1.bf16.msra.mxu0 %v5925_v9  ;;  %v5985_v8 = vld [vmem:[%s7804_s8 + $0xc10] ss:$100 sps:$4 sm:$0xff]   ;;  %v1085_v9 = vrot.slane %v7660_v0, %v6544_v37 }
 0x341   :  { %4164 = vmatprep.subr.bf16.mxu1 %v5930_v10  ;;  %4246 = vmatprep.subr.bf16.mxu0 %v5933_v11  ;;  %v1093_v10 = vrot.slane %v7660_v0, %v7188_v49  ;;  %v5075_v11 = vcombine.low %v1036_v61, %v1036_v61  ;;  %v6004_v61 = vld [vmem:[%s7804_s8 + $0x448] ss:$100 sps:$4 sm:$0xff]  }
 0x344   :  { %4165 = vmatpush1.bf16.msra.mxu1 %v5928_v12  ;;  %4247 = vmatpush1.bf16.msra.mxu0 %v5931_v13  ;;  %v3321_v12 = vand.u32 %v5074_v2, %v6533_v31  ;;  %v3327_v13 = vand.u32 %v5076_v3, %v6533_v31  ;;  %v1097_v2 = vrot.slane %v7660_v0, %v7412_v46 }
 0x345   :  { %4166 = vmatprep.subr.bf16.mxu1 %v5936_v14  ;;  %4248 = vmatprep.subr.bf16.mxu0 %v5939_v15  ;;  %v1105_v3 = vrot.slane %v7660_v0, %v7415_v52 }
 0x348   :  { %4167 = vmatpush1.bf16.msra.mxu1 %v5934_v16  ;;  %4249 = vmatpush1.bf16.msra.mxu0 %v5937_v17 }
 0x349   :  { %4168 = vmatprep.subr.bf16.mxu1 %v5942_v48  ;;  %4250 = vmatprep.subr.bf16.mxu0 %v5945_v18 }
 0x34c   :  { %4169 = vmatpush1.bf16.msra.mxu1 %v5940_v19  ;;  %4251 = vmatpush1.bf16.msra.mxu0 %v5943_v20  ;;  %v3318_v19 = vand.u32 %v5073_v6, %v6533_v31 }
 0x34d   :  { %4170 = vmatprep.subr.bf16.mxu1 %v5948_v21  ;;  %4252 = vmatprep.subr.bf16.mxu0 %v5951_v22 }
 0x350   :  { %4171 = vmatpush1.bf16.msra.mxu1 %v5946_v23  ;;  %4253 = vmatpush1.bf16.msra.mxu0 %v5949_v24  ;;  %v3324_v24 = vand.u32 %v5075_v11, %v6533_v31 }
 0x351   :  { %4172 = vmatprep.subr.bf16.mxu1 %v5954_v26  ;;  %4254 = vmatprep.subr.bf16.mxu0 %v5957_v27 }
 0x354   :  { %4173 = vmatpush1.bf16.msra.mxu1 %v5952_v28  ;;  %4255 = vmatpush1.bf16.msra.mxu0 %v5955_v29 }
 0x355   :  { %4174 = vmatprep.subr.bf16.mxu1 %v5960_v30  ;;  %4256 = vmatprep.subr.bf16.mxu0 %v5963_v32 }
 0x358   :  { %4175 = vmatpush1.bf16.msra.mxu1 %v5958_v33  ;;  %4257 = vmatpush1.bf16.msra.mxu0 %v5961_v36  ;;  %v5992_v33 = vld [vmem:[%s7804_s8 + $0x6a0] ss:$100 sps:$4 sm:$0xff]  }
 0x359   :  { %4176 = vmatprep.subr.bf16.mxu1 %v5966_v38  ;;  %4258 = vmatprep.subr.bf16.mxu0 %v5969_v39 }
 0x35c   :  { %4177 = vmatpush1.bf16.msra.mxu1 %v5964_v40  ;;  %4259 = vmatpush1.bf16.msra.mxu0 %v5967_v41 }
 0x35d   :  { %4178 = vmatprep.subr.bf16.mxu1 %v5972_v43  ;;  %4260 = vmatprep.subr.bf16.mxu0 %v5975_v44  ;;  %v5996_v43 = vld [vmem:[%s7804_s8 + $0xce0] ss:$0 sps:$4 sm:$0xff]  }
 0x35e   :  { %v5993_v44 = vld [vmem:[%s7804_s8 + $0x60] ss:$100 sps:$4 sm:$0xff]  }
 0x360   :  { %4179 = vmatpush1.bf16.msra.mxu1 %v5970_v34  ;;  %4261 = vmatpush1.bf16.msra.mxu0 %v5973_v45  ;;  %v3330_v34 = vand.u32 %v5996_v43, %v6533_v31  ;;  %v5995_v45 = vld [vmem:[%s7804_s8 + $0x128] ss:$100 sps:$4 sm:$0xff]   ;;  %v5998_v31 = vld [vmem:[%s7804_s8 + $0x1f0] ss:$100 sps:$4 sm:$0xff]  }
 0x361   :  { %4180 = vmatprep.subr.bf16.mxu1 %v5978_v53  ;;  %4262 = vmatprep.subr.bf16.mxu0 %v5981_v54  ;;  %v5997_v53 = vld [vmem:[%s7804_s8 + $0x830] ss:$100 sps:$4 sm:$0xff]   ;;  %v6000_v54 = vld [vmem:[%s7804_s8 + $0x2b8] ss:$100 sps:$4 sm:$0xff]  }
 0x364   :  { %4181 = vmatpush1.bf16.msra.mxu1 %v5976_v58  ;;  %4263 = vmatpush1.bf16.msra.mxu0 %v5979_v63  ;;  %v6005_v58 = vld [vmem:[%s7804_s8 + $0xb50] ss:$100 sps:$4 sm:$0xff]  }
 0x365   :  { %4182 = vmatprep.subr.bf16.mxu1 %v5984_v1  ;;  %4264 = vmatprep.subr.bf16.mxu0 %v5987_v60  ;;  %v6006_v63 = vld [vmem:[%s7804_s8 + $0x510] ss:$100 sps:$4 sm:$0xff]   ;;  %v6007_v1 = vld [vmem:[%s7804_s8 + $0xc18] ss:$100 sps:$4 sm:$0xff]  }
 0x366   :  { %v3735_v14 = vpop.f32.mrb[12].mxu1  ;;  %v3817_v15 = vpop.f32.mrb[20].mxu0  ;;  %v6008_v60 = vld [vmem:[%s7804_s8 + $0x5d8] ss:$100 sps:$4 sm:$0xff]  }
 0x367   :  { %v5320_v16 = vadd.f32 %v3735_v14, %v1081_v4  ;;  %v5322_v17 = vadd.f32 %v3817_v15, %v1089_v5  ;;  %v3737_v48 = vpop.f32.mrb[13].mxu1  ;;  %v3819_v18 = vpop.f32.mrb[21].mxu0  ;;  %v1101_v4 = vrot.slane %v7660_v0, %v7424_v55  ;;  %v1109_v5 = vrot.slane %v7660_v0, %v7427_v56 }
 0x368   :  { %4183 = vmatpush1.bf16.msra.mxu1 %v5982_v7  ;;  %4265 = vmatpush1.bf16.msra.mxu0 %v5985_v8  ;;  %v5321_v20 = vadd.f32 %v3737_v48, %v1085_v9  ;;  %v5323_v21 = vadd.f32 %v3819_v18, %v1093_v10  ;;  %v3739_v22 = vpop.f32.mrb[14].mxu1  ;;  %v3821_v23 = vpop.f32.mrb[22].mxu0 }
 0x369   :  { %v4404_v26 = vmax.f32 %v5320_v16, 0.0  ;;  %v4406_v27 = vmax.f32 %v5322_v17, 0.0  ;;  %4193 = vmatprep.subr.bf16.mxu1 %v3321_v12  ;;  %v3740_v28 = vpop.f32.mrb[15].mxu1  ;;  %v3822_v29 = vpop.f32.mrb[23].mxu0  ;;  %4275 = vmatprep.subr.bf16.mxu0 %v3327_v13 }
 0x36a   :  { %v4405_v30 = vmax.f32 %v5321_v20, 0.0  ;;  %v4407_v32 = vmax.f32 %v5323_v21, 0.0  ;;  %v1040_v28 = vld [vmem:[%s7809_s9 + $0x10] sm:$0xff] }
 0x36b   :  { %4185 = vmatmul.mubr.bf16.vlgmr.msra.gmra.mrb[24].mxu1 %v6552_v50  ;;  %4267 = vmatmul.mubr.bf16.vlgmr.msra.gmra.mrb[32].mxu0 %v6552_v50  ;;  %v1113_v29 = vrot.slane %v1040_v28, %v6538_v35 }
 0x36c   :  { %v5095_v36 = vpack.c.bf16 %v4405_v30, %v4404_v26  ;;  %v5096_v38 = vpack.c.bf16 %v4407_v32, %v4406_v27  ;;  %4194 = vmatpush1.bf16.msra.mxu1 %v3318_v19  ;;  %4276 = vmatpush1.bf16.msra.mxu0 %v3324_v24  ;;  %v1121_v30 = vrot.slane %v1040_v28, %v6555_v51 }
 0x36d   :  { %4225 = vmatprep.mubr.bf16.mxu1 %v6016_v57  ;;  %4307 = vmatprep.mubr.bf16.mxu0 %v6016_v57  ;;  %v5994_v57 = vld [vmem:[%s7804_s8 + $0x768] ss:$100 sps:$4 sm:$0xff]   ;;  %v1117_v32 = vrot.slane %v1040_v28, %v6544_v37 }
 0x36e   :  { %v4530_v39 = vrot.slane %v5095_v36, %v7215_v25  ;;  %v4537_v40 = vrot.slane %v5096_v38, %v7215_v25  ;;  %5183 = vmatprep.subr.bf16.mxu1 %v5992_v33  ;;  %5228 = vmatprep.subr.bf16.mxu0 %v6012_v42  ;;  %v1125_v33 = vrot.slane %v1040_v28, %v7188_v49 }
 0x370   :  { %v7696_v41 = vcombine.low %v4530_v39, %v4537_v40 }
 0x372   :  { %v4560_v24 = vrot.slane %v7696_v41, %v7215_v25 }
 0x377   :  { %5088 = vmatmul.mubr.msk.bf16.vlgmr.msra.gmra.mrb[24].mxu1 %vm96_vm1, %v6576_v62  ;;  %5089 = vmatmul.mubr.msk.bf16.vlgmr.msra.gmra.mrb[32].mxu0 %vm96_vm1, %v6576_v62 }
 0x378   :  { %5184 = vmatpush3.bf16.msra.mxu1 %v5993_v44  ;;  %4348 = vmatprep.mubr.bf16.mxu1 %v6548_v47  ;;  %v5999_v47 = vld [vmem:[%s7804_s8 + $0x8f8] ss:$100 sps:$4 sm:$0xff]  }
 0x379   :  { %5185 = vmatprep.subr.bf16.mxu1 %v5994_v57  ;;  %5229 = vmatpush3.bf16.msra.mxu0 %v3330_v34 }
 0x37a   :  { %5230 = vmatprep.mubr.msk.bf16.mxu0 %vm6013_vm2, %v6012_v42  ;;  %v6001_v42 = vld [vmem:[%s7804_s8 + $0x9c0] ss:$100 sps:$4 sm:$0xff]  }
 0x37c   :  { %5186 = vmatpush3.bf16.msra.mxu1 %v5995_v45 }
 0x37d   :  { %5187 = vmatprep.subr.bf16.mxu1 %v5997_v53 }
 0x37f   :  { %5231 = vmatmul.mubr.msk.bf16.vlgmr.msra.gmra.mrb[36].mxu0 %vm96_vm1, %v6576_v62  ;;  %v6003_v62 = vld [vmem:[%s7804_s8 + $0xa88] ss:$100 sps:$4 sm:$0xff]  }
 0x380   :  { %5188 = vmatpush3.bf16.msra.mxu1 %v5998_v31 }
 0x381   :  { %5189 = vmatprep.subr.bf16.mxu1 %v5999_v47 }
 0x384   :  { %5190 = vmatpush3.bf16.msra.mxu1 %v6000_v54 }
 0x385   :  { %5191 = vmatprep.subr.bf16.mxu1 %v6001_v42 }
 0x388   :  { %5192 = vmatpush3.bf16.msra.mxu1 %v6002_v59 }
 0x389   :  { %5193 = vmatprep.subr.bf16.mxu1 %v6003_v62 }
 0x38c   :  { %5194 = vmatpush3.bf16.msra.mxu1 %v6004_v61  ;;  %v1129_v61 = vrot.slane %v1040_v28, %v7412_v46 }
 0x38d   :  { %5195 = vmatprep.subr.bf16.mxu1 %v6005_v58  ;;  %v1137_v58 = vrot.slane %v1040_v28, %v7415_v52 }
 0x390   :  { %5196 = vmatpush3.bf16.msra.mxu1 %v6006_v63  ;;  %v1133_v63 = vrot.slane %v1040_v28, %v7424_v55 }
 0x391   :  { %5197 = vmatprep.subr.bf16.mxu1 %v6007_v1  ;;  %v1141_v1 = vrot.slane %v1040_v28, %v7427_v56 }
 0x394   :  { %5198 = vmatpush3.bf16.msra.mxu1 %v6008_v60 }
 0x397   :  { %4349 = vmatmul.mubr.bf16.vlgmr.msra.gmra.mrb[28].mxu1 %v6552_v50 }
 0x3b2   :  { %v3899_v6 = vpop.f32.mrb[16].mxu1  ;;  %v3981_v7 = vpop.f32.mrb[24].mxu0 }
 0x3b3   :  { %v5324_v8 = vadd.f32 %v3899_v6, %v1097_v2  ;;  %v5326_v9 = vadd.f32 %v3981_v7, %v1105_v3  ;;  %v3901_v10 = vpop.f32.mrb[17].mxu1  ;;  %v3983_v11 = vpop.f32.mrb[25].mxu0 }
 0x3b4   :  { %v5325_v12 = vadd.f32 %v3901_v10, %v1101_v4  ;;  %v5327_v50 = vadd.f32 %v3983_v11, %v1109_v5  ;;  %v3903_v13 = vpop.f32.mrb[18].mxu1  ;;  %v3985_v14 = vpop.f32.mrb[26].mxu0 }
 0x3b5   :  { %v4408_v15 = vmax.f32 %v5324_v8, 0.0  ;;  %v4410_v16 = vmax.f32 %v5326_v9, 0.0  ;;  %v3904_v17 = vpop.f32.mrb[19].mxu1  ;;  %v3986_v48 = vpop.f32.mrb[27].mxu0 }
 0x3b6   :  { %v4409_v18 = vmax.f32 %v5325_v12, 0.0  ;;  %v4411_v19 = vmax.f32 %v5327_v50, 0.0 }
 0x3b8   :  { %v5097_v20 = vpack.c.bf16 %v4409_v18, %v4408_v15  ;;  %v5098_v21 = vpack.c.bf16 %v4411_v19, %v4410_v16 }
 0x3ba   :  { %v4544_v0 = vrot.slane %v5097_v20, %v7215_v25  ;;  %v4551_v22 = vrot.slane %v5098_v21, %v7215_v25 }
 0x3bc   :  { %v4553_v23 = vcombine.low %v4544_v0, %v4551_v22 }
 0x3be   :  { %v4567_v26 = vrot.slane %v4553_v23, %v7215_v25  ;;  %v4652_v23 = vld [vmem:[%s7809_s9 + $0x18] ss:$0 sm:$0xff] }
 0x3c0   :  { %v4568_v27 = vcombine.low %v4560_v24, %v4567_v26 }
 0x3c2   :  { %4637 = vst [vmem:[%s7810_s10 + $0x8] sm:$0xff] %v4568_v27 }
 0x3fe   :  { %v4063_v36 = vpop.f32.mrb[20].mxu1  ;;  %v4145_v38 = vpop.f32.mrb[28].mxu0 }
 0x3ff   :  { %v5328_v39 = vadd.f32 %v4063_v36, %v1113_v29  ;;  %v5330_v40 = vadd.f32 %v4145_v38, %v1121_v30  ;;  %v4065_v41 = vpop.f32.mrb[21].mxu1  ;;  %v4147_v43 = vpop.f32.mrb[29].mxu0 }
 0x400   :  { %v5329_v44 = vadd.f32 %v4065_v41, %v1117_v32  ;;  %v5331_v57 = vadd.f32 %v4147_v43, %v1125_v33  ;;  %v4067_v34 = vpop.f32.mrb[22].mxu1  ;;  %v4149_v45 = vpop.f32.mrb[30].mxu0 }
 0x401   :  { %v4412_v53 = vmax.f32 %v5328_v39, 0.0  ;;  %v4414_v31 = vmax.f32 %v5330_v40, 0.0  ;;  %v4068_v47 = vpop.f32.mrb[23].mxu1  ;;  %v4150_v35 = vpop.f32.mrb[31].mxu0 }
 0x402   :  { %v4413_v54 = vmax.f32 %v5329_v44, 0.0  ;;  %v4415_v51 = vmax.f32 %v5331_v57, 0.0 }
 0x404   :  { %v5099_v42 = vpack.c.bf16 %v4413_v54, %v4412_v53  ;;  %v5100_v37 = vpack.c.bf16 %v4415_v51, %v4414_v31 }
 0x406   :  { %v4579_v49 = vrot.slane %v5099_v42, %v7215_v25  ;;  %v4586_v59 = vrot.slane %v5100_v37, %v7215_v25 }
 0x408   :  { %v4601_v62 = vcombine.low %v4579_v49, %v4586_v59 }
 0x40a   :  { %v4609_v20 = vrot.slane %v4601_v62, %v7215_v25 }
 0x44a   :  { %v4227_v60 = vpop.f32.mrb[24].mxu1  ;;  %v4309_v2 = vpop.f32.mrb[32].mxu0 }
 0x44b   :  { %v5332_v3 = vadd.f32 %v4227_v60, %v1129_v61  ;;  %v5334_v4 = vadd.f32 %v4309_v2, %v1137_v58  ;;  %v4229_v5 = vpop.f32.mrb[25].mxu1  ;;  %v4311_v6 = vpop.f32.mrb[33].mxu0 }
 0x44c   :  { %v5333_v7 = vadd.f32 %v4229_v5, %v1133_v63  ;;  %v5335_v8 = vadd.f32 %v4311_v6, %v1141_v1  ;;  %v4231_v9 = vpop.f32.mrb[26].mxu1  ;;  %v4313_v10 = vpop.f32.mrb[34].mxu0 }
 0x44d   :  { %v4416_v11 = vmax.f32 %v5332_v3, 0.0  ;;  %v4418_v12 = vmax.f32 %v5334_v4, 0.0  ;;  %v4232_v50 = vpop.f32.mrb[27].mxu1  ;;  %v4314_v46 = vpop.f32.mrb[35].mxu0 }
 0x44e   :  { %v4417_v13 = vmax.f32 %v5333_v7, 0.0  ;;  %v4419_v52 = vmax.f32 %v5335_v8, 0.0 }
 0x450   :  { %v5101_v14 = vpack.c.bf16 %v4417_v13, %v4416_v11  ;;  %v5102_v55 = vpack.c.bf16 %v4419_v52, %v4418_v12 }
 0x452   :  { %v4593_v56 = vrot.slane %v5101_v14, %v7215_v25  ;;  %v4600_v15 = vrot.slane %v5102_v55, %v7215_v25  ;;  %v4390_v16 = vpop.f32.mrb[36].mxu0 }
 0x453   :  { %v5232_v17 = vpop.f32.mrb[37].mxu0 }
 0x454   :  { %v4602_v48 = vcombine.low %v4593_v56, %v4600_v15  ;;  %v4393_v18 = vpop.f32.mrb[38].mxu0 }
 0x455   :  { %v5233_v19 = vpop.f32.mrb[39].mxu0 }
 0x456   :  { %v4616_v21 = vrot.slane %v4602_v48, %v7215_v25 }
 0x458   :  { %v4617_v0 = vcombine.low %v4609_v20, %v4616_v21 }
 0x45a   :  { %4638 = vst [vmem:[%s7810_s10 + $0x10] sm:$0xff] %v4617_v0 }
 0x46a   :  { %v5199_v22 = vpop.f32.mrb[28].mxu1 }
 0x46b   :  { %v5200_v24 = vpop.f32.mrb[29].mxu1 }
 0x46c   :  { %v5201_v26 = vadd.f32 %v5200_v24, %v5199_v22  ;;  %v5202_v27 = vpop.f32.mrb[30].mxu1 }
 0x46d   :  { %v5203_v28 = vpop.f32.mrb[31].mxu1 }
 0x46e   :  { %v4351_v29 = vadd.f32 %v5201_v26, %v4652_v23 }
 0x470   :  { %v4391_v30 = vadd.f32 %v4390_v16, %v4351_v29 }
 0x472   :  { %v4420_v32 = vmax.f32 %v4391_v30, 0.0 }
 0x474   :  { %v4445_v33 = vpack.c.bf16 %v4420_v32, %v4420_v32 }
 0x476   :  { %v4624_v36 = vrot.slane %v4445_v33, %v7215_v25 }
 0x478   :  { %5103 = vst.sshfl [vmem:[%s7810_s10 + $0x18] sm:$0x1 pattern:$0x73625140] %v4624_v36 }

// kernel: vae_decoder_forward.5
= control target key start
LH: loop header
LB: loop body
LE: loop exit
PB: predicated region body
PF: predicated region fallthrough
CT: control target
= control target key end

     0   :  { %s1612_s9 = smov 0   ;;  %s2033_s0 = inlined_call_operand.vmem [shape: bf16[2,25,128], index: 0, kind: input, shape index: {}]   ;;  %s2034_s1 = inlined_call_operand.vmem [shape: bf16[128,1600], index: 1, kind: input, shape index: {}]   ;;  %s2035_s2 = inlined_call_operand.vmem [shape: f32[2,25,1600], index: 2, kind: output, shape index: {}]  }
   0x1 LB: > { %s1277_s10 = sadd.s32 4294967295, %s1594_s9   ;;  %p1281_p0 = scmp.ge.s32.totalorder %s1594_s9, 1  ;;  %s1594_s9 = sphi %s1612_s9, %s12_s9  }
   0x2   : > { %p112_p1 = scmp.lt.s32.totalorder %s1594_s9, 3 }
   0x4   : > { %p113_p2 = pnand %p1281_p0, %p112_p1 }
   0x5   : > { %v1434_v0 = vld [vmem:[%s2034_s1 + $0x4] ss:$52 sps:$4 sm:$0xff] (!%p113_p2)   ;;  %v1436_v1 = vld [vmem:[%s2034_s1] ss:$52 sps:$4 sm:$0xff] (!%p113_p2)   ;;  %v1596_v2 = vmov (!%p113_p2), 0   ;;  %p134_p3 = scmp.lt.s32.totalorder (!%p113_p2), %s1277_s10, 1 }
   0x6   : > { %116 = sbr.rel (%p113_p2) target bundleno = 351 (0x15f), region = 28  ;;  %833 = vmatprep.mubr.bf16.mxu0 (!%p113_p2), %v1596_v2  ;;  %886 = vmatprep.mubr.bf16.mxu1 (!%p113_p2), %v1596_v2  ;;  %v1437_v3 = vld [vmem:[%s2034_s1 + $0x6c] ss:$52 sps:$4 sm:$0xff] (!%p113_p2)   ;;  %v1439_v4 = vld [vmem:[%s2034_s1 + $0x68] ss:$52 sps:$4 sm:$0xff] (!%p113_p2)   ;;  %vm1180_vm0 = vcmask (!%p113_p2), 523264  }
   0x7   : > { %801 = vmatprep.subr.bf16.mxu0 (!%p113_p2), %v1434_v0  ;;  %v1440_v5 = vld [vmem:[%s2034_s1 + $0xd4] ss:$52 sps:$4 sm:$0xff] (!%p113_p2)   ;;  %v1442_v6 = vld [vmem:[%s2034_s1 + $0xd0] ss:$52 sps:$4 sm:$0xff] (!%p113_p2)   ;;  %v1452_v8 = vld [vmem:[%s2034_s1 + $0xc] ss:$52 sps:$4 sm:$0xff] (!%p113_p2)  }
   0x8   : > { %802 = vmatpush1.bf16.msra.mxu0 (!%p113_p2), %v1436_v1  ;;  %v1443_v7 = vld [vmem:[%s2034_s1 + $0x13c] ss:$52 sps:$4 sm:$0xff] (!%p113_p2)   ;;  %v1445_v10 = vld [vmem:[%s2034_s1 + $0x138] ss:$52 sps:$4 sm:$0xff] (!%p113_p2)   ;;  %854 = vmatprep.subr.bf16.mxu1 (!%p113_p2), %v1452_v8  ;;  %v1458_v11 = vld [vmem:[%s2034_s1 + $0x74] ss:$52 sps:$4 sm:$0xff] (!%p113_p2)  }
   0x9   : > { %803 = vmatprep.subr.bf16.mxu0 (!%p113_p2), %v1437_v3  ;;  %v1454_v9 = vld [vmem:[%s2034_s1 + $0x8] ss:$52 sps:$4 sm:$0xff] (!%p113_p2)   ;;  %v1460_v12 = vld [vmem:[%s2034_s1 + $0x70] ss:$52 sps:$4 sm:$0xff] (!%p113_p2)   ;;  %v1448_v14 = vld [vmem:[%s2034_s1 + $0x1a0] ss:$52 sps:$4 sm:$0xff] (!%p113_p2)  }
   0xa   : > { %855 = vmatpush1.bf16.msra.mxu1 (!%p113_p2), %v1454_v9  ;;  %v1446_v13 = vld [vmem:[%s2034_s1 + $0x1a4] ss:$52 sps:$4 sm:$0xff] (!%p113_p2)   ;;  %v1464_v15 = vld [vmem:[%s2034_s1 + $0xdc] ss:$52 sps:$4 sm:$0xff] (!%p113_p2)   ;;  %v1449_v17 = vld [vmem:[%s2034_s1 + $0x20c] ss:$52 sps:$4 sm:$0xff] (!%p113_p2)  }
   0xb   : > { %856 = vmatprep.subr.bf16.mxu1 (!%p113_p2), %v1458_v11  ;;  %v1466_v16 = vld [vmem:[%s2034_s1 + $0xd8] ss:$52 sps:$4 sm:$0xff] (!%p113_p2)   ;;  %v1451_v19 = vld [vmem:[%s2034_s1 + $0x208] ss:$52 sps:$4 sm:$0xff] (!%p113_p2)   ;;  %v1473_v20 = vld [vmem:[%s2034_s1 + $0x140] ss:$52 sps:$4 sm:$0xff] (!%p113_p2)  }
   0xc   : > { %804 = vmatpush1.bf16.msra.mxu0 (!%p113_p2), %v1439_v4  ;;  %v1471_v18 = vld [vmem:[%s2034_s1 + $0x144] ss:$52 sps:$4 sm:$0xff] (!%p113_p2)   ;;  %v1455_v21 = vld [vmem:[%s2034_s1 + $0x274] ss:$52 sps:$4 sm:$0xff] (!%p113_p2)   ;;  %v1477_v22 = vld [vmem:[%s2034_s1 + $0x1ac] ss:$52 sps:$4 sm:$0xff] (!%p113_p2)  }
   0xd   : > { %s2037_s10 = smov (!%p134_p3, %s1277_s10), 1  ;;  %805 = vmatprep.subr.bf16.mxu0 %v1440_v5  ;;  %v1457_v23 = vld [vmem:[%s2034_s1 + $0x270] ss:$52 sps:$4 sm:$0xff]   ;;  %v1479_v24 = vld [vmem:[%s2034_s1 + $0x1a8] ss:$52 sps:$4 sm:$0xff]   ;;  %vm1220_vm1 = vcmask 516096  }
   0xe   : > { %s1393_s3 = sshll.u32 %s2037_s10, 4  ;;  %857 = vmatpush1.bf16.msra.mxu1 %v1460_v12  ;;  %v1461_v25 = vld [vmem:[%s2034_s1 + $0x2dc] ss:$52 sps:$4 sm:$0xff]   ;;  %v1483_v26 = vld [vmem:[%s2034_s1 + $0x214] ss:$52 sps:$4 sm:$0xff]   ;;  %s1424_s17 = smul.u32 416, %s2037_s10 }
   0xf   : > { %s1667_s14 = scalar_lea.vmem %s2033_s0, %s1393_s3  ;;  %858 = vmatprep.subr.bf16.mxu1 %v1464_v15  ;;  %v1463_v27 = vld [vmem:[%s2034_s1 + $0x2d8] ss:$52 sps:$4 sm:$0xff]   ;;  %v1485_v28 = vld [vmem:[%s2034_s1 + $0x210] ss:$52 sps:$4 sm:$0xff]   ;;  %v1470_v29 = vld [vmem:[%s2034_s1 + $0x14] ss:$52 sps:$4 sm:$0xff]  }
  0x10   : > { %806 = vmatpush1.bf16.msra.mxu0 %v1442_v6  ;;  %v1489_v30 = vld [vmem:[%s2034_s1 + $0x27c] ss:$52 sps:$4 sm:$0xff]   ;;  %v1721_v31 = vld [vmem:[%s1667_s14] sm:$0xff]   ;;  %v1491_v34 = vld [vmem:[%s2034_s1 + $0x278] ss:$52 sps:$4 sm:$0xff]   ;;  %s1976_s20 = scalar_lea.vmem %s2035_s2, %s1424_s17 }
  0x11   : > { %807 = vmatprep.subr.bf16.mxu0 %v1443_v7  ;;  %v1468_v32 = vld [vmem:[%s2034_s1 + $0x10] ss:$52 sps:$4 sm:$0xff]   ;;  %v1474_v36 = vld [vmem:[%s2034_s1 + $0x78] ss:$52 sps:$4 sm:$0xff]   ;;  %v1497_v37 = vld [vmem:[%s2034_s1 + $0x2e0] ss:$52 sps:$4 sm:$0xff]  }
  0x12   : > { %859 = vmatpush1.bf16.msra.mxu1 %v1466_v16  ;;  %v1476_v33 = vld [vmem:[%s2034_s1 + $0x7c] ss:$52 sps:$4 sm:$0xff]   ;;  %v1495_v35 = vld [vmem:[%s2034_s1 + $0x2e4] ss:$52 sps:$4 sm:$0xff]   ;;  %v1480_v40 = vld [vmem:[%s2034_s1 + $0xe0] ss:$52 sps:$4 sm:$0xff]  }
  0x13   : > { %860 = vmatprep.subr.bf16.mxu1 %v1471_v18  ;;  %v1482_v38 = vld [vmem:[%s2034_s1 + $0xe4] ss:$52 sps:$4 sm:$0xff]   ;;  %v1503_v39 = vld [vmem:[%s2034_s1 + $0x1c] ss:$52 sps:$4 sm:$0xff]   ;;  %v1753_v41 = vld [vmem:[%s1667_s14 + $0x8] sm:$0x1f]  }
  0x14   : > { %808 = vmatpush1.bf16.msra.mxu0 %v1445_v10  ;;  %v1501_v42 = vld [vmem:[%s2034_s1 + $0x18] ss:$52 sps:$4 sm:$0xff]   ;;  %v1486_v45 = vld [vmem:[%s2034_s1 + $0x148] ss:$52 sps:$4 sm:$0xff]   ;;  %v1508_v46 = vld [vmem:[%s2034_s1 + $0x80] ss:$52 sps:$4 sm:$0xff]  }
  0x15   : > { %809 = vmatprep.subr.bf16.mxu0 %v1446_v13  ;;  %v1488_v43 = vld [vmem:[%s2034_s1 + $0x14c] ss:$52 sps:$4 sm:$0xff]   ;;  %v1510_v44 = vld [vmem:[%s2034_s1 + $0x84] ss:$52 sps:$4 sm:$0xff]   ;;  %v1494_v47 = vld [vmem:[%s2034_s1 + $0x1b4] ss:$52 sps:$4 sm:$0xff]  }
  0x16   : > { %861 = vmatpush1.bf16.msra.mxu1 %v1473_v20  ;;  %v1516_v48 = vld [vmem:[%s2034_s1 + $0xec] ss:$52 sps:$4 sm:$0xff]   ;;  %v1492_v49 = vld [vmem:[%s2034_s1 + $0x1b0] ss:$52 sps:$4 sm:$0xff]   ;;  %v1514_v50 = vld [vmem:[%s2034_s1 + $0xe8] ss:$52 sps:$4 sm:$0xff]  }
  0x17   : > { %862 = vmatprep.subr.bf16.mxu1 %v1477_v22  ;;  %v1500_v51 = vld [vmem:[%s2034_s1 + $0x21c] ss:$52 sps:$4 sm:$0xff]   ;;  %v1522_v52 = vld [vmem:[%s2034_s1 + $0x154] ss:$52 sps:$4 sm:$0xff]   ;;  %v1498_v53 = vld [vmem:[%s2034_s1 + $0x218] ss:$52 sps:$4 sm:$0xff]  }
  0x18   : > { %810 = vmatpush1.bf16.msra.mxu0 %v1448_v14  ;;  %v1520_v54 = vld [vmem:[%s2034_s1 + $0x150] ss:$52 sps:$4 sm:$0xff]   ;;  %v1505_v57 = vld [vmem:[%s2034_s1 + $0x280] ss:$52 sps:$4 sm:$0xff]   ;;  %v1526_v58 = vld [vmem:[%s2034_s1 + $0x1b8] ss:$52 sps:$4 sm:$0xff]  }
  0x19   : > { %811 = vmatprep.subr.bf16.mxu0 %v1449_v17  ;;  %v1507_v55 = vld [vmem:[%s2034_s1 + $0x284] ss:$52 sps:$4 sm:$0xff]   ;;  %v1528_v56 = vld [vmem:[%s2034_s1 + $0x1bc] ss:$52 sps:$4 sm:$0xff]   ;;  %v1513_v59 = vld [vmem:[%s2034_s1 + $0x2ec] ss:$52 sps:$4 sm:$0xff]  }
  0x1a   : > { %863 = vmatpush1.bf16.msra.mxu1 %v1479_v24  ;;  %v1534_v60 = vld [vmem:[%s2034_s1 + $0x224] ss:$52 sps:$4 sm:$0xff]   ;;  %v1511_v61 = vld [vmem:[%s2034_s1 + $0x2e8] ss:$52 sps:$4 sm:$0xff]   ;;  %v1532_v63 = vld [vmem:[%s2034_s1 + $0x220] ss:$52 sps:$4 sm:$0xff]  }
  0x1b   : > { %864 = vmatprep.subr.bf16.mxu1 %v1483_v26  ;;  %v1519_v62 = vld [vmem:[%s2034_s1 + $0x24] ss:$52 sps:$4 sm:$0xff]   ;;  %v1540_v0 = vld [vmem:[%s2034_s1 + $0x28c] ss:$52 sps:$4 sm:$0xff]   ;;  %v1538_v4 = vld [vmem:[%s2034_s1 + $0x288] ss:$52 sps:$4 sm:$0xff]  }
  0x1c   : > { %812 = vmatpush1.bf16.msra.mxu0 %v1451_v19  ;;  %v1517_v1 = vld [vmem:[%s2034_s1 + $0x20] ss:$52 sps:$4 sm:$0xff]   ;;  %v1523_v6 = vld [vmem:[%s2034_s1 + $0x88] ss:$52 sps:$4 sm:$0xff]   ;;  %v1544_v7 = vld [vmem:[%s2034_s1 + $0x2f0] ss:$52 sps:$4 sm:$0xff]  }
  0x1d   : > { %813 = vmatprep.subr.bf16.mxu0 %v1455_v21  ;;  %v1525_v3 = vld [vmem:[%s2034_s1 + $0x8c] ss:$52 sps:$4 sm:$0xff]   ;;  %v1546_v5 = vld [vmem:[%s2034_s1 + $0x2f4] ss:$52 sps:$4 sm:$0xff]   ;;  %v1529_v10 = vld [vmem:[%s2034_s1 + $0xf0] ss:$52 sps:$4 sm:$0xff]  }
  0x1e   : > { %865 = vmatpush1.bf16.msra.mxu1 %v1485_v28  ;;  %v1531_v8 = vld [vmem:[%s2034_s1 + $0xf4] ss:$52 sps:$4 sm:$0xff]   ;;  %v1552_v9 = vld [vmem:[%s2034_s1 + $0x2c] ss:$52 sps:$4 sm:$0xff]   ;;  %v1537_v11 = vld [vmem:[%s2034_s1 + $0x15c] ss:$52 sps:$4 sm:$0xff]  }
  0x1f   : > { %866 = vmatprep.subr.bf16.mxu1 %v1489_v30  ;;  %v1550_v12 = vld [vmem:[%s2034_s1 + $0x28] ss:$52 sps:$4 sm:$0xff]   ;;  %v1535_v14 = vld [vmem:[%s2034_s1 + $0x158] ss:$52 sps:$4 sm:$0xff]   ;;  %v1556_v15 = vld [vmem:[%s2034_s1 + $0x90] ss:$52 sps:$4 sm:$0xff]  }
  0x20   : > { %814 = vmatpush1.bf16.msra.mxu0 %v1457_v23  ;;  %v1558_v13 = vld [vmem:[%s2034_s1 + $0x94] ss:$52 sps:$4 sm:$0xff]   ;;  %v1543_v16 = vld [vmem:[%s2034_s1 + $0x1c4] ss:$52 sps:$4 sm:$0xff]   ;;  %v1564_v17 = vld [vmem:[%s2034_s1 + $0xfc] ss:$52 sps:$4 sm:$0xff]  }
  0x21   : > { %815 = vmatprep.subr.bf16.mxu0 %v1461_v25  ;;  %v1541_v18 = vld [vmem:[%s2034_s1 + $0x1c0] ss:$52 sps:$4 sm:$0xff]   ;;  %v1562_v19 = vld [vmem:[%s2034_s1 + $0xf8] ss:$52 sps:$4 sm:$0xff]   ;;  %v1547_v22 = vld [vmem:[%s2034_s1 + $0x228] ss:$52 sps:$4 sm:$0xff]  }
  0x22   : > { %867 = vmatpush1.bf16.msra.mxu1 %v1491_v34  ;;  %v1549_v20 = vld [vmem:[%s2034_s1 + $0x22c] ss:$52 sps:$4 sm:$0xff]   ;;  %v1568_v21 = vld [vmem:[%s2034_s1 + $0x164] ss:$52 sps:$4 sm:$0xff]   ;;  %v1555_v24 = vld [vmem:[%s2034_s1 + $0x294] ss:$52 sps:$4 sm:$0xff]  }
  0x23   : > { %868 = vmatprep.subr.bf16.mxu1 %v1495_v35  ;;  %v1566_v23 = vld [vmem:[%s2034_s1 + $0x160] ss:$52 sps:$4 sm:$0xff]   ;;  %v1553_v26 = vld [vmem:[%s2034_s1 + $0x290] ss:$52 sps:$4 sm:$0xff]   ;;  %v1559_v30 = vld [vmem:[%s2034_s1 + $0x2f8] ss:$52 sps:$4 sm:$0xff]  }
  0x24   : > { %816 = vmatpush1.bf16.msra.mxu0 %v1463_v27  ;;  %v1572_v25 = vld [vmem:[%s2034_s1 + $0x1cc] ss:$52 sps:$4 sm:$0xff]   ;;  %v1570_v27 = vld [vmem:[%s2034_s1 + $0x1c8] ss:$52 sps:$4 sm:$0xff]  }
  0x25   : > { %907 = vmatprep.subr.bf16.mxu0 %v1470_v29  ;;  %v1561_v28 = vld [vmem:[%s2034_s1 + $0x2fc] ss:$52 sps:$4 sm:$0xff]   ;;  %v1576_v29 = vld [vmem:[%s2034_s1 + $0x234] ss:$52 sps:$4 sm:$0xff]   ;;  %v1578_v35 = vld [vmem:[%s2034_s1 + $0x298] ss:$52 sps:$4 sm:$0xff]  }
  0x26   : > { %869 = vmatpush1.bf16.msra.mxu1 %v1497_v37  ;;  %v1580_v34 = vld [vmem:[%s2034_s1 + $0x29c] ss:$52 sps:$4 sm:$0xff]   ;;  %v1584_v37 = vld [vmem:[%s2034_s1 + $0x304] ss:$52 sps:$4 sm:$0xff]  }
  0x27   : > { %834 = vmatmul.mubr.bf16.vlgmr.msra.gmra.mrb[0].mxu0 %v1721_v31  ;;  %960 = vmatprep.subr.bf16.mxu1 %v1503_v39  ;;  %v1573_v39 = vld [vmem:[%s2034_s1 + $0x100] ss:$52 sps:$4 sm:$0xff]  }
  0x28   : > { %908 = vmatpush1.bf16.msra.mxu0 %v1468_v32  ;;  %843 = vmatprep.mubr.bf16.mxu0 %v1596_v2  ;;  %v1574_v32 = vld [vmem:[%s2034_s1 + $0x230] ss:$52 sps:$4 sm:$0xff]  }
  0x29   : > { %909 = vmatprep.subr.bf16.mxu0 %v1476_v33  ;;  %887 = vmatmul.mubr.bf16.vlgmr.msra.gmra.mrb[0].mxu1 %v1721_v31  ;;  %v1565_v33 = vld [vmem:[%s2034_s1 + $0x30] ss:$52 sps:$4 sm:$0xff]  }
  0x2a   : > { %961 = vmatpush1.bf16.msra.mxu1 %v1501_v42  ;;  %896 = vmatprep.mubr.bf16.mxu1 %v1596_v2  ;;  %v1581_v42 = vld [vmem:[%s2034_s1 + $0x1d0] ss:$52 sps:$4 sm:$0xff]  }
  0x2b   : > { %962 = vmatprep.subr.bf16.mxu1 %v1510_v44 }
  0x2c   : > { %910 = vmatpush1.bf16.msra.mxu0 %v1474_v36  ;;  %v1569_v36 = vld [vmem:[%s2034_s1 + $0x98] ss:$52 sps:$4 sm:$0xff]  }
  0x2d   : > { %911 = vmatprep.subr.bf16.mxu0 %v1482_v38  ;;  %v1582_v38 = vld [vmem:[%s2034_s1 + $0x300] ss:$52 sps:$4 sm:$0xff]  }
  0x2e   : > { %963 = vmatpush1.bf16.msra.mxu1 %v1508_v46 }
  0x2f   : > { %844 = vmatmul.mubr.bf16.gmra.mrb[4].mxu0 %v1753_v41  ;;  %964 = vmatprep.subr.bf16.mxu1 %v1516_v48 }
  0x30   : > { %912 = vmatpush1.bf16.msra.mxu0 %v1480_v40  ;;  %939 = vmatprep.mubr.bf16.mxu0 %v1596_v2  ;;  %v1577_v40 = vld [vmem:[%s2034_s1 + $0x168] ss:$52 sps:$4 sm:$0xff]  }
  0x31   : > { %913 = vmatprep.subr.bf16.mxu0 %v1488_v43  ;;  %897 = vmatmul.mubr.bf16.gmra.mrb[4].mxu1 %v1753_v41  ;;  %v1585_v43 = vld [vmem:[%s2034_s1 + $0x238] ss:$52 sps:$4 sm:$0xff]  }
  0x32   : > { %965 = vmatpush1.bf16.msra.mxu1 %v1514_v50  ;;  %992 = vmatprep.mubr.bf16.mxu1 %v1596_v2 }
  0x33   : > { %966 = vmatprep.subr.bf16.mxu1 %v1522_v52 }
  0x34   : > { %914 = vmatpush1.bf16.msra.mxu0 %v1486_v45 }
  0x35   : > { %915 = vmatprep.subr.bf16.mxu0 %v1494_v47 }
  0x36   : > { %967 = vmatpush1.bf16.msra.mxu1 %v1520_v54 }
  0x37   : > { %968 = vmatprep.subr.bf16.mxu1 %v1528_v56 }
  0x38   : > { %916 = vmatpush1.bf16.msra.mxu0 %v1492_v49 }
  0x39   : > { %917 = vmatprep.subr.bf16.mxu0 %v1500_v51 }
  0x3a   : > { %969 = vmatpush1.bf16.msra.mxu1 %v1526_v58 }
  0x3b   : > { %970 = vmatprep.subr.bf16.mxu1 %v1534_v60 }
  0x3c   : > { %918 = vmatpush1.bf16.msra.mxu0 %v1498_v53 }
  0x3d   : > { %919 = vmatprep.subr.bf16.mxu0 %v1507_v55 }
  0x3e   : > { %971 = vmatpush1.bf16.msra.mxu1 %v1532_v63 }
  0x3f   : > { %972 = vmatprep.subr.bf16.mxu1 %v1540_v0 }
  0x40   : > { %920 = vmatpush1.bf16.msra.mxu0 %v1505_v57 }
  0x41   : > { %921 = vmatprep.subr.bf16.mxu0 %v1513_v59 }
  0x42   : > { %973 = vmatpush1.bf16.msra.mxu1 %v1538_v4 }
  0x43   : > { %974 = vmatprep.subr.bf16.mxu1 %v1546_v5 }
  0x44   : > { %922 = vmatpush1.bf16.msra.mxu0 %v1511_v61 }
  0x45   : > { %1013 = vmatprep.subr.bf16.mxu0 %v1519_v62 }
  0x46   : > { %975 = vmatpush1.bf16.msra.mxu1 %v1544_v7 }
  0x47   : > { %940 = vmatmul.mubr.bf16.vlgmr.msra.gmra.mrb[8].mxu0 %v1721_v31  ;;  %1066 = vmatprep.subr.bf16.mxu1 %v1552_v9 }
  0x48   : > { %1014 = vmatpush1.bf16.msra.mxu0 %v1517_v1  ;;  %949 = vmatprep.mubr.bf16.mxu0 %v1596_v2 }
  0x49   : > { %1015 = vmatprep.subr.bf16.mxu0 %v1525_v3  ;;  %993 = vmatmul.mubr.bf16.vlgmr.msra.gmra.mrb[8].mxu1 %v1721_v31 }
  0x4a   : > { %1067 = vmatpush1.bf16.msra.mxu1 %v1550_v12  ;;  %1002 = vmatprep.mubr.bf16.mxu1 %v1596_v2 }
  0x4b   : > { %1068 = vmatprep.subr.bf16.mxu1 %v1558_v13 }
  0x4c   : > { %1016 = vmatpush1.bf16.msra.mxu0 %v1523_v6 }
  0x4d   : > { %1017 = vmatprep.subr.bf16.mxu0 %v1531_v8 }
  0x4e   : > { %1069 = vmatpush1.bf16.msra.mxu1 %v1556_v15 }
  0x4f   : > { %950 = vmatmul.mubr.bf16.gmra.mrb[12].mxu0 %v1753_v41  ;;  %1070 = vmatprep.subr.bf16.mxu1 %v1564_v17 }
  0x50   : > { %1018 = vmatpush1.bf16.msra.mxu0 %v1529_v10  ;;  %1045 = vmatprep.mubr.bf16.mxu0 %v1596_v2 }
  0x51   : > { %1019 = vmatprep.subr.bf16.mxu0 %v1537_v11  ;;  %1003 = vmatmul.mubr.bf16.gmra.mrb[12].mxu1 %v1753_v41 }
  0x52   : > { %1071 = vmatpush1.bf16.msra.mxu1 %v1562_v19  ;;  %1098 = vmatprep.mubr.bf16.mxu1 %v1596_v2 }
  0x53   : > { %1072 = vmatprep.subr.bf16.mxu1 %v1568_v21 }
  0x54   : > { %1020 = vmatpush1.bf16.msra.mxu0 %v1535_v14 }
  0x55   : > { %1021 = vmatprep.subr.bf16.mxu0 %v1543_v16 }
  0x56   : > { %1073 = vmatpush1.bf16.msra.mxu1 %v1566_v23 }
  0x57   : > { %1074 = vmatprep.subr.bf16.mxu1 %v1572_v25 }
  0x58   : > { %1022 = vmatpush1.bf16.msra.mxu0 %v1541_v18 }
  0x59   : > { %1023 = vmatprep.subr.bf16.mxu0 %v1549_v20 }
  0x5a   : > { %1075 = vmatpush1.bf16.msra.mxu1 %v1570_v27 }
  0x5b   : > { %1076 = vmatprep.subr.bf16.mxu1 %v1576_v29 }
  0x5c   : > { %1024 = vmatpush1.bf16.msra.mxu0 %v1547_v22 }
  0x5d   : > { %1025 = vmatprep.subr.bf16.mxu0 %v1555_v24 }
  0x5e   : > { %1077 = vmatpush1.bf16.msra.mxu1 %v1574_v32 }
  0x5f   : > { %1078 = vmatprep.subr.bf16.mxu1 %v1580_v34 }
  0x60   : > { %1026 = vmatpush1.bf16.msra.mxu0 %v1553_v26 }
  0x61   : > { %1027 = vmatprep.subr.bf16.mxu0 %v1561_v28 }
  0x62   : > { %1079 = vmatpush1.bf16.msra.mxu1 %v1578_v35 }
  0x63   : > { %1080 = vmatprep.subr.bf16.mxu1 %v1584_v37 }
  0x64   : > { %1028 = vmatpush1.bf16.msra.mxu0 %v1559_v30 }
  0x65   : > { %1404 = vmatprep.subr.bf16.mxu0 %v1565_v33 }
  0x66   : > { %1081 = vmatpush1.bf16.msra.mxu1 %v1582_v38 }
  0x67   : > { %1046 = vmatmul.mubr.bf16.vlgmr.msra.gmra.mrb[16].mxu0 %v1721_v31 }
  0x68   : > { %1405 = vmatpush3.bf16.msra.mxu0 %v1565_v33  ;;  %1055 = vmatprep.mubr.bf16.mxu0 %v1596_v2 }
  0x69   : > { %1406 = vmatprep.subr.bf16.mxu0 %v1569_v36  ;;  %1099 = vmatmul.mubr.bf16.vlgmr.msra.gmra.mrb[16].mxu1 %v1721_v31 }
  0x6a   : > { %1108 = vmatprep.mubr.bf16.mxu1 %v1596_v2  ;;  %v1586_v2 = vld [vmem:[%s2034_s1 + $0x2a0] ss:$52 sps:$4 sm:$0xff]  }
  0x6c   : > { %1407 = vmatpush3.bf16.msra.mxu0 %v1569_v36 }
  0x6d   : > { %1408 = vmatprep.subr.bf16.mxu0 %v1573_v39 }
  0x6f   : > { %1056 = vmatmul.mubr.bf16.gmra.mrb[20].mxu0 %v1753_v41 }
  0x70   : > { %1409 = vmatpush3.bf16.msra.mxu0 %v1573_v39  ;;  %1420 = vmatprep.mubr.bf16.mxu0 %v1721_v31  ;;  %v1587_v31 = vld [vmem:[%s2034_s1 + $0x308] ss:$52 sps:$4 sm:$0xff]  }
  0x71   : > { %1410 = vmatprep.subr.bf16.mxu0 %v1577_v40  ;;  %1109 = vmatmul.mubr.bf16.gmra.mrb[20].mxu1 %v1753_v41 }
  0x74   : > { %1411 = vmatpush3.bf16.msra.mxu0 %v1577_v40 }
  0x75   : > { %1412 = vmatprep.subr.bf16.mxu0 %v1581_v42 }
  0x78   : > { %1413 = vmatpush3.bf16.msra.mxu0 %v1581_v42 }
  0x79   : > { %1414 = vmatprep.subr.bf16.mxu0 %v1585_v43 }
  0x7c   : > { %1415 = vmatpush3.bf16.msra.mxu0 %v1585_v43 }
  0x7d   : > { %1416 = vmatprep.subr.bf16.mxu0 %v1586_v2 }
  0x80   : > { %1417 = vmatpush3.bf16.msra.mxu0 %v1586_v2 }
  0x81   : > { %1418 = vmatprep.subr.bf16.mxu0 %v1587_v31 }
  0x84   : > { %1419 = vmatpush3.bf16.msra.mxu0 %v1587_v31 }
  0x87   : > { %1421 = vmatmul.mubr.bf16.vlgmr.msra.gmra.mrb[24].mxu0 %v1753_v41 }
  0xfa   : > { %v835_v44 = vpop.f32.mrb[0].mxu0 }
  0xfb   : > { %1168 = vst [vmem:[%s1976_s20] sm:$0xff] %v835_v44  ;;  %v837_v45 = vpop.f32.mrb[1].mxu0 }
  0xfc   : > { %1169 = vst [vmem:[%s1976_s20 + $0x8] sm:$0xff] %v837_v45  ;;  %v839_v41 = vpop.f32.mrb[2].mxu0  ;;  %v888_v48 = vpop.f32.mrb[0].mxu1 }
  0xfd   : > { %1182 = vst [vmem:[%s1976_s20 + $0x68] sm:$0xff] %v839_v41  ;;  %v841_v46 = vpop.f32.mrb[3].mxu0  ;;  %1170 = vst [vmem:[%s1976_s20 + $0x10] sm:$0xff] %v888_v48  ;;  %v890_v50 = vpop.f32.mrb[1].mxu1 }
  0xfe   : > { %1183 = vst [vmem:[%s1976_s20 + $0x70] sm:$0xff] %v841_v46  ;;  %1171 = vst [vmem:[%s1976_s20 + $0x18] sm:$0xff] %v890_v50  ;;  %v892_v52 = vpop.f32.mrb[2].mxu1 }
  0xff   : > { %1184 = vst [vmem:[%s1976_s20 + $0x78] sm:$0xff] %v892_v52  ;;  %v894_v54 = vpop.f32.mrb[3].mxu1 }
 0x100   : > { %1185 = vst [vmem:[%s1976_s20 + $0x80] sm:$0xff] %v894_v54 }
 0x102   : > { %v845_v47 = vpop.f32.mrb[4].mxu0 }
 0x103   : > { %1195 = vst [vmem:[%s1976_s20 + $0xd0] sm:$0xff] %v845_v47  ;;  %v847_v49 = vpop.f32.mrb[5].mxu0 }
 0x104   : > { %1196 = vst [vmem:[%s1976_s20 + $0xd8] sm:$0xff] %v847_v49  ;;  %v849_v51 = vpop.f32.mrb[6].mxu0  ;;  %v898_v55 = vpop.f32.mrb[4].mxu1 }
 0x105   : > { %1208 = vst [vmem:[%s1976_s20 + $0x138] sm:$0x1] %v849_v51  ;;  %v851_v53 = vpop.f32.mrb[7].mxu0  ;;  %1197 = vst [vmem:[%s1976_s20 + $0xe0] sm:$0xff] %v898_v55  ;;  %v900_v56 = vpop.f32.mrb[5].mxu1 }
 0x106   : > { %1209 = vst [vmem:[%s1976_s20 + $0x140] sm:$0x1] %v851_v53  ;;  %1198 = vst [vmem:[%s1976_s20 + $0xe8] sm:$0xff] %v900_v56  ;;  %v902_v57 = vpop.f32.mrb[6].mxu1 }
 0x107   : > { %1210 = vst [vmem:[%s1976_s20 + $0x148] sm:$0x1] %v902_v57  ;;  %v904_v58 = vpop.f32.mrb[7].mxu1 }
 0x108   : > { %1211 = vst [vmem:[%s1976_s20 + $0x150] sm:$0x1] %v904_v58 }
 0x11a   : > { %v941_v59 = vpop.f32.mrb[8].mxu0 }
 0x11b   : > { %1172 = vst [vmem:[%s1976_s20 + $0x20] sm:$0xff] %v941_v59  ;;  %v943_v60 = vpop.f32.mrb[9].mxu0 }
 0x11c   : > { %1173 = vst [vmem:[%s1976_s20 + $0x28] sm:$0xff] %v943_v60  ;;  %v945_v61 = vpop.f32.mrb[10].mxu0  ;;  %v994_v0 = vpop.f32.mrb[8].mxu1 }
 0x11d   : > { %1186 = vst [vmem:[%s1976_s20 + $0x88] sm:$0xff] %v945_v61  ;;  %v947_v62 = vpop.f32.mrb[11].mxu0  ;;  %1174 = vst [vmem:[%s1976_s20 + $0x30] sm:$0xff] %v994_v0  ;;  %v996_v3 = vpop.f32.mrb[9].mxu1 }
 0x11e   : > { %1187 = vst [vmem:[%s1976_s20 + $0x90] sm:$0xff] %v947_v62  ;;  %1175 = vst [vmem:[%s1976_s20 + $0x38] sm:$0xff] %v996_v3  ;;  %v998_v5 = vpop.f32.mrb[10].mxu1 }
 0x11f   : > { %1188 = vst [vmem:[%s1976_s20 + $0x98] sm:$0xff] %v998_v5  ;;  %v1000_v7 = vpop.f32.mrb[11].mxu1 }
 0x120   : > { %1189 = vst [vmem:[%s1976_s20 + $0xa0] sm:$0xff] %v1000_v7 }
 0x122   : > { %v951_v63 = vpop.f32.mrb[12].mxu0 }
 0x123   : > { %1199 = vst [vmem:[%s1976_s20 + $0xf0] sm:$0xff] %v951_v63  ;;  %v953_v1 = vpop.f32.mrb[13].mxu0 }
 0x124   : > { %1200 = vst [vmem:[%s1976_s20 + $0xf8] sm:$0xff] %v953_v1  ;;  %v955_v4 = vpop.f32.mrb[14].mxu0  ;;  %v1004_v8 = vpop.f32.mrb[12].mxu1 }
 0x125   : > { %1212 = vst [vmem:[%s1976_s20 + $0x158] sm:$0x1] %v955_v4  ;;  %v957_v6 = vpop.f32.mrb[15].mxu0  ;;  %1201 = vst [vmem:[%s1976_s20 + $0x100] sm:$0xff] %v1004_v8  ;;  %v1006_v9 = vpop.f32.mrb[13].mxu1 }
 0x126   : > { %1213 = vst [vmem:[%s1976_s20 + $0x160] sm:$0x1] %v957_v6  ;;  %1202 = vst [vmem:[%s1976_s20 + $0x108] sm:$0xff] %v1006_v9  ;;  %v1008_v10 = vpop.f32.mrb[14].mxu1 }
 0x127   : > { %1214 = vst [vmem:[%s1976_s20 + $0x168] sm:$0x1] %v1008_v10  ;;  %v1010_v11 = vpop.f32.mrb[15].mxu1 }
 0x128   : > { %1215 = vst [vmem:[%s1976_s20 + $0x170] sm:$0x1] %v1010_v11 }
 0x13a   : > { %v1047_v12 = vpop.f32.mrb[16].mxu0 }
 0x13b   : > { %1176 = vst [vmem:[%s1976_s20 + $0x40] sm:$0xff] %v1047_v12  ;;  %v1049_v13 = vpop.f32.mrb[17].mxu0 }
 0x13c   : > { %1177 = vst [vmem:[%s1976_s20 + $0x48] sm:$0xff] %v1049_v13  ;;  %v1051_v14 = vpop.f32.mrb[18].mxu0  ;;  %v1100_v17 = vpop.f32.mrb[16].mxu1 }
 0x13d   : > { %1190 = vst [vmem:[%s1976_s20 + $0xa8] sm:$0xff] %v1051_v14  ;;  %v1053_v15 = vpop.f32.mrb[19].mxu0  ;;  %1178 = vst [vmem:[%s1976_s20 + $0x50] sm:$0xff] %v1100_v17  ;;  %v1102_v19 = vpop.f32.mrb[17].mxu1 }
 0x13e   : > { %1191 = vst [vmem:[%s1976_s20 + $0xb0] sm:$0xff] %v1053_v15  ;;  %1179 = vst [vmem:[%s1976_s20 + $0x58] sm:$0xff] %v1102_v19  ;;  %v1104_v21 = vpop.f32.mrb[18].mxu1 }
 0x13f   : > { %1192 = vst [vmem:[%s1976_s20 + $0xb8] sm:$0xff] %v1104_v21  ;;  %v1106_v23 = vpop.f32.mrb[19].mxu1 }
 0x140   : > { %1193 = vst [vmem:[%s1976_s20 + $0xc0] sm:$0xff] %v1106_v23 }
 0x142   : > { %v1057_v16 = vpop.f32.mrb[20].mxu0 }
 0x143   : > { %1203 = vst [vmem:[%s1976_s20 + $0x110] sm:$0xff] %v1057_v16  ;;  %v1059_v18 = vpop.f32.mrb[21].mxu0 }
 0x144   : > { %1204 = vst [vmem:[%s1976_s20 + $0x118] sm:$0xff] %v1059_v18  ;;  %v1061_v20 = vpop.f32.mrb[22].mxu0  ;;  %v1110_v24 = vpop.f32.mrb[20].mxu1 }
 0x145   : > { %1216 = vst [vmem:[%s1976_s20 + $0x178] sm:$0x1] %v1061_v20  ;;  %v1063_v22 = vpop.f32.mrb[23].mxu0  ;;  %1205 = vst [vmem:[%s1976_s20 + $0x120] sm:$0xff] %v1110_v24  ;;  %v1112_v25 = vpop.f32.mrb[21].mxu1 }
 0x146   : > { %1217 = vst [vmem:[%s1976_s20 + $0x180] sm:$0x1] %v1063_v22  ;;  %1206 = vst [vmem:[%s1976_s20 + $0x128] sm:$0xff] %v1112_v25  ;;  %v1114_v26 = vpop.f32.mrb[22].mxu1 }
 0x147   : > { %1218 = vst [vmem:[%s1976_s20 + $0x188] sm:$0x1] %v1114_v26  ;;  %v1116_v27 = vpop.f32.mrb[23].mxu1 }
 0x148   : > { %1219 = vst [vmem:[%s1976_s20 + $0x190] sm:$0x1] %v1116_v27 }
 0x15a   : > { %v1422_v28 = vpop.f32.mrb[24].mxu0 }
 0x15b   : > { %1207 = vst.msk [vmem:[%s1976_s20 + $0x130] sm:$0xff] %vm1180_vm0, %v1422_v28  ;;  %v1153_v29 = vpop.f32.mrb[25].mxu0 }
 0x15c   : > { %1181 = vst.msk [vmem:[%s1976_s20 + $0x60] sm:$0xff] %vm1180_vm0, %v1153_v29  ;;  %v1423_v30 = vpop.f32.mrb[26].mxu0 }
 0x15d   : > { %1221 = vst.msk [vmem:[%s1976_s20 + $0x198] sm:$0x1] %vm1220_vm1, %v1423_v30  ;;  %v1156_v32 = vpop.f32.mrb[27].mxu0 }
 0x15e   : > { %1194 = vst.msk [vmem:[%s1976_s20 + $0xc8] sm:$0xff] %vm1180_vm0, %v1156_v32 }
 0x15f PF: > { %s12_s9 = sadd.s32 1, %s1594_s9  }
 0x160   : > { %p9_p4 = scmp.ge.s32.totalorder %s12_s9, 4  }
 0x162   :  { %11 = sbr.rel (!%p9_p4) target bundleno = 1 (0x1), region = 58 }

// kernel: vae_decoder_forward.6
= control target key start
LH: loop header
LB: loop body
LE: loop exit
PB: predicated region body
PF: predicated region fallthrough
CT: control target
= control target key end

     0   :  { %s1714_s9 = smov 0   ;;  %s2258_s0 = inlined_call_operand.vmem [shape: bf16[2,169,64], index: 0, kind: input, shape index: {}]   ;;  %s2259_s1 = inlined_call_operand.vmem [shape: bf16[64,1152], index: 1, kind: input, shape index: {}]   ;;  %s2260_s2 = inlined_call_operand.vmem [shape: f32[2,169,1152], index: 2, kind: output, shape index: {}]  }
   0x1 LB: > { %s1426_s10 = sadd.s32 4294967295, %s1694_s9   ;;  %p1430_p0 = scmp.ge.s32.totalorder %s1694_s9, 1  ;;  %s1694_s9 = sphi %s1714_s9, %s12_s9  }
   0x2   : > { %p112_p1 = scmp.lt.s32.totalorder %s1694_s9, 3 }
   0x4   : > { %p113_p2 = pnand %p1430_p0, %p112_p1 }
   0x5   : > { %v1625_v0 = vld [vmem:[%s2259_s1 + $0x4] ss:$36 sps:$4 sm:$0xff] (!%p113_p2)   ;;  %p134_p3 = scmp.lt.s32.totalorder (!%p113_p2), %s1426_s10, 1  ;;  %v1696_v2 = vmov (!%p113_p2), 0   ;;  %v1628_v3 = vld [vmem:[%s2259_s1 + $0x4c] ss:$36 sps:$4 sm:$0xff] (!%p113_p2)  }
   0x6   : > { %116 = sbr.rel (%p113_p2) target bundleno = 454 (0x1c6), region = 28  ;;  %v1627_v1 = vld [vmem:[%s2259_s1] ss:$36 sps:$4 sm:$0xff] (!%p113_p2)   ;;  %512 = vmatprep.mubr.bf16.mxu0 (!%p113_p2), %v1696_v2  ;;  %572 = vmatprep.mubr.bf16.mxu1 (!%p113_p2), %v1696_v2  ;;  %v1630_v4 = vld [vmem:[%s2259_s1 + $0x48] ss:$36 sps:$4 sm:$0xff] (!%p113_p2)   ;;  %vm446_vm0 = vcmask (!%p113_p2), 523264  }
   0x7   : > { %480 = vmatprep.subr.bf16.mxu0 (!%p113_p2), %v1625_v0  ;;  %1604 = vmatprep.subr.bf16.mxu1 (!%p113_p2), %v1625_v0  ;;  %v1631_v5 = vld [vmem:[%s2259_s1 + $0x94] ss:$36 sps:$4 sm:$0xff] (!%p113_p2)   ;;  %v1634_v7 = vld [vmem:[%s2259_s1 + $0xdc] ss:$36 sps:$4 sm:$0xff] (!%p113_p2)   ;;  %v1644_v10 = vld [vmem:[%s2259_s1 + $0xc] ss:$36 sps:$4 sm:$0xff] (!%p113_p2)  }
   0x8   : > { %481 = vmatpush1.bf16.msra.mxu0 (!%p113_p2), %v1627_v1  ;;  %1608 = vmatpush1.bf16.msra.mxu1 (!%p113_p2), %v1627_v1  ;;  %v1633_v6 = vld [vmem:[%s2259_s1 + $0x90] ss:$36 sps:$4 sm:$0xff] (!%p113_p2)   ;;  %v1636_v8 = vld [vmem:[%s2259_s1 + $0xd8] ss:$36 sps:$4 sm:$0xff] (!%p113_p2)   ;;  %v1642_v14 = vld [vmem:[%s2259_s1 + $0x8] ss:$36 sps:$4 sm:$0xff] (!%p113_p2)  }
   0x9   : > { %482 = vmatprep.subr.bf16.mxu0 (!%p113_p2), %v1628_v3  ;;  %1605 = vmatprep.subr.bf16.mxu1 (!%p113_p2), %v1628_v3  ;;  %v1640_v9 = vld [vmem:[%s2259_s1 + $0x14] ss:$36 sps:$4 sm:$0xff] (!%p113_p2)   ;;  %v1648_v15 = vld [vmem:[%s2259_s1 + $0x5c] ss:$36 sps:$4 sm:$0xff] (!%p113_p2)   ;;  %v1658_v20 = vld [vmem:[%s2259_s1 + $0xa4] ss:$36 sps:$4 sm:$0xff] (!%p113_p2)  }
   0xa   : > { %v1638_v13 = vld [vmem:[%s2259_s1 + $0x10] ss:$36 sps:$4 sm:$0xff] (!%p113_p2)   ;;  %v1646_v17 = vld [vmem:[%s2259_s1 + $0x58] ss:$36 sps:$4 sm:$0xff] (!%p113_p2)   ;;  %v1656_v23 = vld [vmem:[%s2259_s1 + $0xa0] ss:$36 sps:$4 sm:$0xff] (!%p113_p2)  }
   0xb   : > { %v1653_v16 = vld [vmem:[%s2259_s1 + $0x54] ss:$36 sps:$4 sm:$0xff] (!%p113_p2)   ;;  %v1661_v21 = vld [vmem:[%s2259_s1 + $0x9c] ss:$36 sps:$4 sm:$0xff] (!%p113_p2)   ;;  %v1666_v25 = vld [vmem:[%s2259_s1 + $0xec] ss:$36 sps:$4 sm:$0xff] (!%p113_p2)  }
   0xc   : > { %483 = vmatpush1.bf16.msra.mxu0 (!%p113_p2), %v1630_v4  ;;  %1609 = vmatpush1.bf16.msra.mxu1 (!%p113_p2), %v1630_v4  ;;  %v1651_v18 = vld [vmem:[%s2259_s1 + $0x50] ss:$36 sps:$4 sm:$0xff] (!%p113_p2)   ;;  %v1659_v24 = vld [vmem:[%s2259_s1 + $0x98] ss:$36 sps:$4 sm:$0xff] (!%p113_p2)   ;;  %v1670_v26 = vld [vmem:[%s2259_s1 + $0xe4] ss:$36 sps:$4 sm:$0xff] (!%p113_p2)  }
   0xd   : > { %s2262_s10 = smov (!%p134_p3, %s1426_s10), 1  ;;  %484 = vmatprep.subr.bf16.mxu0 %v1631_v5  ;;  %1606 = vmatprep.subr.bf16.mxu1 %v1631_v5  ;;  %v1664_v27 = vld [vmem:[%s2259_s1 + $0xe8] ss:$36 sps:$4 sm:$0xff]   ;;  %v1668_v28 = vld [vmem:[%s2259_s1 + $0xe0] ss:$36 sps:$4 sm:$0xff]   ;;  %v1697_v32 = vmov 0.0  }
   0xe   : > { %s1612_s21 = smul.u32 88, %s2262_s10  ;;  %v1674_v29 = vld [vmem:[%s2259_s1 + $0x1c] ss:$36 sps:$4 sm:$0xff]   ;;  %v1678_v39 = vld [vmem:[%s2259_s1 + $0x64] ss:$36 sps:$4 sm:$0xff]   ;;  %vm1698_vm1 = vmmov 0  }
   0xf   : > { %v1672_v38 = vld [vmem:[%s2259_s1 + $0x18] ss:$36 sps:$4 sm:$0xff]   ;;  %v1676_v40 = vld [vmem:[%s2259_s1 + $0x60] ss:$36 sps:$4 sm:$0xff]   ;;  %v1682_v41 = vld [vmem:[%s2259_s1 + $0xac] ss:$36 sps:$4 sm:$0xff]  }
  0x10   : > { %s1745_s24 = scalar_lea.vmem %s2258_s0, %s1612_s21  ;;  %485 = vmatpush1.bf16.msra.mxu0 %v1633_v6  ;;  %1610 = vmatpush1.bf16.msra.mxu1 %v1633_v6  ;;  %v1675_v42 = vld [vmem:[%s2259_s1 + $0x20] ss:$36 sps:$4 sm:$0xff]   ;;  %v1680_v43 = vld [vmem:[%s2259_s1 + $0xa8] ss:$36 sps:$4 sm:$0xff]   ;;  %v1686_v44 = vld [vmem:[%s2259_s1 + $0xf4] ss:$36 sps:$4 sm:$0xff]  }
  0x11   : > { %486 = vmatprep.subr.bf16.mxu0 %v1634_v7  ;;  %1607 = vmatprep.subr.bf16.mxu1 %v1634_v7  ;;  %v1763_v11 = vld [vmem:[%s1745_s24] sm:$0xff]   ;;  %v1766_v12 = vld [vmem:[%s1745_s24 + $0x30] sm:$0xff]   ;;  %v1792_v19 = vld [vmem:[%s1745_s24 + $0x8] sm:$0xff]   ;;  %s1613_s8 = smul.u32 1584, %s2262_s10 }
  0x12   : > { %v1802_v22 = vld [vmem:[%s1745_s24 + $0x38] sm:$0xff]   ;;  %v1832_v30 = vld [vmem:[%s1745_s24 + $0x10] sm:$0xff]   ;;  %v1835_v31 = vld [vmem:[%s1745_s24 + $0x40] sm:$0xff]  }
  0x13   : > { %v1845_v33 = vld [vmem:[%s1745_s24 + $0x18] sm:$0xff]   ;;  %v1848_v34 = vld [vmem:[%s1745_s24 + $0x48] sm:$0xff]   ;;  %v1857_v35 = vld [vmem:[%s1745_s24 + $0x20] sm:$0xff]   ;;  %s2051_s13 = scalar_lea.vmem %s2260_s2, %s1613_s8 }
  0x14   : > { %487 = vmatpush1.bf16.msra.mxu0 %v1636_v8  ;;  %1611 = vmatpush1.bf16.msra.mxu1 %v1636_v8  ;;  %v1860_v36 = vld [vmem:[%s1745_s24 + $0x50] sm:$0x1f]   ;;  %v1869_v37 = vld [vmem:[%s1745_s24 + $0x28] sm:$0xff]   ;;  %v1687_v48 = vld [vmem:[%s2259_s1 + $0xf8] ss:$36 sps:$4 sm:$0xff]  }
  0x15   : > { %766 = vmatprep.subr.bf16.mxu0 %v1640_v9  ;;  %623 = vmatprep.subr.bf16.mxu1 %v1644_v10  ;;  %v1679_v45 = vld [vmem:[%s2259_s1 + $0x68] ss:$36 sps:$4 sm:$0xff]   ;;  %v1684_v46 = vld [vmem:[%s2259_s1 + $0xf0] ss:$36 sps:$4 sm:$0xff]  }
  0x16   : > { %v1683_v47 = vld [vmem:[%s2259_s1 + $0xb0] ss:$36 sps:$4 sm:$0xff]  }
  0x17   : > { %1480 = vmatmul.mubr.msk.bf16.vlgmr.msra.gmra.mrb[0].mxu0 %vm446_vm0, %v1763_v11  ;;  %1486 = vmatmul.mubr.msk.bf16.vlgmr.msra.gmra.mrb[0].mxu1 %vm446_vm0, %v1766_v12 }
  0x18   : > { %767 = vmatpush1.bf16.msra.mxu0 %v1638_v13  ;;  %522 = vmatprep.mubr.bf16.mxu0 %v1696_v2 }
  0x19   : > { %624 = vmatpush1.bf16.msra.mxu1 %v1642_v14  ;;  %582 = vmatprep.mubr.bf16.mxu1 %v1696_v2 }
  0x1a   : > { %768 = vmatprep.subr.bf16.mxu0 %v1648_v15  ;;  %625 = vmatprep.subr.bf16.mxu1 %v1653_v16 }
  0x1c   : > { %769 = vmatpush1.bf16.msra.mxu0 %v1646_v17 }
  0x1d   : > { %626 = vmatpush1.bf16.msra.mxu1 %v1651_v18  ;;  %770 = vmatprep.subr.bf16.mxu0 %v1658_v20 }
  0x1e   : > { %627 = vmatprep.subr.bf16.mxu1 %v1661_v21 }
  0x1f   : > { %1481 = vmatmul.mubr.msk.bf16.gmra.mrb[4].mxu0 %vm446_vm0, %v1792_v19  ;;  %1487 = vmatmul.mubr.msk.bf16.gmra.mrb[4].mxu1 %vm446_vm0, %v1802_v22 }
  0x20   : > { %532 = vmatprep.mubr.bf16.mxu0 %v1696_v2  ;;  %592 = vmatprep.mubr.bf16.mxu1 %v1696_v2 }
  0x21   : > { %771 = vmatpush1.bf16.msra.mxu0 %v1656_v23  ;;  %628 = vmatpush1.bf16.msra.mxu1 %v1659_v24 }
  0x22   : > { %772 = vmatprep.subr.bf16.mxu0 %v1666_v25  ;;  %629 = vmatprep.subr.bf16.mxu1 %v1670_v26 }
  0x25   : > { %773 = vmatpush1.bf16.msra.mxu0 %v1664_v27  ;;  %630 = vmatpush1.bf16.msra.mxu1 %v1668_v28 }
  0x26   : > { %909 = vmatprep.subr.bf16.mxu1 %v1674_v29  ;;  %1552 = vmatprep.subr.bf16.mxu0 %v1697_v32 }
  0x27   : > { %1482 = vmatmul.mubr.msk.bf16.gmra.mrb[8].mxu0 %vm446_vm0, %v1832_v30  ;;  %1488 = vmatmul.mubr.msk.bf16.gmra.mrb[8].mxu1 %vm446_vm0, %v1835_v31 }
  0x28   : > { %542 = vmatprep.mubr.bf16.mxu0 %v1696_v2  ;;  %602 = vmatprep.mubr.bf16.mxu1 %v1696_v2 }
  0x2f   : > { %1483 = vmatmul.mubr.msk.bf16.gmra.mrb[12].mxu0 %vm446_vm0, %v1845_v33  ;;  %1489 = vmatmul.mubr.msk.bf16.gmra.mrb[12].mxu1 %vm446_vm0, %v1848_v34 }
  0x30   : > { %552 = vmatprep.mubr.bf16.mxu0 %v1696_v2  ;;  %612 = vmatprep.mubr.bf16.mxu1 %v1696_v2 }
  0x37   : > { %1484 = vmatmul.mubr.msk.bf16.gmra.mrb[16].mxu0 %vm446_vm0, %v1857_v35  ;;  %1490 = vmatmul.mubr.msk.bf16.gmra.mrb[16].mxu1 %vm446_vm0, %v1860_v36 }
  0x38   : > { %562 = vmatprep.mubr.bf16.mxu0 %v1696_v2  ;;  %655 = vmatprep.mubr.bf16.mxu1 %v1696_v2 }
  0x3f   : > { %1485 = vmatmul.mubr.msk.bf16.gmra.mrb[20].mxu0 %vm446_vm0, %v1869_v37  ;;  %1491 = vmatmul.mubr.msk.bf16.vlgmr.msra.gmra.mrb[20].mxu1 %vm446_vm0, %v1763_v11 }
  0x40   : > { %798 = vmatprep.mubr.bf16.mxu0 %v1696_v2  ;;  %910 = vmatpush1.bf16.msra.mxu1 %v1672_v38 }
  0x41   : > { %665 = vmatprep.mubr.bf16.mxu1 %v1696_v2  ;;  %911 = vmatprep.subr.bf16.mxu1 %v1678_v39 }
  0x44   : > { %912 = vmatpush1.bf16.msra.mxu1 %v1676_v40 }
  0x45   : > { %913 = vmatprep.subr.bf16.mxu1 %v1682_v41 }
  0x47   : > { %1502 = vmatmul.mubr.msk.bf16.vlgmr.msra.gmra.mrb[24].mxu0 %vm446_vm0, %v1763_v11  ;;  %1492 = vmatmul.mubr.msk.bf16.gmra.mrb[24].mxu1 %vm446_vm0, %v1792_v19 }
  0x48   : > { %1553 = vmatpush3.bf16.msra.mxu0 %v1675_v42  ;;  %808 = vmatprep.mubr.bf16.mxu0 %v1696_v2 }
  0x49   : > { %675 = vmatprep.mubr.bf16.mxu1 %v1696_v2  ;;  %1554 = vmatprep.subr.bf16.mxu0 %v1697_v32 }
  0x4a   : > { %914 = vmatpush1.bf16.msra.mxu1 %v1680_v43 }
  0x4b   : > { %915 = vmatprep.subr.bf16.mxu1 %v1686_v44 }
  0x4c   : > { %1555 = vmatpush3.bf16.msra.mxu0 %v1679_v45 }
  0x4d   : > { %1556 = vmatprep.subr.bf16.mxu0 %v1697_v32 }
  0x4e   : > { %916 = vmatpush1.bf16.msra.mxu1 %v1684_v46 }
  0x4f   : > { %1503 = vmatmul.mubr.msk.bf16.gmra.mrb[28].mxu0 %vm446_vm0, %v1792_v19  ;;  %1493 = vmatmul.mubr.msk.bf16.gmra.mrb[28].mxu1 %vm446_vm0, %v1832_v30 }
  0x50   : > { %818 = vmatprep.mubr.bf16.mxu0 %v1696_v2  ;;  %685 = vmatprep.mubr.bf16.mxu1 %v1696_v2 }
  0x51   : > { %1557 = vmatpush3.bf16.msra.mxu0 %v1683_v47 }
  0x52   : > { %1558 = vmatprep.subr.bf16.mxu0 %v1697_v32 }
  0x55   : > { %1559 = vmatpush3.bf16.msra.mxu0 %v1687_v48 }
  0x57   : > { %1504 = vmatmul.mubr.msk.bf16.gmra.mrb[32].mxu0 %vm446_vm0, %v1832_v30  ;;  %1494 = vmatmul.mubr.msk.bf16.gmra.mrb[32].mxu1 %vm446_vm0, %v1845_v33 }
  0x58   : > { %828 = vmatprep.mubr.bf16.mxu0 %v1696_v2  ;;  %695 = vmatprep.mubr.bf16.mxu1 %v1696_v2 }
  0x5f   : > { %1505 = vmatmul.mubr.msk.bf16.gmra.mrb[36].mxu0 %vm446_vm0, %v1845_v33  ;;  %1495 = vmatmul.mubr.msk.bf16.gmra.mrb[36].mxu1 %vm446_vm0, %v1857_v35 }
  0x60   : > { %838 = vmatprep.mubr.bf16.mxu0 %v1696_v2  ;;  %705 = vmatprep.mubr.bf16.mxu1 %v1696_v2 }
  0x67   : > { %1506 = vmatmul.mubr.msk.bf16.gmra.mrb[40].mxu0 %vm446_vm0, %v1857_v35  ;;  %1496 = vmatmul.mubr.msk.bf16.gmra.mrb[40].mxu1 %vm446_vm0, %v1869_v37 }
  0x68   : > { %848 = vmatprep.mubr.bf16.mxu0 %v1696_v2  ;;  %715 = vmatprep.mubr.bf16.mxu1 %v1696_v2 }
  0x6f   : > { %1507 = vmatmul.mubr.msk.bf16.gmra.mrb[44].mxu0 %vm446_vm0, %v1869_v37  ;;  %1497 = vmatmul.mubr.msk.bf16.gmra.mrb[44].mxu1 %vm446_vm0, %v1766_v12 }
  0x70   : > { %858 = vmatprep.mubr.bf16.mxu0 %v1696_v2  ;;  %725 = vmatprep.mubr.bf16.mxu1 %v1696_v2 }
  0x77   : > { %1508 = vmatmul.mubr.msk.bf16.gmra.mrb[48].mxu0 %vm446_vm0, %v1766_v12  ;;  %1498 = vmatmul.mubr.msk.bf16.gmra.mrb[48].mxu1 %vm446_vm0, %v1802_v22 }
  0x78   : > { %868 = vmatprep.mubr.bf16.mxu0 %v1696_v2  ;;  %735 = vmatprep.mubr.bf16.mxu1 %v1696_v2 }
  0x7f   : > { %1509 = vmatmul.mubr.msk.bf16.gmra.mrb[52].mxu0 %vm446_vm0, %v1802_v22  ;;  %1499 = vmatmul.mubr.msk.bf16.gmra.mrb[52].mxu1 %vm446_vm0, %v1835_v31 }
  0x80   : > { %878 = vmatprep.mubr.bf16.mxu0 %v1696_v2  ;;  %745 = vmatprep.mubr.bf16.mxu1 %v1696_v2 }
  0x87   : > { %1510 = vmatmul.mubr.msk.bf16.gmra.mrb[56].mxu0 %vm446_vm0, %v1835_v31  ;;  %1500 = vmatmul.mubr.msk.bf16.gmra.mrb[56].mxu1 %vm446_vm0, %v1848_v34 }
  0x88   : > { %888 = vmatprep.mubr.bf16.mxu0 %v1696_v2  ;;  %755 = vmatprep.mubr.bf16.mxu1 %v1696_v2 }
  0x8f   : > { %1511 = vmatmul.mubr.msk.bf16.gmra.mrb[60].mxu0 %vm446_vm0, %v1848_v34  ;;  %1501 = vmatmul.mubr.msk.bf16.gmra.mrb[60].mxu1 %vm446_vm0, %v1860_v36 }
  0x90   : > { %898 = vmatprep.mubr.bf16.mxu0 %v1696_v2  ;;  %941 = vmatprep.mubr.bf16.mxu1 %v1696_v2 }
  0x97   : > { %1512 = vmatmul.mubr.msk.bf16.gmra.mrb[64].mxu0 %vm446_vm0, %v1860_v36  ;;  %1513 = vmatmul.mubr.msk.bf16.vlgmr.msra.gmra.mrb[64].mxu1 %vm446_vm0, %v1763_v11 }
  0x98   : > { %1560 = vmatprep.mubr.msk.bf16.mxu0 %vm1698_vm1, %v1697_v32  ;;  %951 = vmatprep.mubr.bf16.mxu1 %v1696_v2 }
  0x9f   : > { %1561 = vmatmul.mubr.msk.bf16.vlgmr.msra.gmra.mrb[68].mxu0 %vm446_vm0, %v1763_v11  ;;  %1514 = vmatmul.mubr.msk.bf16.gmra.mrb[68].mxu1 %vm446_vm0, %v1792_v19 }
  0xa0   : > { %1564 = vmatprep.mubr.msk.bf16.mxu0 %vm1698_vm1, %v1697_v32  ;;  %961 = vmatprep.mubr.bf16.mxu1 %v1696_v2 }
  0xa7   : > { %1565 = vmatmul.mubr.msk.bf16.gmra.mrb[72].mxu0 %vm446_vm0, %v1792_v19  ;;  %1515 = vmatmul.mubr.msk.bf16.gmra.mrb[72].mxu1 %vm446_vm0, %v1832_v30 }
  0xa8   : > { %1568 = vmatprep.mubr.msk.bf16.mxu0 %vm1698_vm1, %v1697_v32  ;;  %971 = vmatprep.mubr.bf16.mxu1 %v1696_v2 }
  0xaf   : > { %1569 = vmatmul.mubr.msk.bf16.gmra.mrb[76].mxu0 %vm446_vm0, %v1832_v30  ;;  %1516 = vmatmul.mubr.msk.bf16.gmra.mrb[76].mxu1 %vm446_vm0, %v1845_v33 }
  0xb0   : > { %1572 = vmatprep.mubr.msk.bf16.mxu0 %vm1698_vm1, %v1697_v32  ;;  %981 = vmatprep.mubr.bf16.mxu1 %v1696_v2 }
  0xb7   : > { %1573 = vmatmul.mubr.msk.bf16.gmra.mrb[80].mxu0 %vm446_vm0, %v1845_v33  ;;  %1517 = vmatmul.mubr.msk.bf16.gmra.mrb[80].mxu1 %vm446_vm0, %v1857_v35 }
  0xb8   : > { %1576 = vmatprep.mubr.msk.bf16.mxu0 %vm1698_vm1, %v1697_v32  ;;  %991 = vmatprep.mubr.bf16.mxu1 %v1696_v2 }
  0xbf   : > { %1577 = vmatmul.mubr.msk.bf16.gmra.mrb[84].mxu0 %vm446_vm0, %v1857_v35  ;;  %1518 = vmatmul.mubr.msk.bf16.gmra.mrb[84].mxu1 %vm446_vm0, %v1869_v37 }
  0xc0   : > { %1580 = vmatprep.mubr.msk.bf16.mxu0 %vm1698_vm1, %v1697_v32  ;;  %1001 = vmatprep.mubr.bf16.mxu1 %v1696_v2 }
  0xc7   : > { %1581 = vmatmul.mubr.msk.bf16.gmra.mrb[88].mxu0 %vm446_vm0, %v1869_v37  ;;  %1519 = vmatmul.mubr.msk.bf16.gmra.mrb[88].mxu1 %vm446_vm0, %v1766_v12 }
  0xc8   : > { %1584 = vmatprep.mubr.msk.bf16.mxu0 %vm1698_vm1, %v1697_v32  ;;  %1011 = vmatprep.mubr.bf16.mxu1 %v1696_v2 }
  0xcf   : > { %1585 = vmatmul.mubr.msk.bf16.gmra.mrb[92].mxu0 %vm446_vm0, %v1766_v12  ;;  %1520 = vmatmul.mubr.msk.bf16.gmra.mrb[92].mxu1 %vm446_vm0, %v1802_v22 }
  0xd0   : > { %1588 = vmatprep.mubr.msk.bf16.mxu0 %vm1698_vm1, %v1697_v32  ;;  %1021 = vmatprep.mubr.bf16.mxu1 %v1696_v2 }
  0xd7   : > { %1589 = vmatmul.mubr.msk.bf16.gmra.mrb[96].mxu0 %vm446_vm0, %v1802_v22  ;;  %1521 = vmatmul.mubr.msk.bf16.gmra.mrb[96].mxu1 %vm446_vm0, %v1835_v31 }
  0xd8   : > { %1592 = vmatprep.mubr.msk.bf16.mxu0 %vm1698_vm1, %v1697_v32  ;;  %1031 = vmatprep.mubr.bf16.mxu1 %v1696_v2 }
  0xdf   : > { %1593 = vmatmul.mubr.msk.bf16.gmra.mrb[100].mxu0 %vm446_vm0, %v1835_v31  ;;  %1522 = vmatmul.mubr.msk.bf16.gmra.mrb[100].mxu1 %vm446_vm0, %v1848_v34 }
  0xe0   : > { %1596 = vmatprep.mubr.msk.bf16.mxu0 %vm1698_vm1, %v1697_v32  ;;  %1041 = vmatprep.mubr.bf16.mxu1 %v1696_v2 }
  0xe7   : > { %1597 = vmatmul.mubr.msk.bf16.gmra.mrb[104].mxu0 %vm446_vm0, %v1848_v34  ;;  %1523 = vmatmul.mubr.msk.bf16.gmra.mrb[104].mxu1 %vm446_vm0, %v1860_v36 }
  0xe8   : > { %1600 = vmatprep.mubr.msk.bf16.mxu0 %vm1698_vm1, %v1697_v32 }
  0xea   : > { %v514_v49 = vpop.f32.mrb[0].mxu0  ;;  %v574_v50 = vpop.f32.mrb[0].mxu1 }
  0xeb   : > { %1173 = vst [vmem:[%s2051_s13] sm:$0xff] %v514_v49  ;;  %v516_v51 = vpop.f32.mrb[1].mxu0  ;;  %1281 = vst [vmem:[%s2051_s13 + $0x360] sm:$0xff] %v574_v50  ;;  %v576_v52 = vpop.f32.mrb[1].mxu1 }
  0xec   : > { %1174 = vst [vmem:[%s2051_s13 + $0x8] sm:$0xff] %v516_v51  ;;  %v518_v53 = vpop.f32.mrb[2].mxu0  ;;  %1282 = vst [vmem:[%s2051_s13 + $0x368] sm:$0xff] %v576_v52  ;;  %v578_v54 = vpop.f32.mrb[2].mxu1 }
  0xed   : > { %1182 = vst [vmem:[%s2051_s13 + $0x48] sm:$0xff] %v518_v53  ;;  %v520_v55 = vpop.f32.mrb[3].mxu0  ;;  %1290 = vst [vmem:[%s2051_s13 + $0x3a8] sm:$0xff] %v578_v54  ;;  %v580_v56 = vpop.f32.mrb[3].mxu1 }
  0xee   : > { %1183 = vst [vmem:[%s2051_s13 + $0x50] sm:$0xff] %v520_v55  ;;  %1291 = vst [vmem:[%s2051_s13 + $0x3b0] sm:$0xff] %v580_v56 }
  0xef   : > { %1601 = vmatmul.mubr.msk.bf16.gmra.mrb[108].mxu0 %vm446_vm0, %v1860_v36 }
  0xf2   : > { %v524_v57 = vpop.f32.mrb[4].mxu0  ;;  %v584_v58 = vpop.f32.mrb[4].mxu1 }
  0xf3   : > { %1191 = vst [vmem:[%s2051_s13 + $0x90] sm:$0xff] %v524_v57  ;;  %v526_v59 = vpop.f32.mrb[5].mxu0  ;;  %1299 = vst [vmem:[%s2051_s13 + $0x3f0] sm:$0xff] %v584_v58  ;;  %v586_v60 = vpop.f32.mrb[5].mxu1 }
  0xf4   : > { %1192 = vst [vmem:[%s2051_s13 + $0x98] sm:$0xff] %v526_v59  ;;  %v528_v61 = vpop.f32.mrb[6].mxu0  ;;  %1300 = vst [vmem:[%s2051_s13 + $0x3f8] sm:$0xff] %v586_v60  ;;  %v588_v62 = vpop.f32.mrb[6].mxu1 }
  0xf5   : > { %1200 = vst [vmem:[%s2051_s13 + $0xd8] sm:$0xff] %v528_v61  ;;  %v530_v63 = vpop.f32.mrb[7].mxu0  ;;  %1308 = vst [vmem:[%s2051_s13 + $0x438] sm:$0xff] %v588_v62  ;;  %v590_v0 = vpop.f32.mrb[7].mxu1 }
  0xf6   : > { %1201 = vst [vmem:[%s2051_s13 + $0xe0] sm:$0xff] %v530_v63  ;;  %1309 = vst [vmem:[%s2051_s13 + $0x440] sm:$0xff] %v590_v0 }
  0xfa   : > { %v534_v1 = vpop.f32.mrb[8].mxu0  ;;  %v594_v2 = vpop.f32.mrb[8].mxu1 }
  0xfb   : > { %1209 = vst [vmem:[%s2051_s13 + $0x120] sm:$0xff] %v534_v1  ;;  %v536_v3 = vpop.f32.mrb[9].mxu0  ;;  %1317 = vst [vmem:[%s2051_s13 + $0x480] sm:$0xff] %v594_v2  ;;  %v596_v4 = vpop.f32.mrb[9].mxu1 }
  0xfc   : > { %1210 = vst [vmem:[%s2051_s13 + $0x128] sm:$0xff] %v536_v3  ;;  %v538_v5 = vpop.f32.mrb[10].mxu0  ;;  %1318 = vst [vmem:[%s2051_s13 + $0x488] sm:$0xff] %v596_v4  ;;  %v598_v6 = vpop.f32.mrb[10].mxu1 }
  0xfd   : > { %1218 = vst [vmem:[%s2051_s13 + $0x168] sm:$0xff] %v538_v5  ;;  %v540_v7 = vpop.f32.mrb[11].mxu0  ;;  %1326 = vst [vmem:[%s2051_s13 + $0x4c8] sm:$0xff] %v598_v6  ;;  %v600_v8 = vpop.f32.mrb[11].mxu1 }
  0xfe   : > { %1219 = vst [vmem:[%s2051_s13 + $0x170] sm:$0xff] %v540_v7  ;;  %1327 = vst [vmem:[%s2051_s13 + $0x4d0] sm:$0xff] %v600_v8 }
 0x102   : > { %v544_v9 = vpop.f32.mrb[12].mxu0  ;;  %v604_v10 = vpop.f32.mrb[12].mxu1 }
 0x103   : > { %1227 = vst [vmem:[%s2051_s13 + $0x1b0] sm:$0xff] %v544_v9  ;;  %v546_v11 = vpop.f32.mrb[13].mxu0  ;;  %1335 = vst [vmem:[%s2051_s13 + $0x510] sm:$0xff] %v604_v10  ;;  %v606_v12 = vpop.f32.mrb[13].mxu1 }
 0x104   : > { %1228 = vst [vmem:[%s2051_s13 + $0x1b8] sm:$0xff] %v546_v11  ;;  %v548_v13 = vpop.f32.mrb[14].mxu0  ;;  %1336 = vst [vmem:[%s2051_s13 + $0x518] sm:$0xff] %v606_v12  ;;  %v608_v14 = vpop.f32.mrb[14].mxu1 }
 0x105   : > { %1236 = vst [vmem:[%s2051_s13 + $0x1f8] sm:$0xff] %v548_v13  ;;  %v550_v15 = vpop.f32.mrb[15].mxu0  ;;  %1344 = vst [vmem:[%s2051_s13 + $0x558] sm:$0xff] %v608_v14  ;;  %v610_v16 = vpop.f32.mrb[15].mxu1 }
 0x106   : > { %1237 = vst [vmem:[%s2051_s13 + $0x200] sm:$0xff] %v550_v15  ;;  %1345 = vst [vmem:[%s2051_s13 + $0x560] sm:$0xff] %v610_v16 }
 0x10a   : > { %v554_v17 = vpop.f32.mrb[16].mxu0  ;;  %v614_v18 = vpop.f32.mrb[16].mxu1 }
 0x10b   : > { %1245 = vst [vmem:[%s2051_s13 + $0x240] sm:$0xff] %v554_v17  ;;  %v556_v19 = vpop.f32.mrb[17].mxu0  ;;  %1353 = vst [vmem:[%s2051_s13 + $0x5a0] sm:$0xff] %v614_v18  ;;  %v616_v20 = vpop.f32.mrb[17].mxu1 }
 0x10c   : > { %1246 = vst [vmem:[%s2051_s13 + $0x248] sm:$0xff] %v556_v19  ;;  %v558_v21 = vpop.f32.mrb[18].mxu0  ;;  %1354 = vst [vmem:[%s2051_s13 + $0x5a8] sm:$0xff] %v616_v20  ;;  %v618_v22 = vpop.f32.mrb[18].mxu1 }
 0x10d   : > { %1254 = vst [vmem:[%s2051_s13 + $0x288] sm:$0xff] %v558_v21  ;;  %v560_v23 = vpop.f32.mrb[19].mxu0  ;;  %1362 = vst [vmem:[%s2051_s13 + $0x5e8] sm:$0x1] %v618_v22  ;;  %v620_v24 = vpop.f32.mrb[19].mxu1 }
 0x10e   : > { %1255 = vst [vmem:[%s2051_s13 + $0x290] sm:$0xff] %v560_v23  ;;  %1363 = vst [vmem:[%s2051_s13 + $0x5f0] sm:$0x1] %v620_v24 }
 0x112   : > { %v564_v25 = vpop.f32.mrb[20].mxu0  ;;  %v657_v26 = vpop.f32.mrb[20].mxu1 }
 0x113   : > { %1263 = vst [vmem:[%s2051_s13 + $0x2d0] sm:$0xff] %v564_v25  ;;  %v566_v27 = vpop.f32.mrb[21].mxu0  ;;  %1175 = vst [vmem:[%s2051_s13 + $0x10] sm:$0xff] %v657_v26  ;;  %v659_v28 = vpop.f32.mrb[21].mxu1 }
 0x114   : > { %1264 = vst [vmem:[%s2051_s13 + $0x2d8] sm:$0xff] %v566_v27  ;;  %v568_v29 = vpop.f32.mrb[22].mxu0  ;;  %1176 = vst [vmem:[%s2051_s13 + $0x18] sm:$0xff] %v659_v28  ;;  %v661_v30 = vpop.f32.mrb[22].mxu1 }
 0x115   : > { %1272 = vst [vmem:[%s2051_s13 + $0x318] sm:$0xff] %v568_v29  ;;  %v570_v31 = vpop.f32.mrb[23].mxu0  ;;  %1184 = vst [vmem:[%s2051_s13 + $0x58] sm:$0xff] %v661_v30  ;;  %v663_v32 = vpop.f32.mrb[23].mxu1 }
 0x116   : > { %1273 = vst [vmem:[%s2051_s13 + $0x320] sm:$0xff] %v570_v31  ;;  %1185 = vst [vmem:[%s2051_s13 + $0x60] sm:$0xff] %v663_v32 }
 0x11a   : > { %v800_v33 = vpop.f32.mrb[24].mxu0  ;;  %v667_v34 = vpop.f32.mrb[24].mxu1 }
 0x11b   : > { %1177 = vst [vmem:[%s2051_s13 + $0x20] sm:$0xff] %v800_v33  ;;  %v802_v35 = vpop.f32.mrb[25].mxu0  ;;  %1193 = vst [vmem:[%s2051_s13 + $0xa0] sm:$0xff] %v667_v34  ;;  %v669_v36 = vpop.f32.mrb[25].mxu1 }
 0x11c   : > { %1178 = vst [vmem:[%s2051_s13 + $0x28] sm:$0xff] %v802_v35  ;;  %v804_v37 = vpop.f32.mrb[26].mxu0  ;;  %1194 = vst [vmem:[%s2051_s13 + $0xa8] sm:$0xff] %v669_v36  ;;  %v671_v38 = vpop.f32.mrb[26].mxu1 }
 0x11d   : > { %1186 = vst [vmem:[%s2051_s13 + $0x68] sm:$0xff] %v804_v37  ;;  %v806_v39 = vpop.f32.mrb[27].mxu0  ;;  %1202 = vst [vmem:[%s2051_s13 + $0xe8] sm:$0xff] %v671_v38  ;;  %v673_v40 = vpop.f32.mrb[27].mxu1 }
 0x11e   : > { %1187 = vst [vmem:[%s2051_s13 + $0x70] sm:$0xff] %v806_v39  ;;  %1203 = vst [vmem:[%s2051_s13 + $0xf0] sm:$0xff] %v673_v40 }
 0x122   : > { %v810_v41 = vpop.f32.mrb[28].mxu0  ;;  %v677_v42 = vpop.f32.mrb[28].mxu1 }
 0x123   : > { %1195 = vst [vmem:[%s2051_s13 + $0xb0] sm:$0xff] %v810_v41  ;;  %v812_v43 = vpop.f32.mrb[29].mxu0  ;;  %1211 = vst [vmem:[%s2051_s13 + $0x130] sm:$0xff] %v677_v42  ;;  %v679_v44 = vpop.f32.mrb[29].mxu1 }
 0x124   : > { %1196 = vst [vmem:[%s2051_s13 + $0xb8] sm:$0xff] %v812_v43  ;;  %v814_v45 = vpop.f32.mrb[30].mxu0  ;;  %1212 = vst [vmem:[%s2051_s13 + $0x138] sm:$0xff] %v679_v44  ;;  %v681_v46 = vpop.f32.mrb[30].mxu1 }
 0x125   : > { %1204 = vst [vmem:[%s2051_s13 + $0xf8] sm:$0xff] %v814_v45  ;;  %v816_v47 = vpop.f32.mrb[31].mxu0  ;;  %1220 = vst [vmem:[%s2051_s13 + $0x178] sm:$0xff] %v681_v46  ;;  %v683_v48 = vpop.f32.mrb[31].mxu1 }
 0x126   : > { %1205 = vst [vmem:[%s2051_s13 + $0x100] sm:$0xff] %v816_v47  ;;  %1221 = vst [vmem:[%s2051_s13 + $0x180] sm:$0xff] %v683_v48 }
 0x12a   : > { %v820_v49 = vpop.f32.mrb[32].mxu0  ;;  %v687_v50 = vpop.f32.mrb[32].mxu1 }
 0x12b   : > { %1213 = vst [vmem:[%s2051_s13 + $0x140] sm:$0xff] %v820_v49  ;;  %v822_v51 = vpop.f32.mrb[33].mxu0  ;;  %1229 = vst [vmem:[%s2051_s13 + $0x1c0] sm:$0xff] %v687_v50  ;;  %v689_v52 = vpop.f32.mrb[33].mxu1 }
 0x12c   : > { %1214 = vst [vmem:[%s2051_s13 + $0x148] sm:$0xff] %v822_v51  ;;  %v824_v53 = vpop.f32.mrb[34].mxu0  ;;  %1230 = vst [vmem:[%s2051_s13 + $0x1c8] sm:$0xff] %v689_v52  ;;  %v691_v54 = vpop.f32.mrb[34].mxu1 }
 0x12d   : > { %1222 = vst [vmem:[%s2051_s13 + $0x188] sm:$0xff] %v824_v53  ;;  %v826_v55 = vpop.f32.mrb[35].mxu0  ;;  %1238 = vst [vmem:[%s2051_s13 + $0x208] sm:$0xff] %v691_v54  ;;  %v693_v56 = vpop.f32.mrb[35].mxu1 }
 0x12e   : > { %1223 = vst [vmem:[%s2051_s13 + $0x190] sm:$0xff] %v826_v55  ;;  %1239 = vst [vmem:[%s2051_s13 + $0x210] sm:$0xff] %v693_v56 }
 0x132   : > { %v830_v57 = vpop.f32.mrb[36].mxu0  ;;  %v697_v58 = vpop.f32.mrb[36].mxu1 }
 0x133   : > { %1231 = vst [vmem:[%s2051_s13 + $0x1d0] sm:$0xff] %v830_v57  ;;  %v832_v59 = vpop.f32.mrb[37].mxu0  ;;  %1247 = vst [vmem:[%s2051_s13 + $0x250] sm:$0xff] %v697_v58  ;;  %v699_v60 = vpop.f32.mrb[37].mxu1 }
 0x134   : > { %1232 = vst [vmem:[%s2051_s13 + $0x1d8] sm:$0xff] %v832_v59  ;;  %v834_v61 = vpop.f32.mrb[38].mxu0  ;;  %1248 = vst [vmem:[%s2051_s13 + $0x258] sm:$0xff] %v699_v60  ;;  %v701_v62 = vpop.f32.mrb[38].mxu1 }
 0x135   : > { %1240 = vst [vmem:[%s2051_s13 + $0x218] sm:$0xff] %v834_v61  ;;  %v836_v63 = vpop.f32.mrb[39].mxu0  ;;  %1256 = vst [vmem:[%s2051_s13 + $0x298] sm:$0xff] %v701_v62  ;;  %v703_v0 = vpop.f32.mrb[39].mxu1 }
 0x136   : > { %1241 = vst [vmem:[%s2051_s13 + $0x220] sm:$0xff] %v836_v63  ;;  %1257 = vst [vmem:[%s2051_s13 + $0x2a0] sm:$0xff] %v703_v0 }
 0x13a   : > { %v840_v1 = vpop.f32.mrb[40].mxu0  ;;  %v707_v2 = vpop.f32.mrb[40].mxu1 }
 0x13b   : > { %1249 = vst [vmem:[%s2051_s13 + $0x260] sm:$0xff] %v840_v1  ;;  %v842_v3 = vpop.f32.mrb[41].mxu0  ;;  %1265 = vst [vmem:[%s2051_s13 + $0x2e0] sm:$0xff] %v707_v2  ;;  %v709_v4 = vpop.f32.mrb[41].mxu1 }
 0x13c   : > { %1250 = vst [vmem:[%s2051_s13 + $0x268] sm:$0xff] %v842_v3  ;;  %v844_v5 = vpop.f32.mrb[42].mxu0  ;;  %1266 = vst [vmem:[%s2051_s13 + $0x2e8] sm:$0xff] %v709_v4  ;;  %v711_v6 = vpop.f32.mrb[42].mxu1 }
 0x13d   : > { %1258 = vst [vmem:[%s2051_s13 + $0x2a8] sm:$0xff] %v844_v5  ;;  %v846_v7 = vpop.f32.mrb[43].mxu0  ;;  %1274 = vst [vmem:[%s2051_s13 + $0x328] sm:$0xff] %v711_v6  ;;  %v713_v8 = vpop.f32.mrb[43].mxu1 }
 0x13e   : > { %1259 = vst [vmem:[%s2051_s13 + $0x2b0] sm:$0xff] %v846_v7  ;;  %1275 = vst [vmem:[%s2051_s13 + $0x330] sm:$0xff] %v713_v8 }
 0x142   : > { %v850_v9 = vpop.f32.mrb[44].mxu0  ;;  %v717_v10 = vpop.f32.mrb[44].mxu1 }
 0x143   : > { %1267 = vst [vmem:[%s2051_s13 + $0x2f0] sm:$0xff] %v850_v9  ;;  %v852_v11 = vpop.f32.mrb[45].mxu0  ;;  %1283 = vst [vmem:[%s2051_s13 + $0x370] sm:$0xff] %v717_v10  ;;  %v719_v12 = vpop.f32.mrb[45].mxu1 }
 0x144   : > { %1268 = vst [vmem:[%s2051_s13 + $0x2f8] sm:$0xff] %v852_v11  ;;  %v854_v13 = vpop.f32.mrb[46].mxu0  ;;  %1284 = vst [vmem:[%s2051_s13 + $0x378] sm:$0xff] %v719_v12  ;;  %v721_v14 = vpop.f32.mrb[46].mxu1 }
 0x145   : > { %1276 = vst [vmem:[%s2051_s13 + $0x338] sm:$0xff] %v854_v13  ;;  %v856_v15 = vpop.f32.mrb[47].mxu0  ;;  %1292 = vst [vmem:[%s2051_s13 + $0x3b8] sm:$0xff] %v721_v14  ;;  %v723_v16 = vpop.f32.mrb[47].mxu1 }
 0x146   : > { %1277 = vst [vmem:[%s2051_s13 + $0x340] sm:$0xff] %v856_v15  ;;  %1293 = vst [vmem:[%s2051_s13 + $0x3c0] sm:$0xff] %v723_v16 }
 0x14a   : > { %v860_v17 = vpop.f32.mrb[48].mxu0  ;;  %v727_v18 = vpop.f32.mrb[48].mxu1 }
 0x14b   : > { %1285 = vst [vmem:[%s2051_s13 + $0x380] sm:$0xff] %v860_v17  ;;  %v862_v19 = vpop.f32.mrb[49].mxu0  ;;  %1301 = vst [vmem:[%s2051_s13 + $0x400] sm:$0xff] %v727_v18  ;;  %v729_v20 = vpop.f32.mrb[49].mxu1 }
 0x14c   : > { %1286 = vst [vmem:[%s2051_s13 + $0x388] sm:$0xff] %v862_v19  ;;  %v864_v21 = vpop.f32.mrb[50].mxu0  ;;  %1302 = vst [vmem:[%s2051_s13 + $0x408] sm:$0xff] %v729_v20  ;;  %v731_v22 = vpop.f32.mrb[50].mxu1 }
 0x14d   : > { %1294 = vst [vmem:[%s2051_s13 + $0x3c8] sm:$0xff] %v864_v21  ;;  %v866_v23 = vpop.f32.mrb[51].mxu0  ;;  %1310 = vst [vmem:[%s2051_s13 + $0x448] sm:$0xff] %v731_v22  ;;  %v733_v24 = vpop.f32.mrb[51].mxu1 }
 0x14e   : > { %1295 = vst [vmem:[%s2051_s13 + $0x3d0] sm:$0xff] %v866_v23  ;;  %1311 = vst [vmem:[%s2051_s13 + $0x450] sm:$0xff] %v733_v24 }
 0x152   : > { %v870_v25 = vpop.f32.mrb[52].mxu0  ;;  %v737_v26 = vpop.f32.mrb[52].mxu1 }
 0x153   : > { %1303 = vst [vmem:[%s2051_s13 + $0x410] sm:$0xff] %v870_v25  ;;  %v872_v27 = vpop.f32.mrb[53].mxu0  ;;  %1319 = vst [vmem:[%s2051_s13 + $0x490] sm:$0xff] %v737_v26  ;;  %v739_v28 = vpop.f32.mrb[53].mxu1 }
 0x154   : > { %1304 = vst [vmem:[%s2051_s13 + $0x418] sm:$0xff] %v872_v27  ;;  %v874_v29 = vpop.f32.mrb[54].mxu0  ;;  %1320 = vst [vmem:[%s2051_s13 + $0x498] sm:$0xff] %v739_v28  ;;  %v741_v30 = vpop.f32.mrb[54].mxu1 }
 0x155   : > { %1312 = vst [vmem:[%s2051_s13 + $0x458] sm:$0xff] %v874_v29  ;;  %v876_v31 = vpop.f32.mrb[55].mxu0  ;;  %1328 = vst [vmem:[%s2051_s13 + $0x4d8] sm:$0xff] %v741_v30  ;;  %v743_v32 = vpop.f32.mrb[55].mxu1 }
 0x156   : > { %1313 = vst [vmem:[%s2051_s13 + $0x460] sm:$0xff] %v876_v31  ;;  %1329 = vst [vmem:[%s2051_s13 + $0x4e0] sm:$0xff] %v743_v32 }
 0x15a   : > { %v880_v33 = vpop.f32.mrb[56].mxu0  ;;  %v747_v34 = vpop.f32.mrb[56].mxu1 }
 0x15b   : > { %1321 = vst [vmem:[%s2051_s13 + $0x4a0] sm:$0xff] %v880_v33  ;;  %v882_v35 = vpop.f32.mrb[57].mxu0  ;;  %1337 = vst [vmem:[%s2051_s13 + $0x520] sm:$0xff] %v747_v34  ;;  %v749_v36 = vpop.f32.mrb[57].mxu1 }
 0x15c   : > { %1322 = vst [vmem:[%s2051_s13 + $0x4a8] sm:$0xff] %v882_v35  ;;  %v884_v37 = vpop.f32.mrb[58].mxu0  ;;  %1338 = vst [vmem:[%s2051_s13 + $0x528] sm:$0xff] %v749_v36  ;;  %v751_v38 = vpop.f32.mrb[58].mxu1 }
 0x15d   : > { %1330 = vst [vmem:[%s2051_s13 + $0x4e8] sm:$0xff] %v884_v37  ;;  %v886_v39 = vpop.f32.mrb[59].mxu0  ;;  %1346 = vst [vmem:[%s2051_s13 + $0x568] sm:$0xff] %v751_v38  ;;  %v753_v40 = vpop.f32.mrb[59].mxu1 }
 0x15e   : > { %1331 = vst [vmem:[%s2051_s13 + $0x4f0] sm:$0xff] %v886_v39  ;;  %1347 = vst [vmem:[%s2051_s13 + $0x570] sm:$0xff] %v753_v40 }
 0x162   : > { %v890_v41 = vpop.f32.mrb[60].mxu0  ;;  %v757_v42 = vpop.f32.mrb[60].mxu1 }
 0x163   : > { %1339 = vst [vmem:[%s2051_s13 + $0x530] sm:$0xff] %v890_v41  ;;  %v892_v43 = vpop.f32.mrb[61].mxu0  ;;  %1355 = vst [vmem:[%s2051_s13 + $0x5b0] sm:$0xff] %v757_v42  ;;  %v759_v44 = vpop.f32.mrb[61].mxu1 }
 0x164   : > { %1340 = vst [vmem:[%s2051_s13 + $0x538] sm:$0xff] %v892_v43  ;;  %v894_v45 = vpop.f32.mrb[62].mxu0  ;;  %1356 = vst [vmem:[%s2051_s13 + $0x5b8] sm:$0xff] %v759_v44  ;;  %v761_v46 = vpop.f32.mrb[62].mxu1 }
 0x165   : > { %1348 = vst [vmem:[%s2051_s13 + $0x578] sm:$0xff] %v894_v45  ;;  %v896_v47 = vpop.f32.mrb[63].mxu0  ;;  %1364 = vst [vmem:[%s2051_s13 + $0x5f8] sm:$0x1] %v761_v46  ;;  %v763_v48 = vpop.f32.mrb[63].mxu1 }
 0x166   : > { %1349 = vst [vmem:[%s2051_s13 + $0x580] sm:$0xff] %v896_v47  ;;  %1365 = vst [vmem:[%s2051_s13 + $0x600] sm:$0x1] %v763_v48 }
 0x16a   : > { %v900_v49 = vpop.f32.mrb[64].mxu0  ;;  %v943_v50 = vpop.f32.mrb[64].mxu1 }
 0x16b   : > { %1357 = vst [vmem:[%s2051_s13 + $0x5c0] sm:$0xff] %v900_v49  ;;  %v902_v51 = vpop.f32.mrb[65].mxu0  ;;  %1179 = vst [vmem:[%s2051_s13 + $0x30] sm:$0xff] %v943_v50  ;;  %v945_v52 = vpop.f32.mrb[65].mxu1 }
 0x16c   : > { %1358 = vst [vmem:[%s2051_s13 + $0x5c8] sm:$0xff] %v902_v51  ;;  %v904_v53 = vpop.f32.mrb[66].mxu0  ;;  %1180 = vst [vmem:[%s2051_s13 + $0x38] sm:$0xff] %v945_v52  ;;  %v947_v54 = vpop.f32.mrb[66].mxu1 }
 0x16d   : > { %1366 = vst [vmem:[%s2051_s13 + $0x608] sm:$0x1] %v904_v53  ;;  %v906_v55 = vpop.f32.mrb[67].mxu0  ;;  %1188 = vst [vmem:[%s2051_s13 + $0x78] sm:$0xff] %v947_v54  ;;  %v949_v56 = vpop.f32.mrb[67].mxu1 }
 0x16e   : > { %1367 = vst [vmem:[%s2051_s13 + $0x610] sm:$0x1] %v906_v55  ;;  %1189 = vst [vmem:[%s2051_s13 + $0x80] sm:$0xff] %v949_v56 }
 0x172   : > { %v1086_v57 = vpop.f32.mrb[68].mxu0  ;;  %v953_v58 = vpop.f32.mrb[68].mxu1 }
 0x173   : > { %1181 = vst [vmem:[%s2051_s13 + $0x40] sm:$0xff] %v1086_v57  ;;  %v1562_v59 = vpop.f32.mrb[69].mxu0  ;;  %1197 = vst [vmem:[%s2051_s13 + $0xc0] sm:$0xff] %v953_v58  ;;  %v955_v60 = vpop.f32.mrb[69].mxu1 }
 0x174   : > { %v1089_v61 = vpop.f32.mrb[70].mxu0  ;;  %1198 = vst [vmem:[%s2051_s13 + $0xc8] sm:$0xff] %v955_v60  ;;  %v957_v62 = vpop.f32.mrb[70].mxu1 }
 0x175   : > { %1190 = vst [vmem:[%s2051_s13 + $0x88] sm:$0xff] %v1089_v61  ;;  %v1563_v63 = vpop.f32.mrb[71].mxu0  ;;  %1206 = vst [vmem:[%s2051_s13 + $0x108] sm:$0xff] %v957_v62  ;;  %v959_v0 = vpop.f32.mrb[71].mxu1 }
 0x176   : > { %1207 = vst [vmem:[%s2051_s13 + $0x110] sm:$0xff] %v959_v0 }
 0x17a   : > { %v1094_v1 = vpop.f32.mrb[72].mxu0  ;;  %v963_v2 = vpop.f32.mrb[72].mxu1 }
 0x17b   : > { %1199 = vst [vmem:[%s2051_s13 + $0xd0] sm:$0xff] %v1094_v1  ;;  %v1566_v3 = vpop.f32.mrb[73].mxu0  ;;  %1215 = vst [vmem:[%s2051_s13 + $0x150] sm:$0xff] %v963_v2  ;;  %v965_v4 = vpop.f32.mrb[73].mxu1 }
 0x17c   : > { %v1097_v5 = vpop.f32.mrb[74].mxu0  ;;  %1216 = vst [vmem:[%s2051_s13 + $0x158] sm:$0xff] %v965_v4  ;;  %v967_v6 = vpop.f32.mrb[74].mxu1 }
 0x17d   : > { %1208 = vst [vmem:[%s2051_s13 + $0x118] sm:$0xff] %v1097_v5  ;;  %v1567_v7 = vpop.f32.mrb[75].mxu0  ;;  %1224 = vst [vmem:[%s2051_s13 + $0x198] sm:$0xff] %v967_v6  ;;  %v969_v8 = vpop.f32.mrb[75].mxu1 }
 0x17e   : > { %1225 = vst [vmem:[%s2051_s13 + $0x1a0] sm:$0xff] %v969_v8 }
 0x182   : > { %v1102_v9 = vpop.f32.mrb[76].mxu0  ;;  %v973_v10 = vpop.f32.mrb[76].mxu1 }
 0x183   : > { %1217 = vst [vmem:[%s2051_s13 + $0x160] sm:$0xff] %v1102_v9  ;;  %v1570_v11 = vpop.f32.mrb[77].mxu0  ;;  %1233 = vst [vmem:[%s2051_s13 + $0x1e0] sm:$0xff] %v973_v10  ;;  %v975_v12 = vpop.f32.mrb[77].mxu1 }
 0x184   : > { %v1105_v13 = vpop.f32.mrb[78].mxu0  ;;  %1234 = vst [vmem:[%s2051_s13 + $0x1e8] sm:$0xff] %v975_v12  ;;  %v977_v14 = vpop.f32.mrb[78].mxu1 }
 0x185   : > { %1226 = vst [vmem:[%s2051_s13 + $0x1a8] sm:$0xff] %v1105_v13  ;;  %v1571_v15 = vpop.f32.mrb[79].mxu0  ;;  %1242 = vst [vmem:[%s2051_s13 + $0x228] sm:$0xff] %v977_v14  ;;  %v979_v16 = vpop.f32.mrb[79].mxu1 }
 0x186   : > { %1243 = vst [vmem:[%s2051_s13 + $0x230] sm:$0xff] %v979_v16 }
 0x18a   : > { %v1110_v17 = vpop.f32.mrb[80].mxu0  ;;  %v983_v18 = vpop.f32.mrb[80].mxu1 }
 0x18b   : > { %1235 = vst [vmem:[%s2051_s13 + $0x1f0] sm:$0xff] %v1110_v17  ;;  %v1574_v19 = vpop.f32.mrb[81].mxu0  ;;  %1251 = vst [vmem:[%s2051_s13 + $0x270] sm:$0xff] %v983_v18  ;;  %v985_v20 = vpop.f32.mrb[81].mxu1 }
 0x18c   : > { %v1113_v21 = vpop.f32.mrb[82].mxu0  ;;  %1252 = vst [vmem:[%s2051_s13 + $0x278] sm:$0xff] %v985_v20  ;;  %v987_v22 = vpop.f32.mrb[82].mxu1 }
 0x18d   : > { %1244 = vst [vmem:[%s2051_s13 + $0x238] sm:$0xff] %v1113_v21  ;;  %v1575_v23 = vpop.f32.mrb[83].mxu0  ;;  %1260 = vst [vmem:[%s2051_s13 + $0x2b8] sm:$0xff] %v987_v22  ;;  %v989_v24 = vpop.f32.mrb[83].mxu1 }
 0x18e   : > { %1261 = vst [vmem:[%s2051_s13 + $0x2c0] sm:$0xff] %v989_v24 }
 0x192   : > { %v1118_v25 = vpop.f32.mrb[84].mxu0  ;;  %v993_v26 = vpop.f32.mrb[84].mxu1 }
 0x193   : > { %1253 = vst [vmem:[%s2051_s13 + $0x280] sm:$0xff] %v1118_v25  ;;  %v1578_v27 = vpop.f32.mrb[85].mxu0  ;;  %1269 = vst [vmem:[%s2051_s13 + $0x300] sm:$0xff] %v993_v26  ;;  %v995_v28 = vpop.f32.mrb[85].mxu1 }
 0x194   : > { %v1121_v29 = vpop.f32.mrb[86].mxu0  ;;  %1270 = vst [vmem:[%s2051_s13 + $0x308] sm:$0xff] %v995_v28  ;;  %v997_v30 = vpop.f32.mrb[86].mxu1 }
 0x195   : > { %1262 = vst [vmem:[%s2051_s13 + $0x2c8] sm:$0xff] %v1121_v29  ;;  %v1579_v31 = vpop.f32.mrb[87].mxu0  ;;  %1278 = vst [vmem:[%s2051_s13 + $0x348] sm:$0xff] %v997_v30  ;;  %v999_v32 = vpop.f32.mrb[87].mxu1 }
 0x196   : > { %1279 = vst [vmem:[%s2051_s13 + $0x350] sm:$0xff] %v999_v32 }
 0x19a   : > { %v1126_v33 = vpop.f32.mrb[88].mxu0  ;;  %v1003_v34 = vpop.f32.mrb[88].mxu1 }
 0x19b   : > { %1271 = vst [vmem:[%s2051_s13 + $0x310] sm:$0xff] %v1126_v33  ;;  %v1582_v35 = vpop.f32.mrb[89].mxu0  ;;  %1287 = vst [vmem:[%s2051_s13 + $0x390] sm:$0xff] %v1003_v34  ;;  %v1005_v36 = vpop.f32.mrb[89].mxu1 }
 0x19c   : > { %v1129_v37 = vpop.f32.mrb[90].mxu0  ;;  %1288 = vst [vmem:[%s2051_s13 + $0x398] sm:$0xff] %v1005_v36  ;;  %v1007_v38 = vpop.f32.mrb[90].mxu1 }
 0x19d   : > { %1280 = vst [vmem:[%s2051_s13 + $0x358] sm:$0xff] %v1129_v37  ;;  %v1583_v39 = vpop.f32.mrb[91].mxu0  ;;  %1296 = vst [vmem:[%s2051_s13 + $0x3d8] sm:$0xff] %v1007_v38  ;;  %v1009_v40 = vpop.f32.mrb[91].mxu1 }
 0x19e   : > { %1297 = vst [vmem:[%s2051_s13 + $0x3e0] sm:$0xff] %v1009_v40 }
 0x1a2   : > { %v1134_v41 = vpop.f32.mrb[92].mxu0  ;;  %v1013_v42 = vpop.f32.mrb[92].mxu1 }
 0x1a3   : > { %1289 = vst [vmem:[%s2051_s13 + $0x3a0] sm:$0xff] %v1134_v41  ;;  %v1586_v43 = vpop.f32.mrb[93].mxu0  ;;  %1305 = vst [vmem:[%s2051_s13 + $0x420] sm:$0xff] %v1013_v42  ;;  %v1015_v44 = vpop.f32.mrb[93].mxu1 }
 0x1a4   : > { %v1137_v45 = vpop.f32.mrb[94].mxu0  ;;  %1306 = vst [vmem:[%s2051_s13 + $0x428] sm:$0xff] %v1015_v44  ;;  %v1017_v46 = vpop.f32.mrb[94].mxu1 }
 0x1a5   : > { %1298 = vst [vmem:[%s2051_s13 + $0x3e8] sm:$0xff] %v1137_v45  ;;  %v1587_v47 = vpop.f32.mrb[95].mxu0  ;;  %1314 = vst [vmem:[%s2051_s13 + $0x468] sm:$0xff] %v1017_v46  ;;  %v1019_v48 = vpop.f32.mrb[95].mxu1 }
 0x1a6   : > { %1315 = vst [vmem:[%s2051_s13 + $0x470] sm:$0xff] %v1019_v48 }
 0x1aa   : > { %v1142_v49 = vpop.f32.mrb[96].mxu0  ;;  %v1023_v50 = vpop.f32.mrb[96].mxu1 }
 0x1ab   : > { %1307 = vst [vmem:[%s2051_s13 + $0x430] sm:$0xff] %v1142_v49  ;;  %v1590_v51 = vpop.f32.mrb[97].mxu0  ;;  %1323 = vst [vmem:[%s2051_s13 + $0x4b0] sm:$0xff] %v1023_v50  ;;  %v1025_v52 = vpop.f32.mrb[97].mxu1 }
 0x1ac   : > { %v1145_v53 = vpop.f32.mrb[98].mxu0  ;;  %1324 = vst [vmem:[%s2051_s13 + $0x4b8] sm:$0xff] %v1025_v52  ;;  %v1027_v54 = vpop.f32.mrb[98].mxu1 }
 0x1ad   : > { %1316 = vst [vmem:[%s2051_s13 + $0x478] sm:$0xff] %v1145_v53  ;;  %v1591_v55 = vpop.f32.mrb[99].mxu0  ;;  %1332 = vst [vmem:[%s2051_s13 + $0x4f8] sm:$0xff] %v1027_v54  ;;  %v1029_v56 = vpop.f32.mrb[99].mxu1 }
 0x1ae   : > { %1333 = vst [vmem:[%s2051_s13 + $0x500] sm:$0xff] %v1029_v56 }
 0x1b2   : > { %v1150_v57 = vpop.f32.mrb[100].mxu0  ;;  %v1033_v58 = vpop.f32.mrb[100].mxu1 }
 0x1b3   : > { %1325 = vst [vmem:[%s2051_s13 + $0x4c0] sm:$0xff] %v1150_v57  ;;  %v1594_v59 = vpop.f32.mrb[101].mxu0  ;;  %1341 = vst [vmem:[%s2051_s13 + $0x540] sm:$0xff] %v1033_v58  ;;  %v1035_v60 = vpop.f32.mrb[101].mxu1 }
 0x1b4   : > { %v1153_v61 = vpop.f32.mrb[102].mxu0  ;;  %1342 = vst [vmem:[%s2051_s13 + $0x548] sm:$0xff] %v1035_v60  ;;  %v1037_v62 = vpop.f32.mrb[102].mxu1 }
 0x1b5   : > { %1334 = vst [vmem:[%s2051_s13 + $0x508] sm:$0xff] %v1153_v61  ;;  %v1595_v63 = vpop.f32.mrb[103].mxu0  ;;  %1350 = vst [vmem:[%s2051_s13 + $0x588] sm:$0xff] %v1037_v62  ;;  %v1039_v0 = vpop.f32.mrb[103].mxu1 }
 0x1b6   : > { %1351 = vst [vmem:[%s2051_s13 + $0x590] sm:$0xff] %v1039_v0 }
 0x1ba   : > { %v1158_v1 = vpop.f32.mrb[104].mxu0  ;;  %v1043_v2 = vpop.f32.mrb[104].mxu1 }
 0x1bb   : > { %1343 = vst [vmem:[%s2051_s13 + $0x550] sm:$0xff] %v1158_v1  ;;  %v1598_v3 = vpop.f32.mrb[105].mxu0  ;;  %1359 = vst [vmem:[%s2051_s13 + $0x5d0] sm:$0xff] %v1043_v2  ;;  %v1045_v4 = vpop.f32.mrb[105].mxu1 }
 0x1bc   : > { %v1161_v5 = vpop.f32.mrb[106].mxu0  ;;  %1360 = vst [vmem:[%s2051_s13 + $0x5d8] sm:$0xff] %v1045_v4  ;;  %v1047_v6 = vpop.f32.mrb[106].mxu1 }
 0x1bd   : > { %1352 = vst [vmem:[%s2051_s13 + $0x598] sm:$0xff] %v1161_v5  ;;  %v1599_v7 = vpop.f32.mrb[107].mxu0  ;;  %1368 = vst [vmem:[%s2051_s13 + $0x618] sm:$0x1] %v1047_v6  ;;  %v1049_v8 = vpop.f32.mrb[107].mxu1 }
 0x1be   : > { %1369 = vst [vmem:[%s2051_s13 + $0x620] sm:$0x1] %v1049_v8 }
 0x1c2   : > { %v1166_v9 = vpop.f32.mrb[108].mxu0 }
 0x1c3   : > { %1361 = vst [vmem:[%s2051_s13 + $0x5e0] sm:$0xff] %v1166_v9  ;;  %v1602_v10 = vpop.f32.mrb[109].mxu0 }
 0x1c4   : > { %v1169_v11 = vpop.f32.mrb[110].mxu0 }
 0x1c5   : > { %1370 = vst [vmem:[%s2051_s13 + $0x628] sm:$0x1] %v1169_v11  ;;  %v1603_v12 = vpop.f32.mrb[111].mxu0 }
 0x1c6 PF: > { %s12_s9 = sadd.s32 1, %s1694_s9  }
 0x1c7   : > { %p9_p4 = scmp.ge.s32.totalorder %s12_s9, 4  }
 0x1c9   :  { %11 = sbr.rel (!%p9_p4) target bundleno = 1 (0x1), region = 58 }

// kernel: vae_decoder_forward.7
= control target key start
LH: loop header
LB: loop body
LE: loop exit
PB: predicated region body
PF: predicated region fallthrough
CT: control target
= control target key end

     0   :  { %s1903_s9 = smov 0   ;;  %s2391_s0 = inlined_call_operand.vmem [shape: bf16[2,900,32], index: 0, kind: input, shape index: {}]   ;;  %s2392_s1 = inlined_call_operand.vmem [shape: bf16[32,108], index: 1, kind: input, shape index: {}]   ;;  %s2393_s2 = inlined_call_operand.vmem [shape: f32[2,900,108], index: 2, kind: output, shape index: {}]  }
   0x1 LB: > { %s1387_s10 = sadd.s32 4294967295, %s1884_s9   ;;  %p1391_p0 = scmp.ge.s32.totalorder %s1884_s9, 1  ;;  %s1884_s9 = sphi %s1903_s9, %s12_s9  }
   0x2   : > { %p112_p1 = scmp.lt.s32.totalorder %s1884_s9, 3 }
   0x4   : > { %p113_p2 = pnand %p1391_p0, %p112_p1 }
   0x5   : > { %v1819_v0 = vld [vmem:[%s2392_s1] sm:$0xff] (!%p113_p2)   ;;  %v1886_v1 = vmov (!%p113_p2), 0.0   ;;  %v1820_v2 = vld [vmem:[%s2392_s1 + $0x8] sm:$0xff] (!%p113_p2)   ;;  %p134_p3 = scmp.lt.s32.totalorder (!%p113_p2), %s1387_s10, 1  ;;  %vm1887_vm0 = vmmov (!%p113_p2), 0   ;;  %vm557_vm1 = vcmask (!%p113_p2), 261120  }
   0x6   : > { %116 = sbr.rel (%p113_p2) target bundleno = 457 (0x1c9), region = 28  ;;  %1571 = vmatprep.subr.bf16.mxu0 (!%p113_p2), %v1886_v1  ;;  %1803 = vmatprep.subr.bf16.mxu1 (!%p113_p2), %v1886_v1  ;;  %vm1217_vm2 = vcmask (!%p113_p2), 883712   ;;  %vm1330_vm3 = vcmask (!%p113_p2), 879616  }
   0x7   : > { %1572 = vmatpush3.bf16.msra.mxu0 (!%p113_p2), %v1819_v0  ;;  %1805 = vmatpush3.bf16.msra.mxu1 (!%p113_p2), %v1819_v0 }
   0x8   : > { %1573 = vmatprep.subr.bf16.mxu0 (!%p113_p2), %v1886_v1  ;;  %1575 = vmatprep.mubr.msk.bf16.mxu0 (!%p113_p2), %vm1887_vm0, %v1886_v1 }
   0x9   : > { %1804 = vmatprep.subr.bf16.mxu1 (!%p113_p2), %v1886_v1  ;;  %1691 = vmatprep.mubr.msk.bf16.mxu1 (!%p113_p2), %vm1887_vm0, %v1886_v1 }
   0xb   : > { %1574 = vmatpush3.bf16.msra.mxu0 (!%p113_p2), %v1820_v2  ;;  %1806 = vmatpush3.bf16.msra.mxu1 (!%p113_p2), %v1820_v2 }
   0xd   : > { %s2395_s10 = smov (!%p134_p3, %s1387_s10), 1 }
   0xe   : > { %s1807_s15 = smul.u32 452, %s2395_s10 }
   0xf   : > { %s1808_s19 = smul.u32 904, %s2395_s10 }
  0x10   : > { %s1931_s18 = scalar_lea.vmem %s2391_s0, %s1807_s15 }
  0x11   : > { %v1821_v3 = vld [vmem:[%s1931_s18] sm:$0xff]   ;;  %v1822_v4 = vld [vmem:[%s1931_s18 + $0xe8] sm:$0xff]   ;;  %v1824_v6 = vld [vmem:[%s1931_s18 + $0xf0] sm:$0xff]   ;;  %s2148_s22 = scalar_lea.vmem %s2393_s2, %s1808_s19 }
  0x12   : > { %1576 = vmatmul.mubr.msk.bf16.vlgmr.msra.gmra.mrb[0].mxu0 %vm557_vm1, %v1821_v3  ;;  %1692 = vmatmul.mubr.msk.bf16.vlgmr.msra.gmra.mrb[0].mxu1 %vm557_vm1, %v1822_v4  ;;  %v1823_v5 = vld [vmem:[%s1931_s18 + $0x8] sm:$0xff]   ;;  %v1825_v7 = vld [vmem:[%s1931_s18 + $0x10] sm:$0xff]   ;;  %v1826_v8 = vld [vmem:[%s1931_s18 + $0xf8] sm:$0xff]  }
  0x13   : > { %1579 = vmatprep.mubr.msk.bf16.mxu0 %vm1887_vm0, %v1886_v1  ;;  %1695 = vmatprep.mubr.msk.bf16.mxu1 %vm1887_vm0, %v1886_v1  ;;  %v1827_v9 = vld [vmem:[%s1931_s18 + $0x18] sm:$0xff]   ;;  %v1828_v10 = vld [vmem:[%s1931_s18 + $0x100] sm:$0xff]   ;;  %v1830_v12 = vld [vmem:[%s1931_s18 + $0x108] sm:$0xff]  }
  0x14   : > { %v1829_v11 = vld [vmem:[%s1931_s18 + $0x20] sm:$0xff]   ;;  %v1831_v13 = vld [vmem:[%s1931_s18 + $0x28] sm:$0xff]   ;;  %v1832_v14 = vld [vmem:[%s1931_s18 + $0x110] sm:$0xff]  }
  0x15   : > { %v1833_v15 = vld [vmem:[%s1931_s18 + $0x30] sm:$0xff]   ;;  %v1834_v16 = vld [vmem:[%s1931_s18 + $0x118] sm:$0xff]   ;;  %v1836_v18 = vld [vmem:[%s1931_s18 + $0x120] sm:$0xff]  }
  0x16   : > { %v1835_v17 = vld [vmem:[%s1931_s18 + $0x38] sm:$0xff]   ;;  %v1837_v19 = vld [vmem:[%s1931_s18 + $0x40] sm:$0xff]   ;;  %v1838_v20 = vld [vmem:[%s1931_s18 + $0x128] sm:$0xff]  }
  0x17   : > { %v1839_v21 = vld [vmem:[%s1931_s18 + $0x48] sm:$0xff]   ;;  %v1840_v22 = vld [vmem:[%s1931_s18 + $0x130] sm:$0xff]   ;;  %v1842_v24 = vld [vmem:[%s1931_s18 + $0x138] sm:$0xff]  }
  0x18   : > { %v1841_v23 = vld [vmem:[%s1931_s18 + $0x50] sm:$0xff]   ;;  %v1843_v25 = vld [vmem:[%s1931_s18 + $0x58] sm:$0xff]   ;;  %v1844_v26 = vld [vmem:[%s1931_s18 + $0x140] sm:$0xff]  }
  0x19   : > { %v1845_v27 = vld [vmem:[%s1931_s18 + $0x60] sm:$0xff]   ;;  %v1846_v28 = vld [vmem:[%s1931_s18 + $0x148] sm:$0xff]   ;;  %v1848_v30 = vld [vmem:[%s1931_s18 + $0x150] sm:$0xff]  }
  0x1a   : > { %1580 = vmatmul.mubr.msk.bf16.gmra.mrb[4].mxu0 %vm557_vm1, %v1823_v5  ;;  %1696 = vmatmul.mubr.msk.bf16.gmra.mrb[4].mxu1 %vm557_vm1, %v1824_v6  ;;  %v1847_v29 = vld [vmem:[%s1931_s18 + $0x68] sm:$0xff]   ;;  %v1849_v31 = vld [vmem:[%s1931_s18 + $0x70] sm:$0xff]   ;;  %v1850_v32 = vld [vmem:[%s1931_s18 + $0x158] sm:$0xff]  }
  0x1b   : > { %1583 = vmatprep.mubr.msk.bf16.mxu0 %vm1887_vm0, %v1886_v1  ;;  %1699 = vmatprep.mubr.msk.bf16.mxu1 %vm1887_vm0, %v1886_v1  ;;  %v1851_v33 = vld [vmem:[%s1931_s18 + $0x78] sm:$0xff]   ;;  %v1852_v34 = vld [vmem:[%s1931_s18 + $0x160] sm:$0xff]   ;;  %v1854_v36 = vld [vmem:[%s1931_s18 + $0x168] sm:$0xff]  }
  0x1c   : > { %v1853_v35 = vld [vmem:[%s1931_s18 + $0x80] sm:$0xff]   ;;  %v1855_v37 = vld [vmem:[%s1931_s18 + $0x88] sm:$0xff]   ;;  %v1856_v38 = vld [vmem:[%s1931_s18 + $0x170] sm:$0xff]  }
  0x1d   : > { %v1857_v39 = vld [vmem:[%s1931_s18 + $0x90] sm:$0xff]   ;;  %v1858_v40 = vld [vmem:[%s1931_s18 + $0x178] sm:$0xff]   ;;  %v1860_v42 = vld [vmem:[%s1931_s18 + $0x180] sm:$0xff]  }
  0x1e   : > { %v1859_v41 = vld [vmem:[%s1931_s18 + $0x98] sm:$0xff]   ;;  %v1861_v43 = vld [vmem:[%s1931_s18 + $0xa0] sm:$0xff]   ;;  %v1862_v44 = vld [vmem:[%s1931_s18 + $0x188] sm:$0xff]  }
  0x1f   : > { %v1863_v45 = vld [vmem:[%s1931_s18 + $0xa8] sm:$0xff]   ;;  %v1864_v46 = vld [vmem:[%s1931_s18 + $0x190] sm:$0xff]   ;;  %v1866_v48 = vld [vmem:[%s1931_s18 + $0x198] sm:$0xff]  }
  0x20   : > { %v1865_v47 = vld [vmem:[%s1931_s18 + $0xb0] sm:$0xff]   ;;  %v1867_v49 = vld [vmem:[%s1931_s18 + $0xb8] sm:$0xff]   ;;  %v1868_v50 = vld [vmem:[%s1931_s18 + $0x1a0] sm:$0xff]  }
  0x21   : > { %v1869_v51 = vld [vmem:[%s1931_s18 + $0xc0] sm:$0xff]   ;;  %v1870_v52 = vld [vmem:[%s1931_s18 + $0x1a8] sm:$0xff]   ;;  %v1872_v54 = vld [vmem:[%s1931_s18 + $0x1b0] sm:$0xff]  }
  0x22   : > { %1584 = vmatmul.mubr.msk.bf16.gmra.mrb[8].mxu0 %vm557_vm1, %v1825_v7  ;;  %1700 = vmatmul.mubr.msk.bf16.gmra.mrb[8].mxu1 %vm557_vm1, %v1826_v8  ;;  %v1871_v53 = vld [vmem:[%s1931_s18 + $0xc8] sm:$0xff]   ;;  %v1873_v55 = vld [vmem:[%s1931_s18 + $0xd0] sm:$0xff]   ;;  %v1874_v56 = vld [vmem:[%s1931_s18 + $0x1b8] sm:$0xff]  }
  0x23   : > { %1587 = vmatprep.mubr.msk.bf16.mxu0 %vm1887_vm0, %v1886_v1  ;;  %1703 = vmatprep.mubr.msk.bf16.mxu1 %vm1887_vm0, %v1886_v1  ;;  %v1875_v59 = vld [vmem:[%s1931_s18 + $0xd8] sm:$0xff]   ;;  %v1876_v63 = vld [vmem:[%s1931_s18 + $0x1c0] ss:$0 sps:$4 sm:$0x33]  }
  0x24   : > { %v1877_v6 = vld [vmem:[%s1931_s18 + $0xe0] sm:$0xff]  }
  0x2a   : > { %1588 = vmatmul.mubr.msk.bf16.gmra.mrb[12].mxu0 %vm557_vm1, %v1827_v9  ;;  %1704 = vmatmul.mubr.msk.bf16.gmra.mrb[12].mxu1 %vm557_vm1, %v1828_v10 }
  0x2b   : > { %1591 = vmatprep.mubr.msk.bf16.mxu0 %vm1887_vm0, %v1886_v1  ;;  %1707 = vmatprep.mubr.msk.bf16.mxu1 %vm1887_vm0, %v1886_v1 }
  0x32   : > { %1592 = vmatmul.mubr.msk.bf16.gmra.mrb[16].mxu0 %vm557_vm1, %v1829_v11  ;;  %1708 = vmatmul.mubr.msk.bf16.gmra.mrb[16].mxu1 %vm557_vm1, %v1830_v12 }
  0x33   : > { %1595 = vmatprep.mubr.msk.bf16.mxu0 %vm1887_vm0, %v1886_v1  ;;  %1711 = vmatprep.mubr.msk.bf16.mxu1 %vm1887_vm0, %v1886_v1 }
  0x3a   : > { %1596 = vmatmul.mubr.msk.bf16.gmra.mrb[20].mxu0 %vm557_vm1, %v1831_v13  ;;  %1712 = vmatmul.mubr.msk.bf16.gmra.mrb[20].mxu1 %vm557_vm1, %v1832_v14 }
  0x3b   : > { %1599 = vmatprep.mubr.msk.bf16.mxu0 %vm1887_vm0, %v1886_v1  ;;  %1715 = vmatprep.mubr.msk.bf16.mxu1 %vm1887_vm0, %v1886_v1 }
  0x42   : > { %1600 = vmatmul.mubr.msk.bf16.gmra.mrb[24].mxu0 %vm557_vm1, %v1833_v15  ;;  %1716 = vmatmul.mubr.msk.bf16.gmra.mrb[24].mxu1 %vm557_vm1, %v1834_v16 }
  0x43   : > { %1603 = vmatprep.mubr.msk.bf16.mxu0 %vm1887_vm0, %v1886_v1  ;;  %1719 = vmatprep.mubr.msk.bf16.mxu1 %vm1887_vm0, %v1886_v1 }
  0x4a   : > { %1604 = vmatmul.mubr.msk.bf16.gmra.mrb[28].mxu0 %vm557_vm1, %v1835_v17  ;;  %1720 = vmatmul.mubr.msk.bf16.gmra.mrb[28].mxu1 %vm557_vm1, %v1836_v18 }
  0x4b   : > { %1607 = vmatprep.mubr.msk.bf16.mxu0 %vm1887_vm0, %v1886_v1  ;;  %1723 = vmatprep.mubr.msk.bf16.mxu1 %vm1887_vm0, %v1886_v1 }
  0x52   : > { %1608 = vmatmul.mubr.msk.bf16.gmra.mrb[32].mxu0 %vm557_vm1, %v1837_v19  ;;  %1724 = vmatmul.mubr.msk.bf16.gmra.mrb[32].mxu1 %vm557_vm1, %v1838_v20 }
  0x53   : > { %1611 = vmatprep.mubr.msk.bf16.mxu0 %vm1887_vm0, %v1886_v1  ;;  %1727 = vmatprep.mubr.msk.bf16.mxu1 %vm1887_vm0, %v1886_v1 }
  0x5a   : > { %1612 = vmatmul.mubr.msk.bf16.gmra.mrb[36].mxu0 %vm557_vm1, %v1839_v21  ;;  %1728 = vmatmul.mubr.msk.bf16.gmra.mrb[36].mxu1 %vm557_vm1, %v1840_v22 }
  0x5b   : > { %1615 = vmatprep.mubr.msk.bf16.mxu0 %vm1887_vm0, %v1886_v1  ;;  %1731 = vmatprep.mubr.msk.bf16.mxu1 %vm1887_vm0, %v1886_v1 }
  0x62   : > { %1616 = vmatmul.mubr.msk.bf16.gmra.mrb[40].mxu0 %vm557_vm1, %v1841_v23  ;;  %1732 = vmatmul.mubr.msk.bf16.gmra.mrb[40].mxu1 %vm557_vm1, %v1842_v24 }
  0x63   : > { %1619 = vmatprep.mubr.msk.bf16.mxu0 %vm1887_vm0, %v1886_v1  ;;  %1735 = vmatprep.mubr.msk.bf16.mxu1 %vm1887_vm0, %v1886_v1 }
  0x6a   : > { %1620 = vmatmul.mubr.msk.bf16.gmra.mrb[44].mxu0 %vm557_vm1, %v1843_v25  ;;  %1736 = vmatmul.mubr.msk.bf16.gmra.mrb[44].mxu1 %vm557_vm1, %v1844_v26 }
  0x6b   : > { %1623 = vmatprep.mubr.msk.bf16.mxu0 %vm1887_vm0, %v1886_v1  ;;  %1739 = vmatprep.mubr.msk.bf16.mxu1 %vm1887_vm0, %v1886_v1 }
  0x72   : > { %1624 = vmatmul.mubr.msk.bf16.gmra.mrb[48].mxu0 %vm557_vm1, %v1845_v27  ;;  %1740 = vmatmul.mubr.msk.bf16.gmra.mrb[48].mxu1 %vm557_vm1, %v1846_v28 }
  0x73   : > { %1627 = vmatprep.mubr.msk.bf16.mxu0 %vm1887_vm0, %v1886_v1  ;;  %1743 = vmatprep.mubr.msk.bf16.mxu1 %vm1887_vm0, %v1886_v1 }
  0x7a   : > { %1628 = vmatmul.mubr.msk.bf16.gmra.mrb[52].mxu0 %vm557_vm1, %v1847_v29  ;;  %1744 = vmatmul.mubr.msk.bf16.gmra.mrb[52].mxu1 %vm557_vm1, %v1848_v30 }
  0x7b   : > { %1631 = vmatprep.mubr.msk.bf16.mxu0 %vm1887_vm0, %v1886_v1  ;;  %1747 = vmatprep.mubr.msk.bf16.mxu1 %vm1887_vm0, %v1886_v1 }
  0x82   : > { %1632 = vmatmul.mubr.msk.bf16.gmra.mrb[56].mxu0 %vm557_vm1, %v1849_v31  ;;  %1748 = vmatmul.mubr.msk.bf16.gmra.mrb[56].mxu1 %vm557_vm1, %v1850_v32 }
  0x83   : > { %1635 = vmatprep.mubr.msk.bf16.mxu0 %vm1887_vm0, %v1886_v1  ;;  %1751 = vmatprep.mubr.msk.bf16.mxu1 %vm1887_vm0, %v1886_v1 }
  0x8a   : > { %1636 = vmatmul.mubr.msk.bf16.gmra.mrb[60].mxu0 %vm557_vm1, %v1851_v33  ;;  %1752 = vmatmul.mubr.msk.bf16.gmra.mrb[60].mxu1 %vm557_vm1, %v1852_v34 }
  0x8b   : > { %1639 = vmatprep.mubr.msk.bf16.mxu0 %vm1887_vm0, %v1886_v1  ;;  %1755 = vmatprep.mubr.msk.bf16.mxu1 %vm1887_vm0, %v1886_v1 }
  0x92   : > { %1640 = vmatmul.mubr.msk.bf16.gmra.mrb[64].mxu0 %vm557_vm1, %v1853_v35  ;;  %1756 = vmatmul.mubr.msk.bf16.gmra.mrb[64].mxu1 %vm557_vm1, %v1854_v36 }
  0x93   : > { %1643 = vmatprep.mubr.msk.bf16.mxu0 %vm1887_vm0, %v1886_v1  ;;  %1759 = vmatprep.mubr.msk.bf16.mxu1 %vm1887_vm0, %v1886_v1 }
  0x9a   : > { %1644 = vmatmul.mubr.msk.bf16.gmra.mrb[68].mxu0 %vm557_vm1, %v1855_v37  ;;  %1760 = vmatmul.mubr.msk.bf16.gmra.mrb[68].mxu1 %vm557_vm1, %v1856_v38 }
  0x9b   : > { %1647 = vmatprep.mubr.msk.bf16.mxu0 %vm1887_vm0, %v1886_v1  ;;  %1763 = vmatprep.mubr.msk.bf16.mxu1 %vm1887_vm0, %v1886_v1 }
  0xa2   : > { %1648 = vmatmul.mubr.msk.bf16.gmra.mrb[72].mxu0 %vm557_vm1, %v1857_v39  ;;  %1764 = vmatmul.mubr.msk.bf16.gmra.mrb[72].mxu1 %vm557_vm1, %v1858_v40 }
  0xa3   : > { %1651 = vmatprep.mubr.msk.bf16.mxu0 %vm1887_vm0, %v1886_v1  ;;  %1767 = vmatprep.mubr.msk.bf16.mxu1 %vm1887_vm0, %v1886_v1 }
  0xaa   : > { %1652 = vmatmul.mubr.msk.bf16.gmra.mrb[76].mxu0 %vm557_vm1, %v1859_v41  ;;  %1768 = vmatmul.mubr.msk.bf16.gmra.mrb[76].mxu1 %vm557_vm1, %v1860_v42 }
  0xab   : > { %1655 = vmatprep.mubr.msk.bf16.mxu0 %vm1887_vm0, %v1886_v1  ;;  %1771 = vmatprep.mubr.msk.bf16.mxu1 %vm1887_vm0, %v1886_v1 }
  0xb2   : > { %1656 = vmatmul.mubr.msk.bf16.gmra.mrb[80].mxu0 %vm557_vm1, %v1861_v43  ;;  %1772 = vmatmul.mubr.msk.bf16.gmra.mrb[80].mxu1 %vm557_vm1, %v1862_v44 }
  0xb3   : > { %1659 = vmatprep.mubr.msk.bf16.mxu0 %vm1887_vm0, %v1886_v1  ;;  %1775 = vmatprep.mubr.msk.bf16.mxu1 %vm1887_vm0, %v1886_v1 }
  0xba   : > { %1660 = vmatmul.mubr.msk.bf16.gmra.mrb[84].mxu0 %vm557_vm1, %v1863_v45  ;;  %1776 = vmatmul.mubr.msk.bf16.gmra.mrb[84].mxu1 %vm557_vm1, %v1864_v46 }
  0xbb   : > { %1663 = vmatprep.mubr.msk.bf16.mxu0 %vm1887_vm0, %v1886_v1  ;;  %1779 = vmatprep.mubr.msk.bf16.mxu1 %vm1887_vm0, %v1886_v1 }
  0xc2   : > { %1664 = vmatmul.mubr.msk.bf16.gmra.mrb[88].mxu0 %vm557_vm1, %v1865_v47  ;;  %1780 = vmatmul.mubr.msk.bf16.gmra.mrb[88].mxu1 %vm557_vm1, %v1866_v48 }
  0xc3   : > { %1667 = vmatprep.mubr.msk.bf16.mxu0 %vm1887_vm0, %v1886_v1  ;;  %1783 = vmatprep.mubr.msk.bf16.mxu1 %vm1887_vm0, %v1886_v1 }
  0xca   : > { %1668 = vmatmul.mubr.msk.bf16.gmra.mrb[92].mxu0 %vm557_vm1, %v1867_v49  ;;  %1784 = vmatmul.mubr.msk.bf16.gmra.mrb[92].mxu1 %vm557_vm1, %v1868_v50 }
  0xcb   : > { %1671 = vmatprep.mubr.msk.bf16.mxu0 %vm1887_vm0, %v1886_v1  ;;  %1787 = vmatprep.mubr.msk.bf16.mxu1 %vm1887_vm0, %v1886_v1 }
  0xd2   : > { %1672 = vmatmul.mubr.msk.bf16.gmra.mrb[96].mxu0 %vm557_vm1, %v1869_v51  ;;  %1788 = vmatmul.mubr.msk.bf16.gmra.mrb[96].mxu1 %vm557_vm1, %v1870_v52 }
  0xd3   : > { %1675 = vmatprep.mubr.msk.bf16.mxu0 %vm1887_vm0, %v1886_v1  ;;  %1791 = vmatprep.mubr.msk.bf16.mxu1 %vm1887_vm0, %v1886_v1 }
  0xda   : > { %1676 = vmatmul.mubr.msk.bf16.gmra.mrb[100].mxu0 %vm557_vm1, %v1871_v53  ;;  %1792 = vmatmul.mubr.msk.bf16.gmra.mrb[100].mxu1 %vm557_vm1, %v1872_v54 }
  0xdb   : > { %1679 = vmatprep.mubr.msk.bf16.mxu0 %vm1887_vm0, %v1886_v1  ;;  %1795 = vmatprep.mubr.msk.bf16.mxu1 %vm1887_vm0, %v1886_v1 }
  0xe2   : > { %1680 = vmatmul.mubr.msk.bf16.gmra.mrb[104].mxu0 %vm557_vm1, %v1873_v55  ;;  %1796 = vmatmul.mubr.msk.bf16.gmra.mrb[104].mxu1 %vm557_vm1, %v1874_v56 }
  0xe3   : > { %1683 = vmatprep.mubr.msk.bf16.mxu0 %vm1887_vm0, %v1886_v1  ;;  %1799 = vmatprep.mubr.msk.bf16.mxu1 %vm1887_vm0, %v1886_v1 }
  0xe5   : > { %v763_v57 = vpop.f32.mrb[0].mxu0  ;;  %v995_v60 = vpop.f32.mrb[0].mxu1 }
  0xe6   : > { %1218 = vst.msk [vmem:[%s2148_s22] sm:$0xff] %vm1217_vm2, %v763_v57  ;;  %v1577_v58 = vpop.f32.mrb[1].mxu0  ;;  %1276 = vst.msk [vmem:[%s2148_s22 + $0x1d0] sm:$0xff] %vm1217_vm2, %v995_v60  ;;  %v1693_v62 = vpop.f32.mrb[1].mxu1 }
  0xe7   : > { %v766_v61 = vpop.f32.mrb[2].mxu0  ;;  %v998_v2 = vpop.f32.mrb[2].mxu1 }
  0xe8   : > { %1219 = vst.msk [vmem:[%s2148_s22 + $0x8] sm:$0xff] %vm1217_vm2, %v766_v61  ;;  %v1578_v0 = vpop.f32.mrb[3].mxu0  ;;  %1277 = vst.msk [vmem:[%s2148_s22 + $0x1d8] sm:$0xff] %vm1217_vm2, %v998_v2  ;;  %v1694_v3 = vpop.f32.mrb[3].mxu1 }
  0xea   : > { %1684 = vmatmul.mubr.msk.bf16.gmra.mrb[108].mxu0 %vm557_vm1, %v1875_v59  ;;  %1800 = vmatmul.mubr.msk.bf16.gmra.mrb[108].mxu1 %vm557_vm1, %v1876_v63 }
  0xeb   : > { %1687 = vmatprep.mubr.msk.bf16.mxu0 %vm1887_vm0, %v1886_v1 }
  0xed   : > { %v771_v4 = vpop.f32.mrb[4].mxu0  ;;  %v1003_v7 = vpop.f32.mrb[4].mxu1 }
  0xee   : > { %1220 = vst.msk [vmem:[%s2148_s22 + $0x10] sm:$0xff] %vm1217_vm2, %v771_v4  ;;  %v1581_v5 = vpop.f32.mrb[5].mxu0  ;;  %1278 = vst.msk [vmem:[%s2148_s22 + $0x1e0] sm:$0xff] %vm1217_vm2, %v1003_v7  ;;  %v1697_v9 = vpop.f32.mrb[5].mxu1 }
  0xef   : > { %v774_v8 = vpop.f32.mrb[6].mxu0  ;;  %v1006_v11 = vpop.f32.mrb[6].mxu1 }
  0xf0   : > { %1221 = vst.msk [vmem:[%s2148_s22 + $0x18] sm:$0xff] %vm1217_vm2, %v774_v8  ;;  %v1582_v10 = vpop.f32.mrb[7].mxu0  ;;  %1279 = vst.msk [vmem:[%s2148_s22 + $0x1e8] sm:$0xff] %vm1217_vm2, %v1006_v11  ;;  %v1698_v1 = vpop.f32.mrb[7].mxu1 }
  0xf2   : > { %1688 = vmatmul.mubr.msk.bf16.gmra.mrb[112].mxu0 %vm557_vm1, %v1877_v6 }
  0xf5   : > { %v779_v12 = vpop.f32.mrb[8].mxu0  ;;  %v1011_v14 = vpop.f32.mrb[8].mxu1 }
  0xf6   : > { %1222 = vst.msk [vmem:[%s2148_s22 + $0x20] sm:$0xff] %vm1217_vm2, %v779_v12  ;;  %v1585_v13 = vpop.f32.mrb[9].mxu0  ;;  %1280 = vst.msk [vmem:[%s2148_s22 + $0x1f0] sm:$0xff] %vm1217_vm2, %v1011_v14  ;;  %v1701_v16 = vpop.f32.mrb[9].mxu1 }
  0xf7   : > { %v782_v15 = vpop.f32.mrb[10].mxu0  ;;  %v1014_v18 = vpop.f32.mrb[10].mxu1 }
  0xf8   : > { %1223 = vst.msk [vmem:[%s2148_s22 + $0x28] sm:$0xff] %vm1217_vm2, %v782_v15  ;;  %v1586_v17 = vpop.f32.mrb[11].mxu0  ;;  %1281 = vst.msk [vmem:[%s2148_s22 + $0x1f8] sm:$0xff] %vm1217_vm2, %v1014_v18  ;;  %v1702_v19 = vpop.f32.mrb[11].mxu1 }
  0xfd   : > { %v787_v20 = vpop.f32.mrb[12].mxu0  ;;  %v1019_v22 = vpop.f32.mrb[12].mxu1 }
  0xfe   : > { %1224 = vst.msk [vmem:[%s2148_s22 + $0x30] sm:$0xff] %vm1217_vm2, %v787_v20  ;;  %v1589_v21 = vpop.f32.mrb[13].mxu0  ;;  %1282 = vst.msk [vmem:[%s2148_s22 + $0x200] sm:$0xff] %vm1217_vm2, %v1019_v22  ;;  %v1705_v24 = vpop.f32.mrb[13].mxu1 }
  0xff   : > { %v790_v23 = vpop.f32.mrb[14].mxu0  ;;  %v1022_v26 = vpop.f32.mrb[14].mxu1 }
 0x100   : > { %1225 = vst.msk [vmem:[%s2148_s22 + $0x38] sm:$0xff] %vm1217_vm2, %v790_v23  ;;  %v1590_v25 = vpop.f32.mrb[15].mxu0  ;;  %1283 = vst.msk [vmem:[%s2148_s22 + $0x208] sm:$0xff] %vm1217_vm2, %v1022_v26  ;;  %v1706_v27 = vpop.f32.mrb[15].mxu1 }
 0x105   : > { %v795_v28 = vpop.f32.mrb[16].mxu0  ;;  %v1027_v30 = vpop.f32.mrb[16].mxu1 }
 0x106   : > { %1226 = vst.msk [vmem:[%s2148_s22 + $0x40] sm:$0xff] %vm1217_vm2, %v795_v28  ;;  %v1593_v29 = vpop.f32.mrb[17].mxu0  ;;  %1284 = vst.msk [vmem:[%s2148_s22 + $0x210] sm:$0xff] %vm1217_vm2, %v1027_v30  ;;  %v1709_v32 = vpop.f32.mrb[17].mxu1 }
 0x107   : > { %v798_v31 = vpop.f32.mrb[18].mxu0  ;;  %v1030_v34 = vpop.f32.mrb[18].mxu1 }
 0x108   : > { %1227 = vst.msk [vmem:[%s2148_s22 + $0x48] sm:$0xff] %vm1217_vm2, %v798_v31  ;;  %v1594_v33 = vpop.f32.mrb[19].mxu0  ;;  %1285 = vst.msk [vmem:[%s2148_s22 + $0x218] sm:$0xff] %vm1217_vm2, %v1030_v34  ;;  %v1710_v35 = vpop.f32.mrb[19].mxu1 }
 0x10d   : > { %v803_v36 = vpop.f32.mrb[20].mxu0  ;;  %v1035_v38 = vpop.f32.mrb[20].mxu1 }
 0x10e   : > { %1228 = vst.msk [vmem:[%s2148_s22 + $0x50] sm:$0xff] %vm1217_vm2, %v803_v36  ;;  %v1597_v37 = vpop.f32.mrb[21].mxu0  ;;  %1286 = vst.msk [vmem:[%s2148_s22 + $0x220] sm:$0xff] %vm1217_vm2, %v1035_v38  ;;  %v1713_v40 = vpop.f32.mrb[21].mxu1 }
 0x10f   : > { %v806_v39 = vpop.f32.mrb[22].mxu0  ;;  %v1038_v42 = vpop.f32.mrb[22].mxu1 }
 0x110   : > { %1229 = vst.msk [vmem:[%s2148_s22 + $0x58] sm:$0xff] %vm1217_vm2, %v806_v39  ;;  %v1598_v41 = vpop.f32.mrb[23].mxu0  ;;  %1287 = vst.msk [vmem:[%s2148_s22 + $0x228] sm:$0xff] %vm1217_vm2, %v1038_v42  ;;  %v1714_v43 = vpop.f32.mrb[23].mxu1 }
 0x115   : > { %v811_v44 = vpop.f32.mrb[24].mxu0  ;;  %v1043_v46 = vpop.f32.mrb[24].mxu1 }
 0x116   : > { %1230 = vst.msk [vmem:[%s2148_s22 + $0x60] sm:$0xff] %vm1217_vm2, %v811_v44  ;;  %v1601_v45 = vpop.f32.mrb[25].mxu0  ;;  %1288 = vst.msk [vmem:[%s2148_s22 + $0x230] sm:$0xff] %vm1217_vm2, %v1043_v46  ;;  %v1717_v48 = vpop.f32.mrb[25].mxu1 }
 0x117   : > { %v814_v47 = vpop.f32.mrb[26].mxu0  ;;  %v1046_v50 = vpop.f32.mrb[26].mxu1 }
 0x118   : > { %1231 = vst.msk [vmem:[%s2148_s22 + $0x68] sm:$0xff] %vm1217_vm2, %v814_v47  ;;  %v1602_v49 = vpop.f32.mrb[27].mxu0  ;;  %1289 = vst.msk [vmem:[%s2148_s22 + $0x238] sm:$0xff] %vm1217_vm2, %v1046_v50  ;;  %v1718_v51 = vpop.f32.mrb[27].mxu1 }
 0x11d   : > { %v819_v52 = vpop.f32.mrb[28].mxu0  ;;  %v1051_v54 = vpop.f32.mrb[28].mxu1 }
 0x11e   : > { %1232 = vst.msk [vmem:[%s2148_s22 + $0x70] sm:$0xff] %vm1217_vm2, %v819_v52  ;;  %v1605_v53 = vpop.f32.mrb[29].mxu0  ;;  %1290 = vst.msk [vmem:[%s2148_s22 + $0x240] sm:$0xff] %vm1217_vm2, %v1051_v54  ;;  %v1721_v56 = vpop.f32.mrb[29].mxu1 }
 0x11f   : > { %v822_v55 = vpop.f32.mrb[30].mxu0  ;;  %v1054_v58 = vpop.f32.mrb[30].mxu1 }
 0x120   : > { %1233 = vst.msk [vmem:[%s2148_s22 + $0x78] sm:$0xff] %vm1217_vm2, %v822_v55  ;;  %v1606_v57 = vpop.f32.mrb[31].mxu0  ;;  %1291 = vst.msk [vmem:[%s2148_s22 + $0x248] sm:$0xff] %vm1217_vm2, %v1054_v58  ;;  %v1722_v59 = vpop.f32.mrb[31].mxu1 }
 0x125   : > { %v827_v60 = vpop.f32.mrb[32].mxu0  ;;  %v1059_v62 = vpop.f32.mrb[32].mxu1 }
 0x126   : > { %1234 = vst.msk [vmem:[%s2148_s22 + $0x80] sm:$0xff] %vm1217_vm2, %v827_v60  ;;  %v1609_v61 = vpop.f32.mrb[33].mxu0  ;;  %1292 = vst.msk [vmem:[%s2148_s22 + $0x250] sm:$0xff] %vm1217_vm2, %v1059_v62  ;;  %v1725_v0 = vpop.f32.mrb[33].mxu1 }
 0x127   : > { %v830_v63 = vpop.f32.mrb[34].mxu0  ;;  %v1062_v3 = vpop.f32.mrb[34].mxu1 }
 0x128   : > { %1235 = vst.msk [vmem:[%s2148_s22 + $0x88] sm:$0xff] %vm1217_vm2, %v830_v63  ;;  %v1610_v2 = vpop.f32.mrb[35].mxu0  ;;  %1293 = vst.msk [vmem:[%s2148_s22 + $0x258] sm:$0xff] %vm1217_vm2, %v1062_v3  ;;  %v1726_v4 = vpop.f32.mrb[35].mxu1 }
 0x12d   : > { %v835_v5 = vpop.f32.mrb[36].mxu0  ;;  %v1067_v7 = vpop.f32.mrb[36].mxu1 }
 0x12e   : > { %1236 = vst.msk [vmem:[%s2148_s22 + $0x90] sm:$0xff] %vm1217_vm2, %v835_v5  ;;  %v1613_v6 = vpop.f32.mrb[37].mxu0  ;;  %1294 = vst.msk [vmem:[%s2148_s22 + $0x260] sm:$0xff] %vm1217_vm2, %v1067_v7  ;;  %v1729_v9 = vpop.f32.mrb[37].mxu1 }
 0x12f   : > { %v838_v8 = vpop.f32.mrb[38].mxu0  ;;  %v1070_v11 = vpop.f32.mrb[38].mxu1 }
 0x130   : > { %1237 = vst.msk [vmem:[%s2148_s22 + $0x98] sm:$0xff] %vm1217_vm2, %v838_v8  ;;  %v1614_v10 = vpop.f32.mrb[39].mxu0  ;;  %1295 = vst.msk [vmem:[%s2148_s22 + $0x268] sm:$0xff] %vm1217_vm2, %v1070_v11  ;;  %v1730_v1 = vpop.f32.mrb[39].mxu1 }
 0x135   : > { %v843_v12 = vpop.f32.mrb[40].mxu0  ;;  %v1075_v14 = vpop.f32.mrb[40].mxu1 }
 0x136   : > { %1238 = vst.msk [vmem:[%s2148_s22 + $0xa0] sm:$0xff] %vm1217_vm2, %v843_v12  ;;  %v1617_v13 = vpop.f32.mrb[41].mxu0  ;;  %1296 = vst.msk [vmem:[%s2148_s22 + $0x270] sm:$0xff] %vm1217_vm2, %v1075_v14  ;;  %v1733_v16 = vpop.f32.mrb[41].mxu1 }
 0x137   : > { %v846_v15 = vpop.f32.mrb[42].mxu0  ;;  %v1078_v18 = vpop.f32.mrb[42].mxu1 }
 0x138   : > { %1239 = vst.msk [vmem:[%s2148_s22 + $0xa8] sm:$0xff] %vm1217_vm2, %v846_v15  ;;  %v1618_v17 = vpop.f32.mrb[43].mxu0  ;;  %1297 = vst.msk [vmem:[%s2148_s22 + $0x278] sm:$0xff] %vm1217_vm2, %v1078_v18  ;;  %v1734_v19 = vpop.f32.mrb[43].mxu1 }
 0x13d   : > { %v851_v20 = vpop.f32.mrb[44].mxu0  ;;  %v1083_v22 = vpop.f32.mrb[44].mxu1 }
 0x13e   : > { %1240 = vst.msk [vmem:[%s2148_s22 + $0xb0] sm:$0xff] %vm1217_vm2, %v851_v20  ;;  %v1621_v21 = vpop.f32.mrb[45].mxu0  ;;  %1298 = vst.msk [vmem:[%s2148_s22 + $0x280] sm:$0xff] %vm1217_vm2, %v1083_v22  ;;  %v1737_v24 = vpop.f32.mrb[45].mxu1 }
 0x13f   : > { %v854_v23 = vpop.f32.mrb[46].mxu0  ;;  %v1086_v26 = vpop.f32.mrb[46].mxu1 }
 0x140   : > { %1241 = vst.msk [vmem:[%s2148_s22 + $0xb8] sm:$0xff] %vm1217_vm2, %v854_v23  ;;  %v1622_v25 = vpop.f32.mrb[47].mxu0  ;;  %1299 = vst.msk [vmem:[%s2148_s22 + $0x288] sm:$0xff] %vm1217_vm2, %v1086_v26  ;;  %v1738_v27 = vpop.f32.mrb[47].mxu1 }
 0x145   : > { %v859_v28 = vpop.f32.mrb[48].mxu0  ;;  %v1091_v30 = vpop.f32.mrb[48].mxu1 }
 0x146   : > { %1242 = vst.msk [vmem:[%s2148_s22 + $0xc0] sm:$0xff] %vm1217_vm2, %v859_v28  ;;  %v1625_v29 = vpop.f32.mrb[49].mxu0  ;;  %1300 = vst.msk [vmem:[%s2148_s22 + $0x290] sm:$0xff] %vm1217_vm2, %v1091_v30  ;;  %v1741_v32 = vpop.f32.mrb[49].mxu1 }
 0x147   : > { %v862_v31 = vpop.f32.mrb[50].mxu0  ;;  %v1094_v34 = vpop.f32.mrb[50].mxu1 }
 0x148   : > { %1243 = vst.msk [vmem:[%s2148_s22 + $0xc8] sm:$0xff] %vm1217_vm2, %v862_v31  ;;  %v1626_v33 = vpop.f32.mrb[51].mxu0  ;;  %1301 = vst.msk [vmem:[%s2148_s22 + $0x298] sm:$0xff] %vm1217_vm2, %v1094_v34  ;;  %v1742_v35 = vpop.f32.mrb[51].mxu1 }
 0x14d   : > { %v867_v36 = vpop.f32.mrb[52].mxu0  ;;  %v1099_v38 = vpop.f32.mrb[52].mxu1 }
 0x14e   : > { %1244 = vst.msk [vmem:[%s2148_s22 + $0xd0] sm:$0xff] %vm1217_vm2, %v867_v36  ;;  %v1629_v37 = vpop.f32.mrb[53].mxu0  ;;  %1302 = vst.msk [vmem:[%s2148_s22 + $0x2a0] sm:$0xff] %vm1217_vm2, %v1099_v38  ;;  %v1745_v40 = vpop.f32.mrb[53].mxu1 }
 0x14f   : > { %v870_v39 = vpop.f32.mrb[54].mxu0  ;;  %v1102_v42 = vpop.f32.mrb[54].mxu1 }
 0x150   : > { %1245 = vst.msk [vmem:[%s2148_s22 + $0xd8] sm:$0xff] %vm1217_vm2, %v870_v39  ;;  %v1630_v41 = vpop.f32.mrb[55].mxu0  ;;  %1303 = vst.msk [vmem:[%s2148_s22 + $0x2a8] sm:$0xff] %vm1217_vm2, %v1102_v42  ;;  %v1746_v43 = vpop.f32.mrb[55].mxu1 }
 0x155   : > { %v875_v44 = vpop.f32.mrb[56].mxu0  ;;  %v1107_v46 = vpop.f32.mrb[56].mxu1 }
 0x156   : > { %1246 = vst.msk [vmem:[%s2148_s22 + $0xe0] sm:$0xff] %vm1217_vm2, %v875_v44  ;;  %v1633_v45 = vpop.f32.mrb[57].mxu0  ;;  %1304 = vst.msk [vmem:[%s2148_s22 + $0x2b0] sm:$0xff] %vm1217_vm2, %v1107_v46  ;;  %v1749_v48 = vpop.f32.mrb[57].mxu1 }
 0x157   : > { %v878_v47 = vpop.f32.mrb[58].mxu0  ;;  %v1110_v50 = vpop.f32.mrb[58].mxu1 }
 0x158   : > { %1247 = vst.msk [vmem:[%s2148_s22 + $0xe8] sm:$0xff] %vm1217_vm2, %v878_v47  ;;  %v1634_v49 = vpop.f32.mrb[59].mxu0  ;;  %1305 = vst.msk [vmem:[%s2148_s22 + $0x2b8] sm:$0xff] %vm1217_vm2, %v1110_v50  ;;  %v1750_v51 = vpop.f32.mrb[59].mxu1 }
 0x15d   : > { %v883_v52 = vpop.f32.mrb[60].mxu0  ;;  %v1115_v54 = vpop.f32.mrb[60].mxu1 }
 0x15e   : > { %1248 = vst.msk [vmem:[%s2148_s22 + $0xf0] sm:$0xff] %vm1217_vm2, %v883_v52  ;;  %v1637_v53 = vpop.f32.mrb[61].mxu0  ;;  %1306 = vst.msk [vmem:[%s2148_s22 + $0x2c0] sm:$0xff] %vm1217_vm2, %v1115_v54  ;;  %v1753_v56 = vpop.f32.mrb[61].mxu1 }
 0x15f   : > { %v886_v55 = vpop.f32.mrb[62].mxu0  ;;  %v1118_v58 = vpop.f32.mrb[62].mxu1 }
 0x160   : > { %1249 = vst.msk [vmem:[%s2148_s22 + $0xf8] sm:$0xff] %vm1217_vm2, %v886_v55  ;;  %v1638_v57 = vpop.f32.mrb[63].mxu0  ;;  %1307 = vst.msk [vmem:[%s2148_s22 + $0x2c8] sm:$0xff] %vm1217_vm2, %v1118_v58  ;;  %v1754_v59 = vpop.f32.mrb[63].mxu1 }
 0x165   : > { %v891_v60 = vpop.f32.mrb[64].mxu0  ;;  %v1123_v62 = vpop.f32.mrb[64].mxu1 }
 0x166   : > { %1250 = vst.msk [vmem:[%s2148_s22 + $0x100] sm:$0xff] %vm1217_vm2, %v891_v60  ;;  %v1641_v61 = vpop.f32.mrb[65].mxu0  ;;  %1308 = vst.msk [vmem:[%s2148_s22 + $0x2d0] sm:$0xff] %vm1217_vm2, %v1123_v62  ;;  %v1757_v0 = vpop.f32.mrb[65].mxu1 }
 0x167   : > { %v894_v63 = vpop.f32.mrb[66].mxu0  ;;  %v1126_v3 = vpop.f32.mrb[66].mxu1 }
 0x168   : > { %1251 = vst.msk [vmem:[%s2148_s22 + $0x108] sm:$0xff] %vm1217_vm2, %v894_v63  ;;  %v1642_v2 = vpop.f32.mrb[67].mxu0  ;;  %1309 = vst.msk [vmem:[%s2148_s22 + $0x2d8] sm:$0xff] %vm1217_vm2, %v1126_v3  ;;  %v1758_v4 = vpop.f32.mrb[67].mxu1 }
 0x16d   : > { %v899_v5 = vpop.f32.mrb[68].mxu0  ;;  %v1131_v7 = vpop.f32.mrb[68].mxu1 }
 0x16e   : > { %1252 = vst.msk [vmem:[%s2148_s22 + $0x110] sm:$0xff] %vm1217_vm2, %v899_v5  ;;  %v1645_v6 = vpop.f32.mrb[69].mxu0  ;;  %1310 = vst.msk [vmem:[%s2148_s22 + $0x2e0] sm:$0xff] %vm1217_vm2, %v1131_v7  ;;  %v1761_v9 = vpop.f32.mrb[69].mxu1 }
 0x16f   : > { %v902_v8 = vpop.f32.mrb[70].mxu0  ;;  %v1134_v11 = vpop.f32.mrb[70].mxu1 }
 0x170   : > { %1253 = vst.msk [vmem:[%s2148_s22 + $0x118] sm:$0xff] %vm1217_vm2, %v902_v8  ;;  %v1646_v10 = vpop.f32.mrb[71].mxu0  ;;  %1311 = vst.msk [vmem:[%s2148_s22 + $0x2e8] sm:$0xff] %vm1217_vm2, %v1134_v11  ;;  %v1762_v1 = vpop.f32.mrb[71].mxu1 }
 0x175   : > { %v907_v12 = vpop.f32.mrb[72].mxu0  ;;  %v1139_v14 = vpop.f32.mrb[72].mxu1 }
 0x176   : > { %1254 = vst.msk [vmem:[%s2148_s22 + $0x120] sm:$0xff] %vm1217_vm2, %v907_v12  ;;  %v1649_v13 = vpop.f32.mrb[73].mxu0  ;;  %1312 = vst.msk [vmem:[%s2148_s22 + $0x2f0] sm:$0xff] %vm1217_vm2, %v1139_v14  ;;  %v1765_v16 = vpop.f32.mrb[73].mxu1 }
 0x177   : > { %v910_v15 = vpop.f32.mrb[74].mxu0  ;;  %v1142_v18 = vpop.f32.mrb[74].mxu1 }
 0x178   : > { %1255 = vst.msk [vmem:[%s2148_s22 + $0x128] sm:$0xff] %vm1217_vm2, %v910_v15  ;;  %v1650_v17 = vpop.f32.mrb[75].mxu0  ;;  %1313 = vst.msk [vmem:[%s2148_s22 + $0x2f8] sm:$0xff] %vm1217_vm2, %v1142_v18  ;;  %v1766_v19 = vpop.f32.mrb[75].mxu1 }
 0x17d   : > { %v915_v20 = vpop.f32.mrb[76].mxu0  ;;  %v1147_v22 = vpop.f32.mrb[76].mxu1 }
 0x17e   : > { %1256 = vst.msk [vmem:[%s2148_s22 + $0x130] sm:$0xff] %vm1217_vm2, %v915_v20  ;;  %v1653_v21 = vpop.f32.mrb[77].mxu0  ;;  %1314 = vst.msk [vmem:[%s2148_s22 + $0x300] sm:$0xff] %vm1217_vm2, %v1147_v22  ;;  %v1769_v24 = vpop.f32.mrb[77].mxu1 }
 0x17f   : > { %v918_v23 = vpop.f32.mrb[78].mxu0  ;;  %v1150_v26 = vpop.f32.mrb[78].mxu1 }
 0x180   : > { %1257 = vst.msk [vmem:[%s2148_s22 + $0x138] sm:$0xff] %vm1217_vm2, %v918_v23  ;;  %v1654_v25 = vpop.f32.mrb[79].mxu0  ;;  %1315 = vst.msk [vmem:[%s2148_s22 + $0x308] sm:$0xff] %vm1217_vm2, %v1150_v26  ;;  %v1770_v27 = vpop.f32.mrb[79].mxu1 }
 0x185   : > { %v923_v28 = vpop.f32.mrb[80].mxu0  ;;  %v1155_v30 = vpop.f32.mrb[80].mxu1 }
 0x186   : > { %1258 = vst.msk [vmem:[%s2148_s22 + $0x140] sm:$0xff] %vm1217_vm2, %v923_v28  ;;  %v1657_v29 = vpop.f32.mrb[81].mxu0  ;;  %1316 = vst.msk [vmem:[%s2148_s22 + $0x310] sm:$0xff] %vm1217_vm2, %v1155_v30  ;;  %v1773_v32 = vpop.f32.mrb[81].mxu1 }
 0x187   : > { %v926_v31 = vpop.f32.mrb[82].mxu0  ;;  %v1158_v34 = vpop.f32.mrb[82].mxu1 }
 0x188   : > { %1259 = vst.msk [vmem:[%s2148_s22 + $0x148] sm:$0xff] %vm1217_vm2, %v926_v31  ;;  %v1658_v33 = vpop.f32.mrb[83].mxu0  ;;  %1317 = vst.msk [vmem:[%s2148_s22 + $0x318] sm:$0xff] %vm1217_vm2, %v1158_v34  ;;  %v1774_v35 = vpop.f32.mrb[83].mxu1 }
 0x18d   : > { %v931_v36 = vpop.f32.mrb[84].mxu0  ;;  %v1163_v38 = vpop.f32.mrb[84].mxu1 }
 0x18e   : > { %1260 = vst.msk [vmem:[%s2148_s22 + $0x150] sm:$0xff] %vm1217_vm2, %v931_v36  ;;  %v1661_v37 = vpop.f32.mrb[85].mxu0  ;;  %1318 = vst.msk [vmem:[%s2148_s22 + $0x320] sm:$0xff] %vm1217_vm2, %v1163_v38  ;;  %v1777_v40 = vpop.f32.mrb[85].mxu1 }
 0x18f   : > { %v934_v39 = vpop.f32.mrb[86].mxu0  ;;  %v1166_v42 = vpop.f32.mrb[86].mxu1 }
 0x190   : > { %1261 = vst.msk [vmem:[%s2148_s22 + $0x158] sm:$0xff] %vm1217_vm2, %v934_v39  ;;  %v1662_v41 = vpop.f32.mrb[87].mxu0  ;;  %1319 = vst.msk [vmem:[%s2148_s22 + $0x328] sm:$0xff] %vm1217_vm2, %v1166_v42  ;;  %v1778_v43 = vpop.f32.mrb[87].mxu1 }
 0x195   : > { %v939_v44 = vpop.f32.mrb[88].mxu0  ;;  %v1171_v46 = vpop.f32.mrb[88].mxu1 }
 0x196   : > { %1262 = vst.msk [vmem:[%s2148_s22 + $0x160] sm:$0xff] %vm1217_vm2, %v939_v44  ;;  %v1665_v45 = vpop.f32.mrb[89].mxu0  ;;  %1320 = vst.msk [vmem:[%s2148_s22 + $0x330] sm:$0xff] %vm1217_vm2, %v1171_v46  ;;  %v1781_v48 = vpop.f32.mrb[89].mxu1 }
 0x197   : > { %v942_v47 = vpop.f32.mrb[90].mxu0  ;;  %v1174_v50 = vpop.f32.mrb[90].mxu1 }
 0x198   : > { %1263 = vst.msk [vmem:[%s2148_s22 + $0x168] sm:$0xff] %vm1217_vm2, %v942_v47  ;;  %v1666_v49 = vpop.f32.mrb[91].mxu0  ;;  %1321 = vst.msk [vmem:[%s2148_s22 + $0x338] sm:$0xff] %vm1217_vm2, %v1174_v50  ;;  %v1782_v51 = vpop.f32.mrb[91].mxu1 }
 0x19d   : > { %v947_v52 = vpop.f32.mrb[92].mxu0  ;;  %v1179_v54 = vpop.f32.mrb[92].mxu1 }
 0x19e   : > { %1264 = vst.msk [vmem:[%s2148_s22 + $0x170] sm:$0xff] %vm1217_vm2, %v947_v52  ;;  %v1669_v53 = vpop.f32.mrb[93].mxu0  ;;  %1322 = vst.msk [vmem:[%s2148_s22 + $0x340] sm:$0xff] %vm1217_vm2, %v1179_v54  ;;  %v1785_v56 = vpop.f32.mrb[93].mxu1 }
 0x19f   : > { %v950_v55 = vpop.f32.mrb[94].mxu0  ;;  %v1182_v58 = vpop.f32.mrb[94].mxu1 }
 0x1a0   : > { %1265 = vst.msk [vmem:[%s2148_s22 + $0x178] sm:$0xff] %vm1217_vm2, %v950_v55  ;;  %v1670_v57 = vpop.f32.mrb[95].mxu0  ;;  %1323 = vst.msk [vmem:[%s2148_s22 + $0x348] sm:$0xff] %vm1217_vm2, %v1182_v58  ;;  %v1786_v59 = vpop.f32.mrb[95].mxu1 }
 0x1a5   : > { %v955_v60 = vpop.f32.mrb[96].mxu0  ;;  %v1187_v62 = vpop.f32.mrb[96].mxu1 }
 0x1a6   : > { %1266 = vst.msk [vmem:[%s2148_s22 + $0x180] sm:$0xff] %vm1217_vm2, %v955_v60  ;;  %v1673_v61 = vpop.f32.mrb[97].mxu0  ;;  %1324 = vst.msk [vmem:[%s2148_s22 + $0x350] sm:$0xff] %vm1217_vm2, %v1187_v62  ;;  %v1789_v0 = vpop.f32.mrb[97].mxu1 }
 0x1a7   : > { %v958_v63 = vpop.f32.mrb[98].mxu0  ;;  %v1190_v3 = vpop.f32.mrb[98].mxu1 }
 0x1a8   : > { %1267 = vst.msk [vmem:[%s2148_s22 + $0x188] sm:$0xff] %vm1217_vm2, %v958_v63  ;;  %v1674_v2 = vpop.f32.mrb[99].mxu0  ;;  %1325 = vst.msk [vmem:[%s2148_s22 + $0x358] sm:$0xff] %vm1217_vm2, %v1190_v3  ;;  %v1790_v4 = vpop.f32.mrb[99].mxu1 }
 0x1ad   : > { %v963_v5 = vpop.f32.mrb[100].mxu0  ;;  %v1195_v7 = vpop.f32.mrb[100].mxu1 }
 0x1ae   : > { %1268 = vst.msk [vmem:[%s2148_s22 + $0x190] sm:$0xff] %vm1217_vm2, %v963_v5  ;;  %v1677_v6 = vpop.f32.mrb[101].mxu0  ;;  %1326 = vst.msk [vmem:[%s2148_s22 + $0x360] sm:$0xff] %vm1217_vm2, %v1195_v7  ;;  %v1793_v9 = vpop.f32.mrb[101].mxu1 }
 0x1af   : > { %v966_v8 = vpop.f32.mrb[102].mxu0  ;;  %v1198_v11 = vpop.f32.mrb[102].mxu1 }
 0x1b0   : > { %1269 = vst.msk [vmem:[%s2148_s22 + $0x198] sm:$0xff] %vm1217_vm2, %v966_v8  ;;  %v1678_v10 = vpop.f32.mrb[103].mxu0  ;;  %1327 = vst.msk [vmem:[%s2148_s22 + $0x368] sm:$0xff] %vm1217_vm2, %v1198_v11  ;;  %v1794_v1 = vpop.f32.mrb[103].mxu1 }
 0x1b5   : > { %v971_v12 = vpop.f32.mrb[104].mxu0  ;;  %v1203_v14 = vpop.f32.mrb[104].mxu1 }
 0x1b6   : > { %1270 = vst.msk [vmem:[%s2148_s22 + $0x1a0] sm:$0xff] %vm1217_vm2, %v971_v12  ;;  %v1681_v13 = vpop.f32.mrb[105].mxu0  ;;  %1328 = vst.msk [vmem:[%s2148_s22 + $0x370] sm:$0xff] %vm1217_vm2, %v1203_v14  ;;  %v1797_v16 = vpop.f32.mrb[105].mxu1 }
 0x1b7   : > { %v974_v15 = vpop.f32.mrb[106].mxu0  ;;  %v1206_v18 = vpop.f32.mrb[106].mxu1 }
 0x1b8   : > { %1271 = vst.msk [vmem:[%s2148_s22 + $0x1a8] sm:$0xff] %vm1217_vm2, %v974_v15  ;;  %v1682_v17 = vpop.f32.mrb[107].mxu0  ;;  %1329 = vst.msk [vmem:[%s2148_s22 + $0x378] sm:$0xff] %vm1217_vm2, %v1206_v18  ;;  %v1798_v19 = vpop.f32.mrb[107].mxu1 }
 0x1bd   : > { %v979_v20 = vpop.f32.mrb[108].mxu0  ;;  %v1211_v22 = vpop.f32.mrb[108].mxu1 }
 0x1be   : > { %1272 = vst.msk [vmem:[%s2148_s22 + $0x1b0] sm:$0xff] %vm1217_vm2, %v979_v20  ;;  %v1685_v21 = vpop.f32.mrb[109].mxu0  ;;  %v1801_v24 = vpop.f32.mrb[109].mxu1 }
 0x1bf   : > { %v982_v23 = vpop.f32.mrb[110].mxu0  ;;  %1331 = vst.msk [vmem:[%s2148_s22 + $0x380] sm:$0xf] %vm1330_vm3, %v1211_v22  ;;  %v1214_v26 = vpop.f32.mrb[110].mxu1 }
 0x1c0   : > { %1273 = vst.msk [vmem:[%s2148_s22 + $0x1b8] sm:$0xff] %vm1217_vm2, %v982_v23  ;;  %v1686_v25 = vpop.f32.mrb[111].mxu0  ;;  %v1802_v27 = vpop.f32.mrb[111].mxu1 }
 0x1c5   : > { %v987_v28 = vpop.f32.mrb[112].mxu0 }
 0x1c6   : > { %1274 = vst.msk [vmem:[%s2148_s22 + $0x1c0] sm:$0xff] %vm1217_vm2, %v987_v28  ;;  %v1689_v29 = vpop.f32.mrb[113].mxu0 }
 0x1c7   : > { %v990_v30 = vpop.f32.mrb[114].mxu0 }
 0x1c8   : > { %1275 = vst.msk [vmem:[%s2148_s22 + $0x1c8] sm:$0xff] %vm1217_vm2, %v990_v30  ;;  %v1690_v31 = vpop.f32.mrb[115].mxu0 }
 0x1c9 PF: > { %s12_s9 = sadd.s32 1, %s1884_s9  }
 0x1ca   : > { %p9_p4 = scmp.ge.s32.totalorder %s12_s9, 4  }
 0x1cc   :  { %11 = sbr.rel (!%p9_p4) target bundleno = 1 (0x1), region = 58 }

</bundles_post_ra>
